<compile_context>
chip_gen: v7x
topology: tpu7x:2x2x1
jax: 0.10.0
libtpu: 0.0.40
codegen_flags: <defaults>
</compile_context>

<pallas_src>
import functools

import jax
import jax.numpy as jnp
from jax.experimental import pallas as pl
from jax.experimental.pallas import tpu as pltpu

EPS = 1e-5                      # PyTorch BatchNorm2d default eps
LANE = 128                      # channel padding target (lane width)
ROW_TILE = 256                  # row tile; sweep 256-1024 for large inputs
VMEM_LIMIT = 32 * 1024 * 1024   # explicit scoped-VMEM budget (fits v5e..v7x)


# ------------------------------ small helpers ------------------------------ #

def _round_up(n, m):
    return (n + m - 1) // m * m


def _row_tile(m):
    tm = min(ROW_TILE, _round_up(m, 8))
    return _round_up(m, tm), tm


def _pad1d(a, n):
    return jnp.pad(a, (0, n - a.shape[0]))


def _pad2d(a, r, c):
    return jnp.pad(a, ((0, r - a.shape[0]), (0, c - a.shape[1])))


def _cparams(parallel):
    return pltpu.CompilerParams(
        dimension_semantics=(("parallel",) if parallel else ("arbitrary",)),
        vmem_limit_bytes=VMEM_LIMIT)


def _full(shape):
    return pl.BlockSpec(shape, lambda i, n=len(shape): (0,) * n)


def _rows(tm, c):
    return pl.BlockSpec((tm, c), lambda i: (i, 0))


def _scale_shift(stats, gamma, beta, count):
    """Fold batch-norm into per-channel scale/shift (f32)."""
    mean = stats[0] / count
    var = jnp.maximum(stats[1] / count - mean * mean, 0.0)
    scale = gamma * jax.lax.rsqrt(var + EPS)
    shift = beta - mean * scale
    return scale.reshape(1, -1), shift.reshape(1, -1)


# ----------------------------- Pallas kernels ------------------------------ #

def _stats_kernel(x_ref, st_ref):
    """Accumulate per-channel [sum; sum-of-squares] over row tiles."""
    x = x_ref[...].astype(jnp.float32)

    @pl.when(pl.program_id(0) == 0)
    def _():
        st_ref[...] = jnp.zeros_like(st_ref)

    st_ref[...] += jnp.concatenate(
        [jnp.sum(x, axis=0, keepdims=True),
         jnp.sum(x * x, axis=0, keepdims=True)], axis=0)


def _bn0_conv1_kernel(x_ref, s0_ref, t0_ref, w1_ref, *out_refs,
                      write_pre, rows_valid, tm, cdtype):
    """preact = relu(bn0(x)); y1 = preact @ w1; accumulate bn1 statistics."""
    if write_pre:
        y1_ref, pre_ref, st_ref = out_refs
    else:
        y1_ref, st_ref = out_refs
    i = pl.program_id(0)
    pre = jnp.maximum(x_ref[...] * s0_ref[...] + t0_ref[...], 0.0)
    if rows_valid is not None:
        # zero padded rows so bn1 batch statistics stay exact
        row = i * tm + jax.lax.broadcasted_iota(jnp.int32, (tm, 1), 0)
        pre = jnp.where(row < rows_valid, pre, 0.0)
    pre_c = pre.astype(cdtype)
    if write_pre:
        pre_ref[...] = pre_c
    y1 = jnp.dot(pre_c, w1_ref[...], preferred_element_type=jnp.float32)
    y1_ref[...] = y1

    @pl.when(i == 0)
    def _():
        st_ref[...] = jnp.zeros_like(st_ref)

    st_ref[...] += jnp.concatenate(
        [jnp.sum(y1, axis=0, keepdims=True),
         jnp.sum(y1 * y1, axis=0, keepdims=True)], axis=0)


def _bn_relu_kernel(y_ref, s_ref, t_ref, o_ref):
    y = y_ref[...].astype(jnp.float32)
    o_ref[...] = jnp.maximum(y * s_ref[...] + t_ref[...], 0.0).astype(o_ref.dtype)


def _conv3x3_kernel(a_ref, w2_ref, y2_ref, st_ref, *, stride, ho, wo, c):
    """3x3/stride conv as 9 accumulated matmuls over pre-split taps; bn2 stats."""
    acc = jnp.zeros((ho * wo, c), jnp.float32)
    for kh in range(3):
        for kw in range(3):
            t = kw * stride + kh % stride          # which (kw, H-phase) slab
            dh = kh // stride                      # H offset inside the slab
            tap = a_ref[0, t, dh:dh + ho, :, :]    # (ho, wo, c)
            acc += jnp.dot(tap.reshape(ho * wo, c), w2_ref[kh * 3 + kw],
                           preferred_element_type=jnp.float32)
    y2_ref[...] = acc.reshape(1, ho, wo, c).astype(y2_ref.dtype)

    @pl.when(pl.program_id(0) == 0)
    def _():
        st_ref[...] = jnp.zeros_like(st_ref)

    st_ref[...] += jnp.concatenate(
        [jnp.sum(acc, axis=0, keepdims=True),
         jnp.sum(acc * acc, axis=0, keepdims=True)], axis=0)


def _final_proj_kernel(y2_ref, s2_ref, t2_ref, w3_ref, b3_ref,
                       sp_ref, ws_ref, bs_ref, o_ref, *, cdtype):
    r2 = jnp.maximum(y2_ref[...].astype(jnp.float32) * s2_ref[...] + t2_ref[...], 0.0)
    res = jnp.dot(r2.astype(cdtype), w3_ref[...],
                  preferred_element_type=jnp.float32) + b3_ref[...]
    sc = jnp.dot(sp_ref[...], ws_ref[...],
                 preferred_element_type=jnp.float32) + bs_ref[...]
    o_ref[...] = res + sc


def _final_ident_kernel(y2_ref, s2_ref, t2_ref, w3_ref, b3_ref, sc_ref, o_ref,
                        *, cdtype):
    r2 = jnp.maximum(y2_ref[...].astype(jnp.float32) * s2_ref[...] + t2_ref[...], 0.0)
    res = jnp.dot(r2.astype(cdtype), w3_ref[...],
                  preferred_element_type=jnp.float32) + b3_ref[...]
    o_ref[...] = res + sc_ref[...].astype(jnp.float32)   # identity shortcut: plain add


# ---------------------------- pallas_call wrappers -------------------------- #

def _channel_stats(x2d, tm):
    mp, c = x2d.shape
    return pl.pallas_call(
        _stats_kernel,
        out_shape=jax.ShapeDtypeStruct((2, c), jnp.float32),
        grid=(mp // tm,),
        in_specs=[_rows(tm, c)],
        out_specs=_full((2, c)),
        compiler_params=_cparams(False),
    )(x2d)


def _bn0_conv1(x2d, scale0, shift0, w1, tm, rows_true, write_pre, cdt):
    mp, cin_p = x2d.shape
    cmid_p = w1.shape[1]
    out_shape = [jax.ShapeDtypeStruct((mp, cmid_p), jnp.float32)]
    out_specs = [_rows(tm, cmid_p)]
    if write_pre:
        out_shape.append(jax.ShapeDtypeStruct((mp, cin_p), cdt))
        out_specs.append(_rows(tm, cin_p))
    out_shape.append(jax.ShapeDtypeStruct((2, cmid_p), jnp.float32))
    out_specs.append(_full((2, cmid_p)))
    kernel = functools.partial(
        _bn0_conv1_kernel, write_pre=write_pre,
        rows_valid=(rows_true if mp > rows_true else None), tm=tm, cdtype=cdt)
    outs = pl.pallas_call(
        kernel,
        out_shape=tuple(out_shape),
        grid=(mp // tm,),
        in_specs=[_rows(tm, cin_p), _full((1, cin_p)), _full((1, cin_p)),
                  _full((cin_p, cmid_p))],
        out_specs=tuple(out_specs),
        compiler_params=_cparams(False),
    )(x2d, scale0, shift0, w1)
    if write_pre:
        return outs[0], outs[1], outs[2]
    return outs[0], None, outs[1]


def _bn_relu_apply(y2d, scale, shift, tm, out_dtype):
    mp, c = y2d.shape
    return pl.pallas_call(
        _bn_relu_kernel,
        out_shape=jax.ShapeDtypeStruct((mp, c), out_dtype),
        grid=(mp // tm,),
        in_specs=[_rows(tm, c), _full((1, c)), _full((1, c))],
        out_specs=_rows(tm, c),
        compiler_params=_cparams(True),
    )(y2d, scale, shift)


def _conv3x3(a, w2, stride, ho, wo):
    n, ts, hq, _, c = a.shape
    kernel = functools.partial(_conv3x3_kernel, stride=stride, ho=ho, wo=wo, c=c)
    return pl.pallas_call(
        kernel,
        out_shape=(jax.ShapeDtypeStruct((n, ho, wo, c), jnp.float32),
                   jax.ShapeDtypeStruct((2, c), jnp.float32)),
        grid=(n,),
        in_specs=[pl.BlockSpec((1, ts, hq, wo, c), lambda i: (i, 0, 0, 0, 0)),
                  _full((9, c, c))],
        out_specs=(pl.BlockSpec((1, ho, wo, c), lambda i: (i, 0, 0, 0)),
                   _full((2, c))),
        compiler_params=_cparams(False),
    )(a, w2)


def _final_proj(y2, s2, t2, w3, b3, sp, ws, bs, tm, cdt):
    mp, cmid_p = y2.shape
    cin_p, cout_p = ws.shape
    kernel = functools.partial(_final_proj_kernel, cdtype=cdt)
    return pl.pallas_call(
        kernel,
        out_shape=jax.ShapeDtypeStruct((mp, cout_p), jnp.float32),
        grid=(mp // tm,),
        in_specs=[_rows(tm, cmid_p), _full((1, cmid_p)), _full((1, cmid_p)),
                  _full((cmid_p, cout_p)), _full((1, cout_p)),
                  _rows(tm, cin_p), _full((cin_p, cout_p)), _full((1, cout_p))],
        out_specs=_rows(tm, cout_p),
        compiler_params=_cparams(True),
    )(y2, s2, t2, w3, b3, sp, ws, bs)


def _final_ident(y2, s2, t2, w3, b3, sc, tm, cdt):
    mp, cmid_p = y2.shape
    cout_p = w3.shape[1]
    kernel = functools.partial(_final_ident_kernel, cdtype=cdt)
    return pl.pallas_call(
        kernel,
        out_shape=jax.ShapeDtypeStruct((mp, cout_p), jnp.float32),
        grid=(mp // tm,),
        in_specs=[_rows(tm, cmid_p), _full((1, cmid_p)), _full((1, cmid_p)),
                  _full((cmid_p, cout_p)), _full((1, cout_p)),
                  _rows(tm, cout_p)],
        out_specs=_rows(tm, cout_p),
        compiler_params=_cparams(True),
    )(y2, s2, t2, w3, b3, sc)


# ------------------------------ module wrapper ------------------------------ #

def init_params(key, cin, cout):
    """Deterministic synthetic parameters, PyTorch shapes from __init__."""
    cmid = cout // 4  # expansion = 4
    ks = jax.random.split(key, 16)
    n = lambda k, shp, s=0.1: s * jax.random.normal(k, shp, jnp.float32)
    p = {
        "g0": 1.0 + n(ks[0], (cin,)),  "b0": n(ks[1], (cin,)),
        "w1": n(ks[2], (cmid, cin, 1, 1)),
        "g1": 1.0 + n(ks[3], (cmid,)), "b1": n(ks[4], (cmid,)),
        "w2": n(ks[5], (cmid, cmid, 3, 3)),
        "g2": 1.0 + n(ks[6], (cmid,)), "b2": n(ks[7], (cmid,)),
        "w3": n(ks[8], (cout, cmid, 1, 1)), "b3": n(ks[9], (cout,)),
    }
    if cin != cout:
        p["ws"] = n(ks[10], (cout, cin, 1, 1))
        p["bs"] = n(ks[11], (cout,))
    return p


@functools.partial(jax.jit, static_argnames=("stride", "compute_dtype"))
def bottleneck_v2_forward(x_nchw, p, *, stride, compute_dtype=jnp.bfloat16):
    s = int(stride)
    cdt = compute_dtype
    N, cin, H, W = x_nchw.shape
    cout, cmid = p["w3"].shape[0], p["w3"].shape[1]
    cin_p, cmid_p, cout_p = (_round_up(c, LANE) for c in (cin, cmid, cout))
    has_proj = cin != cout
    Ho, Wo = (H - 1) // s + 1, (W - 1) // s + 1
    M, Mo = N * H * W, N * Ho * Wo
    Mp, TM = _row_tile(M)
    Mop, TMo = _row_tile(Mo)

    # ---- inputs / parameters, lane-dense (channel padded) layouts ----
    x = jnp.transpose(x_nchw, (0, 2, 3, 1)).astype(jnp.float32)          # NHWC
    xp = jnp.pad(x, ((0, 0), (0, 0), (0, 0), (0, cin_p - cin)))
    x2d = jnp.pad(xp.reshape(M, cin_p), ((0, Mp - M), (0, 0)))

    g0, b0 = _pad1d(p["g0"], cin_p), _pad1d(p["b0"], cin_p)
    g1, b1 = _pad1d(p["g1"], cmid_p), _pad1d(p["b1"], cmid_p)
    g2, b2 = _pad1d(p["g2"], cmid_p), _pad1d(p["b2"], cmid_p)
    w1 = _pad2d(p["w1"].reshape(cmid, cin).T, cin_p, cmid_p).astype(cdt)
    w2 = jnp.transpose(p["w2"], (2, 3, 1, 0))                            # kh,kw,ci,co
    w2 = jnp.pad(w2, ((0, 0), (0, 0), (0, cmid_p - cmid), (0, cmid_p - cmid)))
    w2 = w2.reshape(9, cmid_p, cmid_p).astype(cdt)
    w3 = _pad2d(p["w3"].reshape(cout, cmid).T, cmid_p, cout_p).astype(cdt)
    b3 = _pad1d(p["b3"], cout_p).reshape(1, cout_p).astype(jnp.float32)

    # ---- 1) bn0 statistics over x (row-tiled reduction) ----
    st0 = _channel_stats(x2d, TM)
    sc0, sh0 = _scale_shift(st0, g0, b0, M)

    # ---- 2) bn0 apply + ReLU + conv1 (1x1) + bn1 statistics (fused) ----
    # preact is only written back to HBM when the projection shortcut needs it.
    y1, pre2d, st1 = _bn0_conv1(x2d, sc0, sh0, w1, TM, M, has_proj, cdt)
    sc1, sh1 = _scale_shift(st1, g1, b1, M)

    # ---- 3) bn1 apply + ReLU ----
    r1_2d = _bn_relu_apply(y1, sc1, sh1, TM, cdt)

    # ---- 4) glue: spatial pad + per-(kw, H-phase) tap views of r1 ----
    # 3*s strided views (~3x r1 bytes) instead of a 9x im2col expansion; the
    # conv kernel then only slices the plane-granular H axis.
    r1 = r1_2d[:M].reshape(N, H, W, cmid_p)
    Hq = Ho + 2 // s
    Hpad, Wpad = s * Hq, s * (Wo - 1) + 3
    r1p = jnp.pad(r1, ((0, 0), (1, Hpad - H - 1), (1, Wpad - W - 1), (0, 0)))
    taps = [r1p[:, ph:ph + s * (Hq - 1) + 1:s, kw:kw + s * (Wo - 1) + 1:s, :]
            for kw in range(3) for ph in range(s)]
    a = jnp.stack(taps, axis=1)                       # (N, 3*s, Hq, Wo, cmid_p)

    # ---- 5) conv2 (3x3, stride s) as 9 accumulated MXU matmuls + bn2 stats ----
    y2, st2 = _conv3x3(a, w2, s, Ho, Wo)
    sc2, sh2 = _scale_shift(st2, g2, b2, Mo)

    # ---- 6) bn2 apply + ReLU + conv3 (1x1, bias) + shortcut add ----
    y2_2d = jnp.pad(y2.reshape(Mo, cmid_p), ((0, Mop - Mo), (0, 0)))
    if has_proj:
        ws = _pad2d(p["ws"].reshape(cout, cin).T, cin_p, cout_p).astype(cdt)
        bs = _pad1d(p["bs"], cout_p).reshape(1, cout_p).astype(jnp.float32)
        sp = pre2d[:M].reshape(N, H, W, cin_p)[:, ::s, ::s, :].reshape(Mo, cin_p)
        sp = jnp.pad(sp, ((0, Mop - Mo), (0, 0)))
        out2d = _final_proj(y2_2d, sc2, sh2, w3, b3, sp, ws, bs, TMo, cdt)
    else:
        sc = xp[:, ::s, ::s, :].reshape(Mo, cout_p)   # maxpool(k=1, stride) of x
        sc = jnp.pad(sc, ((0, Mop - Mo), (0, 0)))
        out2d = _final_ident(y2_2d, sc2, sh2, w3, b3, sc, TMo, cdt)

    out = out2d[:Mo, :cout].reshape(N, Ho, Wo, cout)
    return jnp.transpose(out, (0, 3, 1, 2))           # back to NCHW


# ------------------------------ pure-JAX reference -------------------------- #

def reference(x, p, stride):
    cin, cout = x.shape[1], p["w3"].shape[0]
    x = x.astype(jnp.float32)

    def bn(t, g, b):
        mu = t.mean(axis=(0, 2, 3), keepdims=True)
        var = jnp.square(t - mu).mean(axis=(0, 2, 3), keepdims=True)
        return g.reshape(1, -1, 1, 1) * (t - mu) / jnp.sqrt(var + EPS) + b.reshape(1, -1, 1, 1)

    def conv(t, w, b=None, st=1, pad=0):
        o = jax.lax.conv_general_dilated(
            t, w, (st, st), [(pad, pad), (pad, pad)],
            dimension_numbers=("NCHW", "OIHW", "NCHW"),
            precision=jax.lax.Precision.HIGHEST)
        return o if b is None else o + b.reshape(1, -1, 1, 1)

    relu = lambda t: jnp.maximum(t, 0.0)
    preact = relu(bn(x, p["g0"], p["b0"]))
    if cin != cout:
        sc = conv(preact, p["ws"], p["bs"], st=stride)
    else:
        sc = x[:, :, ::stride, ::stride]
    r = relu(bn(conv(preact, p["w1"]), p["g1"], p["b1"]))
    r = relu(bn(conv(r, p["w2"], st=stride, pad=1), p["g2"], p["b2"]))
    r = conv(r, p["w3"], p["b3"])
    return sc + r


if __name__ == "__main__":
    key = jax.random.PRNGKey(0)
    kx, kx2, kp1, kp2 = jax.random.split(key, 4)

    # Case 1: projection shortcut (cin != cout), stride 2
    N, cin, H, W = 2, 8, 16, 16
    cout, stride = 16, 2
    x = jax.random.normal(kx, (N, cin, H, W), jnp.float32)
    params = init_params(kp1, cin, cout)
    ref = reference(x, params, stride)

    out_f32 = jax.block_until_ready(
        bottleneck_v2_forward(x, params, stride=stride, compute_dtype=jnp.float32))
    assert out_f32.shape == (N, cout, H // stride, W // stride), out_f32.shape
    assert jnp.allclose(out_f32, ref, rtol=5e-3, atol=5e-3), \
        float(jnp.max(jnp.abs(out_f32 - ref)))

    # bf16 MXU operands (f32 accumulation / f32 BN stats) vs all-f32 reference:
    # expected deviation ~2^-9 operand rounding amplified by batch-norm.
    out_bf16 = jax.block_until_ready(
        bottleneck_v2_forward(x, params, stride=stride, compute_dtype=jnp.bfloat16))
    assert jnp.allclose(out_bf16, ref, rtol=2e-2, atol=2e-2), \
        float(jnp.max(jnp.abs(out_bf16 - ref)))

    # Case 2: identity (maxpool k=1) shortcut (cin == cout), stride 1
    cin2 = cout2 = 16
    x2 = jax.random.normal(kx2, (N, cin2, H, W), jnp.float32)
    params2 = init_params(kp2, cin2, cout2)
    ref2 = reference(x2, params2, 1)

    out2_f32 = jax.block_until_ready(
        bottleneck_v2_forward(x2, params2, stride=1, compute_dtype=jnp.float32))
    assert out2_f32.shape == (N, cout2, H, W), out2_f32.shape
    assert jnp.allclose(out2_f32, ref2, rtol=5e-3, atol=5e-3), \
        float(jnp.max(jnp.abs(out2_f32 - ref2)))

    out2_bf16 = jax.block_until_ready(
        bottleneck_v2_forward(x2, params2, stride=1, compute_dtype=jnp.bfloat16))
    assert jnp.allclose(out2_bf16, ref2, rtol=2e-2, atol=2e-2), \
        float(jnp.max(jnp.abs(out2_bf16 - ref2)))

    print("KERNEL_OK")
</pallas_src>

<mosaic_0001>
module attributes {stable_mosaic.version = 11 : i64} {
  func.func @_stats_kernel(%arg0: i32, %arg1: memref<256x128xf32, #tpu.memory_space<vmem>>, %arg2: memref<2x128xf32, #tpu.memory_space<vmem>>) attributes {dimension_semantics = [#tpu.dimension_semantics<arbitrary>], iteration_bounds = array<i64: 2>, scalar_prefetch = 0 : i64, scratch_operands = 0 : i64, tpu.core_type = #tpu.core_type<tc>, window_params = [{transform_indices = @transform_0, window_bounds = array<i64: 256, 128>}, {pipeline_mode = #tpu.pipeline_mode<synchronous>, transform_indices = @transform_1, window_bounds = array<i64: 2, 128>}]} {
    %c0 = arith.constant 0 : index
    %c0_0 = arith.constant 0 : index
    %0 = vector.load %arg1[%c0, %c0_0] : memref<256x128xf32, #tpu.memory_space<vmem>>, vector<256x128xf32>
    %c0_i32 = arith.constant 0 : i32
    %1 = arith.cmpi eq, %arg0, %c0_i32 : i32
    %2 = arith.extui %1 : i1 to i32
    %c0_i32_1 = arith.constant 0 : i32
    %3 = arith.cmpi ne, %2, %c0_i32_1 : i32
    scf.if %3 {
      %cst_7 = arith.constant 0.000000e+00 : f32
      %13 = vector.broadcast %cst_7 : f32 to vector<2x128xf32>
      %c0_8 = arith.constant 0 : index
      %c0_9 = arith.constant 0 : index
      %14 = vector.load %arg2[%c0_8, %c0_9] : memref<2x128xf32, #tpu.memory_space<vmem>>, vector<2x128xf32>
      tpu.vector_store %arg2[%c0_8, %c0_9], %13 {strides = array<i32>} : memref<2x128xf32, #tpu.memory_space<vmem>>, vector<2x128xf32>,
    } else {
    }
    %c0_2 = arith.constant 0 : index
    %c0_3 = arith.constant 0 : index
    %4 = vector.load %arg2[%c0_2, %c0_3] : memref<2x128xf32, #tpu.memory_space<vmem>>, vector<2x128xf32>
    %cst = arith.constant dense<0.000000e+00> : vector<128xf32>
    %5 = vector.multi_reduction <add>, %0, %cst [0] : vector<256x128xf32> to vector<128xf32>
    %6 = vector.shape_cast %5 : vector<128xf32> to vector<1x128xf32>
    %7 = arith.mulf %0, %0 : vector<256x128xf32>
    %cst_4 = arith.constant dense<0.000000e+00> : vector<128xf32>
    %8 = vector.multi_reduction <add>, %7, %cst_4 [0] : vector<256x128xf32> to vector<128xf32>
    %9 = vector.shape_cast %8 : vector<128xf32> to vector<1x128xf32>
    %10 = tpu.concatenate %6, %9 in 0 : vector<1x128xf32>, vector<1x128xf32> -> vector<2x128xf32>
    %11 = arith.addf %4, %10 : vector<2x128xf32>
    %c0_5 = arith.constant 0 : index
    %c0_6 = arith.constant 0 : index
    %12 = vector.load %arg2[%c0_5, %c0_6] : memref<2x128xf32, #tpu.memory_space<vmem>>, vector<2x128xf32>
    tpu.vector_store %arg2[%c0_5, %c0_6], %11 {strides = array<i32>} : memref<2x128xf32, #tpu.memory_space<vmem>>, vector<2x128xf32>,
    return
  }
  func.func @transform_0(%arg0: i32) -> (i32, i32) {
    %c0_i32 = arith.constant 0 : i32
    %c0_i32_0 = arith.constant 0 : i32
    return %arg0, %c0_i32 : i32, i32
  }
  func.func @transform_1(%arg0: i32) -> (i32, i32) {
    %c0_i32 = arith.constant 0 : i32
    %c0_i32_0 = arith.constant 0 : i32
    %c0_i32_1 = arith.constant 0 : i32
    return %c0_i32, %c0_i32_0 : i32, i32
  }
}

module attributes {stable_mosaic.version = 11 : i64} {
  func.func @_bn0_conv1_kernel(%arg0: i32, %arg1: memref<256x128xf32, #tpu.memory_space<vmem>>, %arg2: memref<1x128xf32, #tpu.memory_space<vmem>>, %arg3: memref<1x128xf32, #tpu.memory_space<vmem>>, %arg4: memref<128x128xf32, #tpu.memory_space<vmem>>, %arg5: memref<256x128xf32, #tpu.memory_space<vmem>>, %arg6: memref<256x128xf32, #tpu.memory_space<vmem>>, %arg7: memref<2x128xf32, #tpu.memory_space<vmem>>) attributes {dimension_semantics = [#tpu.dimension_semantics<arbitrary>], iteration_bounds = array<i64: 2>, scalar_prefetch = 0 : i64, scratch_operands = 0 : i64, tpu.core_type = #tpu.core_type<tc>, window_params = [{transform_indices = @transform_0, window_bounds = array<i64: 256, 128>}, {pipeline_mode = #tpu.pipeline_mode<synchronous>, transform_indices = @transform_1, window_bounds = array<i64: 1, 128>}, {pipeline_mode = #tpu.pipeline_mode<synchronous>, transform_indices = @transform_2, window_bounds = array<i64: 1, 128>}, {pipeline_mode = #tpu.pipeline_mode<synchronous>, transform_indices = @transform_3, window_bounds = array<i64: 128, 128>}, {transform_indices = @transform_4, window_bounds = array<i64: 256, 128>}, {transform_indices = @transform_5, window_bounds = array<i64: 256, 128>}, {pipeline_mode = #tpu.pipeline_mode<synchronous>, transform_indices = @transform_6, window_bounds = array<i64: 2, 128>}]} {
    %c0 = arith.constant 0 : index
    %c0_0 = arith.constant 0 : index
    %0 = vector.load %arg1[%c0, %c0_0] : memref<256x128xf32, #tpu.memory_space<vmem>>, vector<256x128xf32>
    %c0_1 = arith.constant 0 : index
    %c0_2 = arith.constant 0 : index
    %1 = vector.load %arg2[%c0_1, %c0_2] : memref<1x128xf32, #tpu.memory_space<vmem>>, vector<1x128xf32>
    %2 = vector.broadcast %1 : vector<1x128xf32> to vector<256x128xf32>
    %3 = arith.mulf %0, %2 : vector<256x128xf32>
    %c0_3 = arith.constant 0 : index
    %c0_4 = arith.constant 0 : index
    %4 = vector.load %arg3[%c0_3, %c0_4] : memref<1x128xf32, #tpu.memory_space<vmem>>, vector<1x128xf32>
    %5 = vector.broadcast %4 : vector<1x128xf32> to vector<256x128xf32>
    %6 = arith.addf %3, %5 : vector<256x128xf32>
    %cst = arith.constant 0.000000e+00 : f32
    %7 = vector.broadcast %cst : f32 to vector<256x128xf32>
    %8 = arith.maximumf %6, %7 : vector<256x128xf32>
    %c0_5 = arith.constant 0 : index
    %c0_6 = arith.constant 0 : index
    %9 = vector.load %arg6[%c0_5, %c0_6] : memref<256x128xf32, #tpu.memory_space<vmem>>, vector<256x128xf32>
    tpu.vector_store %arg6[%c0_5, %c0_6], %8 {strides = array<i32>} : memref<256x128xf32, #tpu.memory_space<vmem>>, vector<256x128xf32>,
    %c0_7 = arith.constant 0 : index
    %c0_8 = arith.constant 0 : index
    %10 = vector.load %arg4[%c0_7, %c0_8] : memref<128x128xf32, #tpu.memory_space<vmem>>, vector<128x128xf32>
    %cst_9 = arith.constant dense<0.000000e+00> : vector<256x128xf32>
    %11 = tpu.matmul %8, %10, %cst_9 {dimension_numbers = #tpu.dot_dimension_numbers<[1], [0], [0], [1], [0, 0, 1, 1], [], []>} : vector<256x128xf32>, vector<128x128xf32>, vector<256x128xf32> -> vector<256x128xf32>
    %c0_10 = arith.constant 0 : index
    %c0_11 = arith.constant 0 : index
    %12 = vector.load %arg5[%c0_10, %c0_11] : memref<256x128xf32, #tpu.memory_space<vmem>>, vector<256x128xf32>
    tpu.vector_store %arg5[%c0_10, %c0_11], %11 {strides = array<i32>} : memref<256x128xf32, #tpu.memory_space<vmem>>, vector<256x128xf32>,
    %c0_i32 = arith.constant 0 : i32
    %13 = arith.cmpi eq, %arg0, %c0_i32 : i32
    %14 = arith.extui %13 : i1 to i32
    %c0_i32_12 = arith.constant 0 : i32
    %15 = arith.cmpi ne, %14, %c0_i32_12 : i32
    scf.if %15 {
      %cst_19 = arith.constant 0.000000e+00 : f32
      %25 = vector.broadcast %cst_19 : f32 to vector<2x128xf32>
      %c0_20 = arith.constant 0 : index
      %c0_21 = arith.constant 0 : index
      %26 = vector.load %arg7[%c0_20, %c0_21] : memref<2x128xf32, #tpu.memory_space<vmem>>, vector<2x128xf32>
      tpu.vector_store %arg7[%c0_20, %c0_21], %25 {strides = array<i32>} : memref<2x128xf32, #tpu.memory_space<vmem>>, vector<2x128xf32>,
    } else {
    }
    %c0_13 = arith.constant 0 : index
    %c0_14 = arith.constant 0 : index
    %16 = vector.load %arg7[%c0_13, %c0_14] : memref<2x128xf32, #tpu.memory_space<vmem>>, vector<2x128xf32>
    %cst_15 = arith.constant dense<0.000000e+00> : vector<128xf32>
    %17 = vector.multi_reduction <add>, %11, %cst_15 [0] : vector<256x128xf32> to vector<128xf32>
    %18 = vector.shape_cast %17 : vector<128xf32> to vector<1x128xf32>
    %19 = arith.mulf %11, %11 : vector<256x128xf32>
    %cst_16 = arith.constant dense<0.000000e+00> : vector<128xf32>
    %20 = vector.multi_reduction <add>, %19, %cst_16 [0] : vector<256x128xf32> to vector<128xf32>
    %21 = vector.shape_cast %20 : vector<128xf32> to vector<1x128xf32>
    %22 = tpu.concatenate %18, %21 in 0 : vector<1x128xf32>, vector<1x128xf32> -> vector<2x128xf32>
    %23 = arith.addf %16, %22 : vector<2x128xf32>
    %c0_17 = arith.constant 0 : index
    %c0_18 = arith.constant 0 : index
    %24 = vector.load %arg7[%c0_17, %c0_18] : memref<2x128xf32, #tpu.memory_space<vmem>>, vector<2x128xf32>
    tpu.vector_store %arg7[%c0_17, %c0_18], %23 {strides = array<i32>} : memref<2x128xf32, #tpu.memory_space<vmem>>, vector<2x128xf32>,
    return
  }
  func.func @transform_0(%arg0: i32) -> (i32, i32) {
    %c0_i32 = arith.constant 0 : i32
    %c0_i32_0 = arith.constant 0 : i32
    return %arg0, %c0_i32 : i32, i32
  }
  func.func @transform_1(%arg0: i32) -> (i32, i32) {
    %c0_i32 = arith.constant 0 : i32
    %c0_i32_0 = arith.constant 0 : i32
    %c0_i32_1 = arith.constant 0 : i32
    return %c0_i32, %c0_i32_0 : i32, i32
  }
  func.func @transform_2(%arg0: i32) -> (i32, i32) {
    %c0_i32 = arith.constant 0 : i32
    %c0_i32_0 = arith.constant 0 : i32
    %c0_i32_1 = arith.constant 0 : i32
    return %c0_i32, %c0_i32_0 : i32, i32
  }
  func.func @transform_3(%arg0: i32) -> (i32, i32) {
    %c0_i32 = arith.constant 0 : i32
    %c0_i32_0 = arith.constant 0 : i32
    %c0_i32_1 = arith.constant 0 : i32
    return %c0_i32, %c0_i32_0 : i32, i32
  }
  func.func @transform_4(%arg0: i32) -> (i32, i32) {
    %c0_i32 = arith.constant 0 : i32
    %c0_i32_0 = arith.constant 0 : i32
    return %arg0, %c0_i32 : i32, i32
  }
  func.func @transform_5(%arg0: i32) -> (i32, i32) {
    %c0_i32 = arith.constant 0 : i32
    %c0_i32_0 = arith.constant 0 : i32
    return %arg0, %c0_i32 : i32, i32
  }
  func.func @transform_6(%arg0: i32) -> (i32, i32) {
    %c0_i32 = arith.constant 0 : i32
    %c0_i32_0 = arith.constant 0 : i32
    %c0_i32_1 = arith.constant 0 : i32
    return %c0_i32, %c0_i32_0 : i32, i32
  }
}

module attributes {stable_mosaic.version = 11 : i64} {
  func.func @_bn_relu_kernel(%arg0: i32, %arg1: memref<256x128xf32, #tpu.memory_space<vmem>>, %arg2: memref<1x128xf32, #tpu.memory_space<vmem>>, %arg3: memref<1x128xf32, #tpu.memory_space<vmem>>, %arg4: memref<256x128xf32, #tpu.memory_space<vmem>>) attributes {dimension_semantics = [#tpu.dimension_semantics<parallel>], iteration_bounds = array<i64: 2>, scalar_prefetch = 0 : i64, scratch_operands = 0 : i64, tpu.core_type = #tpu.core_type<tc>, window_params = [{transform_indices = @transform_0, window_bounds = array<i64: 256, 128>}, {pipeline_mode = #tpu.pipeline_mode<synchronous>, transform_indices = @transform_1, window_bounds = array<i64: 1, 128>}, {pipeline_mode = #tpu.pipeline_mode<synchronous>, transform_indices = @transform_2, window_bounds = array<i64: 1, 128>}, {transform_indices = @transform_3, window_bounds = array<i64: 256, 128>}]} {
    %c0 = arith.constant 0 : index
    %c0_0 = arith.constant 0 : index
    %0 = vector.load %arg1[%c0, %c0_0] : memref<256x128xf32, #tpu.memory_space<vmem>>, vector<256x128xf32>
    %c0_1 = arith.constant 0 : index
    %c0_2 = arith.constant 0 : index
    %1 = vector.load %arg2[%c0_1, %c0_2] : memref<1x128xf32, #tpu.memory_space<vmem>>, vector<1x128xf32>
    %2 = vector.broadcast %1 : vector<1x128xf32> to vector<256x128xf32>
    %3 = arith.mulf %0, %2 : vector<256x128xf32>
    %c0_3 = arith.constant 0 : index
    %c0_4 = arith.constant 0 : index
    %4 = vector.load %arg3[%c0_3, %c0_4] : memref<1x128xf32, #tpu.memory_space<vmem>>, vector<1x128xf32>
    %5 = vector.broadcast %4 : vector<1x128xf32> to vector<256x128xf32>
    %6 = arith.addf %3, %5 : vector<256x128xf32>
    %cst = arith.constant 0.000000e+00 : f32
    %7 = vector.broadcast %cst : f32 to vector<256x128xf32>
    %8 = arith.maximumf %6, %7 : vector<256x128xf32>
    %c0_5 = arith.constant 0 : index
    %c0_6 = arith.constant 0 : index
    %9 = vector.load %arg4[%c0_5, %c0_6] : memref<256x128xf32, #tpu.memory_space<vmem>>, vector<256x128xf32>
    tpu.vector_store %arg4[%c0_5, %c0_6], %8 {strides = array<i32>} : memref<256x128xf32, #tpu.memory_space<vmem>>, vector<256x128xf32>,
    return
  }
  func.func @transform_0(%arg0: i32) -> (i32, i32) {
    %c0_i32 = arith.constant 0 : i32
    %c0_i32_0 = arith.constant 0 : i32
    return %arg0, %c0_i32 : i32, i32
  }
  func.func @transform_1(%arg0: i32) -> (i32, i32) {
    %c0_i32 = arith.constant 0 : i32
    %c0_i32_0 = arith.constant 0 : i32
    %c0_i32_1 = arith.constant 0 : i32
    return %c0_i32, %c0_i32_0 : i32, i32
  }
  func.func @transform_2(%arg0: i32) -> (i32, i32) {
    %c0_i32 = arith.constant 0 : i32
    %c0_i32_0 = arith.constant 0 : i32
    %c0_i32_1 = arith.constant 0 : i32
    return %c0_i32, %c0_i32_0 : i32, i32
  }
  func.func @transform_3(%arg0: i32) -> (i32, i32) {
    %c0_i32 = arith.constant 0 : i32
    %c0_i32_0 = arith.constant 0 : i32
    return %arg0, %c0_i32 : i32, i32
  }
}

module attributes {stable_mosaic.version = 11 : i64} {
  func.func @_conv3x3_kernel(%arg0: i32, %arg1: memref<1x6x9x8x128xf32, #tpu.memory_space<vmem>>, %arg2: memref<9x128x128xf32, #tpu.memory_space<vmem>>, %arg3: memref<1x8x8x128xf32, #tpu.memory_space<vmem>>, %arg4: memref<2x128xf32, #tpu.memory_space<vmem>>) attributes {dimension_semantics = [#tpu.dimension_semantics<arbitrary>], iteration_bounds = array<i64: 2>, scalar_prefetch = 0 : i64, scratch_operands = 0 : i64, tpu.core_type = #tpu.core_type<tc>, window_params = [{transform_indices = @transform_0, window_bounds = array<i64: 1, 6, 9, 8, 128>}, {pipeline_mode = #tpu.pipeline_mode<synchronous>, transform_indices = @transform_1, window_bounds = array<i64: 9, 128, 128>}, {transform_indices = @transform_2, window_bounds = array<i64: 1, 8, 8, 128>}, {pipeline_mode = #tpu.pipeline_mode<synchronous>, transform_indices = @transform_3, window_bounds = array<i64: 2, 128>}]} {
    %cst = arith.constant 0.000000e+00 : f32
    %0 = vector.broadcast %cst : f32 to vector<64x128xf32>
    %c0 = arith.constant 0 : index
    %c0_0 = arith.constant 0 : index
    %c0_1 = arith.constant 0 : index
    %c0_2 = arith.constant 0 : index
    %c0_3 = arith.constant 0 : index
    %1 = vector.load %arg1[%c0, %c0_0, %c0_1, %c0_2, %c0_3] : memref<1x6x9x8x128xf32, #tpu.memory_space<vmem>>, vector<1x1x8x8x128xf32>
    %2 = vector.shape_cast %1 : vector<1x1x8x8x128xf32> to vector<8x8x128xf32>
    %3 = vector.shape_cast %2 : vector<8x8x128xf32> to vector<64x128xf32>
    %c0_4 = arith.constant 0 : index
    %c0_5 = arith.constant 0 : index
    %c0_6 = arith.constant 0 : index
    %4 = vector.load %arg2[%c0_4, %c0_5, %c0_6] : memref<9x128x128xf32, #tpu.memory_space<vmem>>, vector<1x128x128xf32>
    %5 = vector.shape_cast %4 : vector<1x128x128xf32> to vector<128x128xf32>
    %cst_7 = arith.constant dense<0.000000e+00> : vector<64x128xf32>
    %6 = tpu.matmul %3, %5, %cst_7 {dimension_numbers = #tpu.dot_dimension_numbers<[1], [0], [0], [1], [0, 0, 1, 1], [], []>} : vector<64x128xf32>, vector<128x128xf32>, vector<64x128xf32> -> vector<64x128xf32>
    %7 = arith.addf %0, %6 : vector<64x128xf32>
    %c0_8 = arith.constant 0 : index
    %c2 = arith.constant 2 : index
    %c0_9 = arith.constant 0 : index
    %c0_10 = arith.constant 0 : index
    %c0_11 = arith.constant 0 : index
    %8 = vector.load %arg1[%c0_8, %c2, %c0_9, %c0_10, %c0_11] : memref<1x6x9x8x128xf32, #tpu.memory_space<vmem>>, vector<1x1x8x8x128xf32>
    %9 = vector.shape_cast %8 : vector<1x1x8x8x128xf32> to vector<8x8x128xf32>
    %10 = vector.shape_cast %9 : vector<8x8x128xf32> to vector<64x128xf32>
    %c1 = arith.constant 1 : index
    %c0_12 = arith.constant 0 : index
    %c0_13 = arith.constant 0 : index
    %11 = vector.load %arg2[%c1, %c0_12, %c0_13] : memref<9x128x128xf32, #tpu.memory_space<vmem>>, vector<1x128x128xf32>
    %12 = vector.shape_cast %11 : vector<1x128x128xf32> to vector<128x128xf32>
    %cst_14 = arith.constant dense<0.000000e+00> : vector<64x128xf32>
    %13 = tpu.matmul %10, %12, %cst_14 {dimension_numbers = #tpu.dot_dimension_numbers<[1], [0], [0], [1], [0, 0, 1, 1], [], []>} : vector<64x128xf32>, vector<128x128xf32>, vector<64x128xf32> -> vector<64x128xf32>
    %14 = arith.addf %7, %13 : vector<64x128xf32>
    %c0_15 = arith.constant 0 : index
    %c4 = arith.constant 4 : index
    %c0_16 = arith.constant 0 : index
    %c0_17 = arith.constant 0 : index
    %c0_18 = arith.constant 0 : index
    %15 = vector.load %arg1[%c0_15, %c4, %c0_16, %c0_17, %c0_18] : memref<1x6x9x8x128xf32, #tpu.memory_space<vmem>>, vector<1x1x8x8x128xf32>
    %16 = vector.shape_cast %15 : vector<1x1x8x8x128xf32> to vector<8x8x128xf32>
    %17 = vector.shape_cast %16 : vector<8x8x128xf32> to vector<64x128xf32>
    %c2_19 = arith.constant 2 : index
    %c0_20 = arith.constant 0 : index
    %c0_21 = arith.constant 0 : index
    %18 = vector.load %arg2[%c2_19, %c0_20, %c0_21] : memref<9x128x128xf32, #tpu.memory_space<vmem>>, vector<1x128x128xf32>
    %19 = vector.shape_cast %18 : vector<1x128x128xf32> to vector<128x128xf32>
    %cst_22 = arith.constant dense<0.000000e+00> : vector<64x128xf32>
    %20 = tpu.matmul %17, %19, %cst_22 {dimension_numbers = #tpu.dot_dimension_numbers<[1], [0], [0], [1], [0, 0, 1, 1], [], []>} : vector<64x128xf32>, vector<128x128xf32>, vector<64x128xf32> -> vector<64x128xf32>
    %21 = arith.addf %14, %20 : vector<64x128xf32>
    %c0_23 = arith.constant 0 : index
    %c1_24 = arith.constant 1 : index
    %c0_25 = arith.constant 0 : index
    %c0_26 = arith.constant 0 : index
    %c0_27 = arith.constant 0 : index
    %22 = vector.load %arg1[%c0_23, %c1_24, %c0_25, %c0_26, %c0_27] : memref<1x6x9x8x128xf32, #tpu.memory_space<vmem>>, vector<1x1x8x8x128xf32>
    %23 = vector.shape_cast %22 : vector<1x1x8x8x128xf32> to vector<8x8x128xf32>
    %24 = vector.shape_cast %23 : vector<8x8x128xf32> to vector<64x128xf32>
    %c3 = arith.constant 3 : index
    %c0_28 = arith.constant 0 : index
    %c0_29 = arith.constant 0 : index
    %25 = vector.load %arg2[%c3, %c0_28, %c0_29] : memref<9x128x128xf32, #tpu.memory_space<vmem>>, vector<1x128x128xf32>
    %26 = vector.shape_cast %25 : vector<1x128x128xf32> to vector<128x128xf32>
    %cst_30 = arith.constant dense<0.000000e+00> : vector<64x128xf32>
    %27 = tpu.matmul %24, %26, %cst_30 {dimension_numbers = #tpu.dot_dimension_numbers<[1], [0], [0], [1], [0, 0, 1, 1], [], []>} : vector<64x128xf32>, vector<128x128xf32>, vector<64x128xf32> -> vector<64x128xf32>
    %28 = arith.addf %21, %27 : vector<64x128xf32>
    %c0_31 = arith.constant 0 : index
    %c3_32 = arith.constant 3 : index
    %c0_33 = arith.constant 0 : index
    %c0_34 = arith.constant 0 : index
    %c0_35 = arith.constant 0 : index
    %29 = vector.load %arg1[%c0_31, %c3_32, %c0_33, %c0_34, %c0_35] : memref<1x6x9x8x128xf32, #tpu.memory_space<vmem>>, vector<1x1x8x8x128xf32>
    %30 = vector.shape_cast %29 : vector<1x1x8x8x128xf32> to vector<8x8x128xf32>
    %31 = vector.shape_cast %30 : vector<8x8x128xf32> to vector<64x128xf32>
    %c4_36 = arith.constant 4 : index
    %c0_37 = arith.constant 0 : index
    %c0_38 = arith.constant 0 : index
    %32 = vector.load %arg2[%c4_36, %c0_37, %c0_38] : memref<9x128x128xf32, #tpu.memory_space<vmem>>, vector<1x128x128xf32>
    %33 = vector.shape_cast %32 : vector<1x128x128xf32> to vector<128x128xf32>
    %cst_39 = arith.constant dense<0.000000e+00> : vector<64x128xf32>
    %34 = tpu.matmul %31, %33, %cst_39 {dimension_numbers = #tpu.dot_dimension_numbers<[1], [0], [0], [1], [0, 0, 1, 1], [], []>} : vector<64x128xf32>, vector<128x128xf32>, vector<64x128xf32> -> vector<64x128xf32>
    %35 = arith.addf %28, %34 : vector<64x128xf32>
    %c0_40 = arith.constant 0 : index
    %c5 = arith.constant 5 : index
    %c0_41 = arith.constant 0 : index
    %c0_42 = arith.constant 0 : index
    %c0_43 = arith.constant 0 : index
    %36 = vector.load %arg1[%c0_40, %c5, %c0_41, %c0_42, %c0_43] : memref<1x6x9x8x128xf32, #tpu.memory_space<vmem>>, vector<1x1x8x8x128xf32>
    %37 = vector.shape_cast %36 : vector<1x1x8x8x128xf32> to vector<8x8x128xf32>
    %38 = vector.shape_cast %37 : vector<8x8x128xf32> to vector<64x128xf32>
    %c5_44 = arith.constant 5 : index
    %c0_45 = arith.constant 0 : index
    %c0_46 = arith.constant 0 : index
    %39 = vector.load %arg2[%c5_44, %c0_45, %c0_46] : memref<9x128x128xf32, #tpu.memory_space<vmem>>, vector<1x128x128xf32>
    %40 = vector.shape_cast %39 : vector<1x128x128xf32> to vector<128x128xf32>
    %cst_47 = arith.constant dense<0.000000e+00> : vector<64x128xf32>
    %41 = tpu.matmul %38, %40, %cst_47 {dimension_numbers = #tpu.dot_dimension_numbers<[1], [0], [0], [1], [0, 0, 1, 1], [], []>} : vector<64x128xf32>, vector<128x128xf32>, vector<64x128xf32> -> vector<64x128xf32>
    %42 = arith.addf %35, %41 : vector<64x128xf32>
    %c0_48 = arith.constant 0 : index
    %c0_49 = arith.constant 0 : index
    %c1_50 = arith.constant 1 : index
    %c0_51 = arith.constant 0 : index
    %c0_52 = arith.constant 0 : index
    %43 = vector.load %arg1[%c0_48, %c0_49, %c1_50, %c0_51, %c0_52] : memref<1x6x9x8x128xf32, #tpu.memory_space<vmem>>, vector<1x1x8x8x128xf32>
    %44 = vector.shape_cast %43 : vector<1x1x8x8x128xf32> to vector<8x8x128xf32>
    %45 = vector.shape_cast %44 : vector<8x8x128xf32> to vector<64x128xf32>
    %c6 = arith.constant 6 : index
    %c0_53 = arith.constant 0 : index
    %c0_54 = arith.constant 0 : index
    %46 = vector.load %arg2[%c6, %c0_53, %c0_54] : memref<9x128x128xf32, #tpu.memory_space<vmem>>, vector<1x128x128xf32>
    %47 = vector.shape_cast %46 : vector<1x128x128xf32> to vector<128x128xf32>
    %cst_55 = arith.constant dense<0.000000e+00> : vector<64x128xf32>
    %48 = tpu.matmul %45, %47, %cst_55 {dimension_numbers = #tpu.dot_dimension_numbers<[1], [0], [0], [1], [0, 0, 1, 1], [], []>} : vector<64x128xf32>, vector<128x128xf32>, vector<64x128xf32> -> vector<64x128xf32>
    %49 = arith.addf %42, %48 : vector<64x128xf32>
    %c0_56 = arith.constant 0 : index
    %c2_57 = arith.constant 2 : index
    %c1_58 = arith.constant 1 : index
    %c0_59 = arith.constant 0 : index
    %c0_60 = arith.constant 0 : index
    %50 = vector.load %arg1[%c0_56, %c2_57, %c1_58, %c0_59, %c0_60] : memref<1x6x9x8x128xf32, #tpu.memory_space<vmem>>, vector<1x1x8x8x128xf32>
    %51 = vector.shape_cast %50 : vector<1x1x8x8x128xf32> to vector<8x8x128xf32>
    %52 = vector.shape_cast %51 : vector<8x8x128xf32> to vector<64x128xf32>
    %c7 = arith.constant 7 : index
    %c0_61 = arith.constant 0 : index
    %c0_62 = arith.constant 0 : index
    %53 = vector.load %arg2[%c7, %c0_61, %c0_62] : memref<9x128x128xf32, #tpu.memory_space<vmem>>, vector<1x128x128xf32>
    %54 = vector.shape_cast %53 : vector<1x128x128xf32> to vector<128x128xf32>
    %cst_63 = arith.constant dense<0.000000e+00> : vector<64x128xf32>
    %55 = tpu.matmul %52, %54, %cst_63 {dimension_numbers = #tpu.dot_dimension_numbers<[1], [0], [0], [1], [0, 0, 1, 1], [], []>} : vector<64x128xf32>, vector<128x128xf32>, vector<64x128xf32> -> vector<64x128xf32>
    %56 = arith.addf %49, %55 : vector<64x128xf32>
    %c0_64 = arith.constant 0 : index
    %c4_65 = arith.constant 4 : index
    %c1_66 = arith.constant 1 : index
    %c0_67 = arith.constant 0 : index
    %c0_68 = arith.constant 0 : index
    %57 = vector.load %arg1[%c0_64, %c4_65, %c1_66, %c0_67, %c0_68] : memref<1x6x9x8x128xf32, #tpu.memory_space<vmem>>, vector<1x1x8x8x128xf32>
    %58 = vector.shape_cast %57 : vector<1x1x8x8x128xf32> to vector<8x8x128xf32>
    %59 = vector.shape_cast %58 : vector<8x8x128xf32> to vector<64x128xf32>
    %c8 = arith.constant 8 : index
    %c0_69 = arith.constant 0 : index
    %c0_70 = arith.constant 0 : index
    %60 = vector.load %arg2[%c8, %c0_69, %c0_70] : memref<9x128x128xf32, #tpu.memory_space<vmem>>, vector<1x128x128xf32>
    %61 = vector.shape_cast %60 : vector<1x128x128xf32> to vector<128x128xf32>
    %cst_71 = arith.constant dense<0.000000e+00> : vector<64x128xf32>
    %62 = tpu.matmul %59, %61, %cst_71 {dimension_numbers = #tpu.dot_dimension_numbers<[1], [0], [0], [1], [0, 0, 1, 1], [], []>} : vector<64x128xf32>, vector<128x128xf32>, vector<64x128xf32> -> vector<64x128xf32>
    %63 = arith.addf %56, %62 : vector<64x128xf32>
    %64 = vector.shape_cast %63 : vector<64x128xf32> to vector<1x8x8x128xf32>
    %c0_72 = arith.constant 0 : index
    %c0_73 = arith.constant 0 : index
    %c0_74 = arith.constant 0 : index
    %c0_75 = arith.constant 0 : index
    %65 = vector.load %arg3[%c0_72, %c0_73, %c0_74, %c0_75] : memref<1x8x8x128xf32, #tpu.memory_space<vmem>>, vector<1x8x8x128xf32>
    tpu.vector_store %arg3[%c0_72, %c0_73, %c0_74, %c0_75], %64 {strides = array<i32>} : memref<1x8x8x128xf32, #tpu.memory_space<vmem>>, vector<1x8x8x128xf32>,
    %c0_i32 = arith.constant 0 : i32
    %66 = arith.cmpi eq, %arg0, %c0_i32 : i32
    %67 = arith.extui %66 : i1 to i32
    %c0_i32_76 = arith.constant 0 : i32
    %68 = arith.cmpi ne, %67, %c0_i32_76 : i32
    scf.if %68 {
      %cst_83 = arith.constant 0.000000e+00 : f32
      %78 = vector.broadcast %cst_83 : f32 to vector<2x128xf32>
      %c0_84 = arith.constant 0 : index
      %c0_85 = arith.constant 0 : index
      %79 = vector.load %arg4[%c0_84, %c0_85] : memref<2x128xf32, #tpu.memory_space<vmem>>, vector<2x128xf32>
      tpu.vector_store %arg4[%c0_84, %c0_85], %78 {strides = array<i32>} : memref<2x128xf32, #tpu.memory_space<vmem>>, vector<2x128xf32>,
    } else {
    }
    %c0_77 = arith.constant 0 : index
    %c0_78 = arith.constant 0 : index
    %69 = vector.load %arg4[%c0_77, %c0_78] : memref<2x128xf32, #tpu.memory_space<vmem>>, vector<2x128xf32>
    %cst_79 = arith.constant dense<0.000000e+00> : vector<128xf32>
    %70 = vector.multi_reduction <add>, %63, %cst_79 [0] : vector<64x128xf32> to vector<128xf32>
    %71 = vector.shape_cast %70 : vector<128xf32> to vector<1x128xf32>
    %72 = arith.mulf %63, %63 : vector<64x128xf32>
    %cst_80 = arith.constant dense<0.000000e+00> : vector<128xf32>
    %73 = vector.multi_reduction <add>, %72, %cst_80 [0] : vector<64x128xf32> to vector<128xf32>
    %74 = vector.shape_cast %73 : vector<128xf32> to vector<1x128xf32>
    %75 = tpu.concatenate %71, %74 in 0 : vector<1x128xf32>, vector<1x128xf32> -> vector<2x128xf32>
    %76 = arith.addf %69, %75 : vector<2x128xf32>
    %c0_81 = arith.constant 0 : index
    %c0_82 = arith.constant 0 : index
    %77 = vector.load %arg4[%c0_81, %c0_82] : memref<2x128xf32, #tpu.memory_space<vmem>>, vector<2x128xf32>
    tpu.vector_store %arg4[%c0_81, %c0_82], %76 {strides = array<i32>} : memref<2x128xf32, #tpu.memory_space<vmem>>, vector<2x128xf32>,
    return
  }
  func.func @transform_0(%arg0: i32) -> (i32, i32, i32, i32, i32) {
    %c0_i32 = arith.constant 0 : i32
    %c0_i32_0 = arith.constant 0 : i32
    %c0_i32_1 = arith.constant 0 : i32
    %c0_i32_2 = arith.constant 0 : i32
    %c0_i32_3 = arith.constant 0 : i32
    return %arg0, %c0_i32, %c0_i32_0, %c0_i32_1, %c0_i32_2 : i32, i32, i32, i32, i32
  }
  func.func @transform_1(%arg0: i32) -> (i32, i32, i32) {
    %c0_i32 = arith.constant 0 : i32
    %c0_i32_0 = arith.constant 0 : i32
    %c0_i32_1 = arith.constant 0 : i32
    %c0_i32_2 = arith.constant 0 : i32
    return %c0_i32, %c0_i32_0, %c0_i32_1 : i32, i32, i32
  }
  func.func @transform_2(%arg0: i32) -> (i32, i32, i32, i32) {
    %c0_i32 = arith.constant 0 : i32
    %c0_i32_0 = arith.constant 0 : i32
    %c0_i32_1 = arith.constant 0 : i32
    %c0_i32_2 = arith.constant 0 : i32
    return %arg0, %c0_i32, %c0_i32_0, %c0_i32_1 : i32, i32, i32, i32
  }
  func.func @transform_3(%arg0: i32) -> (i32, i32) {
    %c0_i32 = arith.constant 0 : i32
    %c0_i32_0 = arith.constant 0 : i32
    %c0_i32_1 = arith.constant 0 : i32
    return %c0_i32, %c0_i32_0 : i32, i32
  }
}

module attributes {stable_mosaic.version = 11 : i64} {
  func.func @_final_proj_kernel(%arg0: i32, %arg1: memref<128x128xf32, #tpu.memory_space<vmem>>, %arg2: memref<1x128xf32, #tpu.memory_space<vmem>>, %arg3: memref<1x128xf32, #tpu.memory_space<vmem>>, %arg4: memref<128x128xf32, #tpu.memory_space<vmem>>, %arg5: memref<1x128xf32, #tpu.memory_space<vmem>>, %arg6: memref<128x128xf32, #tpu.memory_space<vmem>>, %arg7: memref<128x128xf32, #tpu.memory_space<vmem>>, %arg8: memref<1x128xf32, #tpu.memory_space<vmem>>, %arg9: memref<128x128xf32, #tpu.memory_space<vmem>>) attributes {dimension_semantics = [#tpu.dimension_semantics<parallel>], iteration_bounds = array<i64: 1>, scalar_prefetch = 0 : i64, scratch_operands = 0 : i64, tpu.core_type = #tpu.core_type<tc>, window_params = [{transform_indices = @transform_0, window_bounds = array<i64: 128, 128>}, {pipeline_mode = #tpu.pipeline_mode<synchronous>, transform_indices = @transform_1, window_bounds = array<i64: 1, 128>}, {pipeline_mode = #tpu.pipeline_mode<synchronous>, transform_indices = @transform_2, window_bounds = array<i64: 1, 128>}, {pipeline_mode = #tpu.pipeline_mode<synchronous>, transform_indices = @transform_3, window_bounds = array<i64: 128, 128>}, {pipeline_mode = #tpu.pipeline_mode<synchronous>, transform_indices = @transform_4, window_bounds = array<i64: 1, 128>}, {transform_indices = @transform_5, window_bounds = array<i64: 128, 128>}, {pipeline_mode = #tpu.pipeline_mode<synchronous>, transform_indices = @transform_6, window_bounds = array<i64: 128, 128>}, {pipeline_mode = #tpu.pipeline_mode<synchronous>, transform_indices = @transform_7, window_bounds = array<i64: 1, 128>}, {transform_indices = @transform_8, window_bounds = array<i64: 128, 128>}]} {
    %c0 = arith.constant 0 : index
    %c0_0 = arith.constant 0 : index
    %0 = vector.load %arg1[%c0, %c0_0] : memref<128x128xf32, #tpu.memory_space<vmem>>, vector<128x128xf32>
    %c0_1 = arith.constant 0 : index
    %c0_2 = arith.constant 0 : index
    %1 = vector.load %arg2[%c0_1, %c0_2] : memref<1x128xf32, #tpu.memory_space<vmem>>, vector<1x128xf32>
    %2 = vector.broadcast %1 : vector<1x128xf32> to vector<128x128xf32>
    %3 = arith.mulf %0, %2 : vector<128x128xf32>
    %c0_3 = arith.constant 0 : index
    %c0_4 = arith.constant 0 : index
    %4 = vector.load %arg3[%c0_3, %c0_4] : memref<1x128xf32, #tpu.memory_space<vmem>>, vector<1x128xf32>
    %5 = vector.broadcast %4 : vector<1x128xf32> to vector<128x128xf32>
    %6 = arith.addf %3, %5 : vector<128x128xf32>
    %cst = arith.constant 0.000000e+00 : f32
    %7 = vector.broadcast %cst : f32 to vector<128x128xf32>
    %8 = arith.maximumf %6, %7 : vector<128x128xf32>
    %c0_5 = arith.constant 0 : index
    %c0_6 = arith.constant 0 : index
    %9 = vector.load %arg4[%c0_5, %c0_6] : memref<128x128xf32, #tpu.memory_space<vmem>>, vector<128x128xf32>
    %cst_7 = arith.constant dense<0.000000e+00> : vector<128x128xf32>
    %10 = tpu.matmul %8, %9, %cst_7 {dimension_numbers = #tpu.dot_dimension_numbers<[1], [0], [0], [1], [0, 0, 1, 1], [], []>} : vector<128x128xf32>, vector<128x128xf32>, vector<128x128xf32> -> vector<128x128xf32>
    %c0_8 = arith.constant 0 : index
    %c0_9 = arith.constant 0 : index
    %11 = vector.load %arg5[%c0_8, %c0_9] : memref<1x128xf32, #tpu.memory_space<vmem>>, vector<1x128xf32>
    %12 = vector.broadcast %11 : vector<1x128xf32> to vector<128x128xf32>
    %13 = arith.addf %10, %12 : vector<128x128xf32>
    %c0_10 = arith.constant 0 : index
    %c0_11 = arith.constant 0 : index
    %14 = vector.load %arg6[%c0_10, %c0_11] : memref<128x128xf32, #tpu.memory_space<vmem>>, vector<128x128xf32>
    %c0_12 = arith.constant 0 : index
    %c0_13 = arith.constant 0 : index
    %15 = vector.load %arg7[%c0_12, %c0_13] : memref<128x128xf32, #tpu.memory_space<vmem>>, vector<128x128xf32>
    %cst_14 = arith.constant dense<0.000000e+00> : vector<128x128xf32>
    %16 = tpu.matmul %14, %15, %cst_14 {dimension_numbers = #tpu.dot_dimension_numbers<[1], [0], [0], [1], [0, 0, 1, 1], [], []>} : vector<128x128xf32>, vector<128x128xf32>, vector<128x128xf32> -> vector<128x128xf32>
    %c0_15 = arith.constant 0 : index
    %c0_16 = arith.constant 0 : index
    %17 = vector.load %arg8[%c0_15, %c0_16] : memref<1x128xf32, #tpu.memory_space<vmem>>, vector<1x128xf32>
    %18 = vector.broadcast %17 : vector<1x128xf32> to vector<128x128xf32>
    %19 = arith.addf %16, %18 : vector<128x128xf32>
    %20 = arith.addf %13, %19 : vector<128x128xf32>
    %c0_17 = arith.constant 0 : index
    %c0_18 = arith.constant 0 : index
    %21 = vector.load %arg9[%c0_17, %c0_18] : memref<128x128xf32, #tpu.memory_space<vmem>>, vector<128x128xf32>
    tpu.vector_store %arg9[%c0_17, %c0_18], %20 {strides = array<i32>} : memref<128x128xf32, #tpu.memory_space<vmem>>, vector<128x128xf32>,
    return
  }
  func.func @transform_0(%arg0: i32) -> (i32, i32) {
    %c0_i32 = arith.constant 0 : i32
    %c0_i32_0 = arith.constant 0 : i32
    return %arg0, %c0_i32 : i32, i32
  }
  func.func @transform_1(%arg0: i32) -> (i32, i32) {
    %c0_i32 = arith.constant 0 : i32
    %c0_i32_0 = arith.constant 0 : i32
    %c0_i32_1 = arith.constant 0 : i32
    return %c0_i32, %c0_i32_0 : i32, i32
  }
  func.func @transform_2(%arg0: i32) -> (i32, i32) {
    %c0_i32 = arith.constant 0 : i32
    %c0_i32_0 = arith.constant 0 : i32
    %c0_i32_1 = arith.constant 0 : i32
    return %c0_i32, %c0_i32_0 : i32, i32
  }
  func.func @transform_3(%arg0: i32) -> (i32, i32) {
    %c0_i32 = arith.constant 0 : i32
    %c0_i32_0 = arith.constant 0 : i32
    %c0_i32_1 = arith.constant 0 : i32
    return %c0_i32, %c0_i32_0 : i32, i32
  }
  func.func @transform_4(%arg0: i32) -> (i32, i32) {
    %c0_i32 = arith.constant 0 : i32
    %c0_i32_0 = arith.constant 0 : i32
    %c0_i32_1 = arith.constant 0 : i32
    return %c0_i32, %c0_i32_0 : i32, i32
  }
  func.func @transform_5(%arg0: i32) -> (i32, i32) {
    %c0_i32 = arith.constant 0 : i32
    %c0_i32_0 = arith.constant 0 : i32
    return %arg0, %c0_i32 : i32, i32
  }
  func.func @transform_6(%arg0: i32) -> (i32, i32) {
    %c0_i32 = arith.constant 0 : i32
    %c0_i32_0 = arith.constant 0 : i32
    %c0_i32_1 = arith.constant 0 : i32
    return %c0_i32, %c0_i32_0 : i32, i32
  }
  func.func @transform_7(%arg0: i32) -> (i32, i32) {
    %c0_i32 = arith.constant 0 : i32
    %c0_i32_0 = arith.constant 0 : i32
    %c0_i32_1 = arith.constant 0 : i32
    return %c0_i32, %c0_i32_0 : i32, i32
  }
  func.func @transform_8(%arg0: i32) -> (i32, i32) {
    %c0_i32 = arith.constant 0 : i32
    %c0_i32_0 = arith.constant 0 : i32
    return %arg0, %c0_i32 : i32, i32
  }
}

</mosaic_0001>

<bundles_post_ra>
// kernel: bottleneck_v2_forward.5
= control target key start
LH: loop header
LB: loop body
LE: loop exit
PB: predicated region body
PF: predicated region fallthrough
CT: control target
= control target key end

     0   :  { %s317_s6 = smov 0   ;;  %s468_s0 = inlined_call_operand.vmem [shape: f32[512,128], index: 0, kind: input, shape index: {}]   ;;  %s469_s1 = inlined_call_operand.vmem [shape: f32[2,128], index: 1, kind: output, shape index: {}]  }
   0x1 LB: > { %s280_s7 = sadd.s32 4294967295, %s304_s6   ;;  %p283_p0 = scmp.ge.s32.totalorder %s304_s6, 1  ;;  %s304_s6 = sphi %s317_s6, %s11_s6  }
   0x2   : > { %p83_p1 = scmp.lt.s32.totalorder %s304_s6, 3 }
   0x4   : > { %p84_p2 = pnand %p283_p0, %p83_p1 }
   0x5   : > { %s284_s8 = sshll.u32 (!%p84_p2), %s280_s7, 5  ;;  %p286_p4 = scmp.ne.s32.totalorder (!%p84_p2), %s280_s7, 0 }
   0x6   : > { %87 = sbr.rel (%p84_p2) target bundleno = 107 (0x6b), region = 24  ;;  %p99_p3 = scmp.lt.s32.totalorder (!%p84_p2), %s284_s8, 63 }
   0xd   : > { %s471_s8 = smov (!%p99_p3, %s284_s8), 63  ;;  %v306_v32 = vmov (!%p286_p4), 0.0  }
   0xe   : > { %s285_s9 = sshll.u32 %s471_s8, 3  ;;  %140 = vst [vmem:[%s469_s1] sm:$0x3] (!%p286_p4), %v306_v32 }
   0xf   : > { %s330_s12 = scalar_lea.vmem %s468_s0, %s285_s9 }
  0x10   : > { %v104_v0 = vld [vmem:[%s330_s12] sm:$0xff]  ;;  %v105_v1 = vld [vmem:[%s330_s12 + $0x8] sm:$0xff]  ;;  %v106_v2 = vld [vmem:[%s330_s12 + $0x10] sm:$0xff] }
  0x11   : > { %v107_v3 = vld [vmem:[%s330_s12 + $0x18] sm:$0xff]  ;;  %v108_v4 = vld [vmem:[%s330_s12 + $0x20] sm:$0xff]  ;;  %v109_v5 = vld [vmem:[%s330_s12 + $0x28] sm:$0xff] }
  0x12   : > { %v110_v6 = vld [vmem:[%s330_s12 + $0x30] sm:$0xff]  ;;  %v111_v7 = vld [vmem:[%s330_s12 + $0x38] sm:$0xff]  ;;  %v112_v8 = vld [vmem:[%s330_s12 + $0x40] sm:$0xff] }
  0x13   : > { %v113_v9 = vld [vmem:[%s330_s12 + $0x48] sm:$0xff]  ;;  %v114_v10 = vld [vmem:[%s330_s12 + $0x50] sm:$0xff]  ;;  %v115_v11 = vld [vmem:[%s330_s12 + $0x58] sm:$0xff] }
  0x14   : > { %v116_v12 = vld [vmem:[%s330_s12 + $0x60] sm:$0xff]  ;;  %v117_v13 = vld [vmem:[%s330_s12 + $0x68] sm:$0xff]  ;;  %v347_v14 = vld [vmem:[%s330_s12 + $0x70] sm:$0xff]  ;;  %139 = sbr.rel (%p286_p4) target bundleno = 27 (0x1b), region = 28 }
  0x15   : > { %v350_v15 = vld [vmem:[%s330_s12 + $0x78] sm:$0xff]  ;;  %v353_v16 = vld [vmem:[%s330_s12 + $0x80] sm:$0xff]  ;;  %v356_v17 = vld [vmem:[%s330_s12 + $0x88] sm:$0xff] }
  0x16   : > { %v359_v18 = vld [vmem:[%s330_s12 + $0x90] sm:$0xff]  ;;  %v362_v19 = vld [vmem:[%s330_s12 + $0x98] sm:$0xff]  ;;  %v365_v20 = vld [vmem:[%s330_s12 + $0xa0] sm:$0xff] }
  0x17   : > { %v368_v21 = vld [vmem:[%s330_s12 + $0xa8] sm:$0xff]  ;;  %v371_v22 = vld [vmem:[%s330_s12 + $0xb0] sm:$0xff]  ;;  %v374_v23 = vld [vmem:[%s330_s12 + $0xb8] sm:$0xff] }
  0x18   : > { %v377_v24 = vld [vmem:[%s330_s12 + $0xc0] sm:$0xff]  ;;  %v380_v25 = vld [vmem:[%s330_s12 + $0xc8] sm:$0xff]  ;;  %v383_v26 = vld [vmem:[%s330_s12 + $0xd0] sm:$0xff] }
  0x19   : > { %v386_v27 = vld [vmem:[%s330_s12 + $0xd8] sm:$0xff]  ;;  %v389_v28 = vld [vmem:[%s330_s12 + $0xe0] sm:$0xff]  ;;  %v392_v29 = vld [vmem:[%s330_s12 + $0xe8] sm:$0xff] }
  0x1a   : > { %v395_v30 = vld [vmem:[%s330_s12 + $0xf0] sm:$0xff]  ;;  %v398_v31 = vld [vmem:[%s330_s12 + $0xf8] sm:$0xff] }
  0x1b PF: > { %v142_v33 = vadd.f32 %v105_v1, %v104_v0  ;;  %v179_v36 = vmul.f32 %v104_v0, %v104_v0  ;;  %v180_v37 = vmul.f32 %v105_v1, %v105_v1  ;;  %v181_v39 = vmul.f32 %v106_v2, %v106_v2 }
  0x1c   : > { %v182_v41 = vmul.f32 %v107_v3, %v107_v3  ;;  %v183_v44 = vmul.f32 %v108_v4, %v108_v4  ;;  %v184_v47 = vmul.f32 %v109_v5, %v109_v5  ;;  %v185_v50 = vmul.f32 %v110_v6, %v110_v6 }
  0x1d   : > { %v143_v34 = vadd.f32 %v142_v33, %v106_v2  ;;  %v211_v42 = vadd.f32 %v180_v37, %v179_v36  ;;  %v186_v53 = vmul.f32 %v111_v7, %v111_v7  ;;  %v187_v56 = vmul.f32 %v112_v8, %v112_v8 }
  0x1e   : > { %v188_v59 = vmul.f32 %v113_v9, %v113_v9  ;;  %v189_v62 = vmul.f32 %v114_v10, %v114_v10  ;;  %v190_v1 = vmul.f32 %v115_v11, %v115_v11  ;;  %v196_v37 = vmul.f32 %v356_v17, %v356_v17 }
  0x1f   : > { %v144_v35 = vadd.f32 %v143_v34, %v107_v3  ;;  %v212_v45 = vadd.f32 %v211_v42, %v181_v39  ;;  %v197_v39 = vmul.f32 %v359_v18, %v359_v18  ;;  %vm248_vm0 = vcmask 1040384  }
  0x21   : > { %v145_v38 = vadd.f32 %v144_v35, %v108_v4  ;;  %v213_v48 = vadd.f32 %v212_v45, %v182_v41  ;;  %v191_v4 = vmul.f32 %v116_v12, %v116_v12  ;;  %v198_v41 = vmul.f32 %v362_v19, %v362_v19 }
  0x22   : > { %v200_v45 = vmul.f32 %v368_v21, %v368_v21 }
  0x23   : > { %v146_v40 = vadd.f32 %v145_v38, %v109_v5  ;;  %v214_v51 = vadd.f32 %v213_v48, %v183_v44 }
  0x25   : > { %v147_v43 = vadd.f32 %v146_v40, %v110_v6  ;;  %v215_v54 = vadd.f32 %v214_v51, %v184_v47  ;;  %v201_v47 = vmul.f32 %v371_v22, %v371_v22  ;;  %v203_v51 = vmul.f32 %v377_v24, %v377_v24 }
  0x27   : > { %v148_v46 = vadd.f32 %v147_v43, %v111_v7  ;;  %v216_v57 = vadd.f32 %v215_v54, %v185_v50  ;;  %v192_v7 = vmul.f32 %v117_v13, %v117_v13  ;;  %v199_v43 = vmul.f32 %v365_v20, %v365_v20 }
  0x29   : > { %v149_v49 = vadd.f32 %v148_v46, %v112_v8  ;;  %v217_v60 = vadd.f32 %v216_v57, %v186_v53  ;;  %v204_v53 = vmul.f32 %v380_v25, %v380_v25  ;;  %v206_v57 = vmul.f32 %v386_v27, %v386_v27 }
  0x2b   : > { %v150_v52 = vadd.f32 %v149_v49, %v113_v9  ;;  %v218_v63 = vadd.f32 %v217_v60, %v187_v56  ;;  %v193_v9 = vmul.f32 %v347_v14, %v347_v14  ;;  %v202_v49 = vmul.f32 %v374_v23, %v374_v23 }
  0x2d   : > { %v151_v55 = vadd.f32 %v150_v52, %v114_v10  ;;  %v219_v2 = vadd.f32 %v218_v63, %v188_v59  ;;  %v207_v59 = vmul.f32 %v389_v28, %v389_v28  ;;  %v209_v63 = vmul.f32 %v395_v30, %v395_v30 }
  0x2f   : > { %v152_v58 = vadd.f32 %v151_v55, %v115_v11  ;;  %v220_v5 = vadd.f32 %v219_v2, %v189_v62  ;;  %v194_v11 = vmul.f32 %v350_v15, %v350_v15  ;;  %v205_v55 = vmul.f32 %v383_v26, %v383_v26 }
  0x31   : > { %v153_v61 = vadd.f32 %v152_v58, %v116_v12  ;;  %v221_v32 = vadd.f32 %v220_v5, %v190_v1  ;;  %v195_v12 = vmul.f32 %v353_v16, %v353_v16 }
  0x33   : > { %v154_v0 = vadd.f32 %v153_v61, %v117_v13  ;;  %v222_v33 = vadd.f32 %v221_v32, %v191_v4  ;;  %v208_v61 = vmul.f32 %v392_v29, %v392_v29 }
  0x35   : > { %v155_v3 = vadd.f32 %v154_v0, %v347_v14  ;;  %v223_v34 = vadd.f32 %v222_v33, %v192_v7 }
  0x37   : > { %v156_v6 = vadd.f32 %v155_v3, %v350_v15  ;;  %v224_v36 = vadd.f32 %v223_v34, %v193_v9 }
  0x39   : > { %v157_v8 = vadd.f32 %v156_v6, %v353_v16  ;;  %v225_v38 = vadd.f32 %v224_v36, %v194_v11 }
  0x3b   : > { %v158_v10 = vadd.f32 %v157_v8, %v356_v17  ;;  %v226_v40 = vadd.f32 %v225_v38, %v195_v12 }
  0x3d   : > { %v159_v35 = vadd.f32 %v158_v10, %v359_v18  ;;  %v227_v42 = vadd.f32 %v226_v40, %v196_v37 }
  0x3f   : > { %v160_v13 = vadd.f32 %v159_v35, %v362_v19  ;;  %v228_v44 = vadd.f32 %v227_v42, %v197_v39 }
  0x41   : > { %v161_v14 = vadd.f32 %v160_v13, %v365_v20  ;;  %v229_v46 = vadd.f32 %v228_v44, %v198_v41 }
  0x43   : > { %v162_v15 = vadd.f32 %v161_v14, %v368_v21  ;;  %v230_v48 = vadd.f32 %v229_v46, %v199_v43 }
  0x45   : > { %v163_v16 = vadd.f32 %v162_v15, %v371_v22  ;;  %v231_v50 = vadd.f32 %v230_v48, %v200_v45 }
  0x47   : > { %v164_v17 = vadd.f32 %v163_v16, %v374_v23  ;;  %v232_v52 = vadd.f32 %v231_v50, %v201_v47 }
  0x49   : > { %v165_v18 = vadd.f32 %v164_v17, %v377_v24  ;;  %v233_v54 = vadd.f32 %v232_v52, %v202_v49 }
  0x4b   : > { %v166_v19 = vadd.f32 %v165_v18, %v380_v25  ;;  %v234_v56 = vadd.f32 %v233_v54, %v203_v51 }
  0x4d   : > { %v167_v20 = vadd.f32 %v166_v19, %v383_v26  ;;  %v235_v58 = vadd.f32 %v234_v56, %v204_v53 }
  0x4f   : > { %v168_v21 = vadd.f32 %v167_v20, %v386_v27  ;;  %v236_v60 = vadd.f32 %v235_v58, %v205_v55  ;;  %v210_v27 = vmul.f32 %v398_v31, %v398_v31 }
  0x51   : > { %v169_v22 = vadd.f32 %v168_v21, %v389_v28  ;;  %v237_v62 = vadd.f32 %v236_v60, %v206_v57 }
  0x53   : > { %v170_v23 = vadd.f32 %v169_v22, %v392_v29  ;;  %v238_v0 = vadd.f32 %v237_v62, %v207_v59 }
  0x55   : > { %v171_v24 = vadd.f32 %v170_v23, %v395_v30  ;;  %v239_v2 = vadd.f32 %v238_v0, %v208_v61  ;;  %v141_v30 = vld [vmem:[%s469_s1] sm:$0x3] }
  0x57   : > { %v172_v25 = vadd.f32 %v171_v24, %v398_v31  ;;  %v240_v4 = vadd.f32 %v239_v2, %v209_v63 }
  0x59   : > { %v173_v26 = vrot.slane %v172_v25, 4  ;;  %v241_v28 = vadd.f32 %v240_v4, %v210_v27 }
  0x5b   : > { %v174_v1 = vadd.f32 %v173_v26, %v172_v25  ;;  %v242_v6 = vrot.slane %v241_v28, 4 }
  0x5d   : > { %v175_v3 = vrot.slane %v174_v1, 2  ;;  %v243_v7 = vadd.f32 %v242_v6, %v241_v28 }
  0x5f   : > { %v176_v5 = vadd.f32 %v175_v3, %v174_v1  ;;  %v244_v8 = vrot.slane %v243_v7, 2 }
  0x61   : > { %v177_v32 = vrot.slane %v176_v5, 1  ;;  %v245_v29 = vadd.f32 %v244_v8, %v243_v7 }
  0x63   : > { %v178_v9 = vadd.f32 %v177_v32, %v176_v5  ;;  %v246_v33 = vrot.slane %v245_v29, 1 }
  0x65   : > { %v247_v10 = vadd.f32 %v246_v33, %v245_v29 }
  0x67   : > { %v249_v11 = vsel %vm248_vm0, %v178_v9, %v247_v10 }
  0x68   : > { %v250_v31 = vadd.f32 %v249_v11, %v141_v30 }
  0x6a   : > { %251 = vst [vmem:[%s469_s1] sm:$0x3] %v250_v31 }
  0x6b PF: > { %s11_s6 = sadd.s32 1, %s304_s6  }
  0x6c   : > { %p8_p5 = scmp.ge.s32.totalorder %s11_s6, 4  }
  0x6e   :  { %10 = sbr.rel (!%p8_p5) target bundleno = 1 (0x1), region = 54 }

// kernel: bottleneck_v2_forward.7
= control target key start
LH: loop header
LB: loop body
LE: loop exit
PB: predicated region body
PF: predicated region fallthrough
CT: control target
= control target key end

     0   :  { %s453_s12 = smov 0   ;;  %s612_s0 = inlined_call_operand.vmem [shape: f32[512,128], index: 0, kind: input, shape index: {}]   ;;  %s613_s1 = inlined_call_operand.vmem [shape: f32[1,128], index: 1, kind: input, shape index: {}]   ;;  %s614_s2 = inlined_call_operand.vmem [shape: f32[1,128], index: 2, kind: input, shape index: {}]   ;;  %s615_s3 = inlined_call_operand.vmem [shape: f32[512,128], index: 3, kind: output, shape index: {}]  }
   0x1 LB: > { %s404_s13 = sadd.s32 4294967295, %s431_s12   ;;  %p408_p0 = scmp.ge.s32.totalorder %s431_s12, 1  ;;  %s431_s12 = sphi %s453_s12, %s13_s12  }
   0x2   : > { %p138_p1 = scmp.lt.s32.totalorder %s431_s12, 3 }
   0x4   : > { %p139_p2 = pnand %p408_p0, %p138_p1 }
   0x5   : > { %s409_s14 = sshll.u32 (!%p139_p2), %s404_s13, 5  ;;  %v464_v0 = vld [vmem:[%s613_s1] ss:$0 sm:$0xff] (!%p139_p2) }
   0x6   : > { %142 = sbr.rel (%p139_p2) target bundleno = 46 (0x2e), region = 32  ;;  %p163_p3 = scmp.lt.s32.totalorder (!%p139_p2), %s409_s14, 63  ;;  %v474_v1 = vld [vmem:[%s614_s2] ss:$0 sm:$0xff] (!%p139_p2) }
   0xd   : > { %s617_s14 = smov (!%p163_p3, %s409_s14), 63 }
   0xe   : > { %s410_s15 = sshll.u32 %s617_s14, 3 }
   0xf   : > { %s469_s20 = scalar_lea.vmem %s612_s0, %s410_s15  ;;  %s497_s25 = scalar_lea.vmem %s615_s3, %s410_s15 }
  0x10   : > { %v174_v2 = vld [vmem:[%s469_s20] sm:$0xff]  ;;  %v175_v3 = vld [vmem:[%s469_s20 + $0x8] sm:$0xff]  ;;  %v176_v4 = vld [vmem:[%s469_s20 + $0x10] sm:$0xff] }
  0x11   : > { %v213_v5 = vmul.f32 %v464_v0, %v174_v2  ;;  %v214_v6 = vmul.f32 %v464_v0, %v175_v3  ;;  %v215_v7 = vmul.f32 %v464_v0, %v176_v4  ;;  %v177_v8 = vld [vmem:[%s469_s20 + $0x18] sm:$0xff]  ;;  %v178_v9 = vld [vmem:[%s469_s20 + $0x20] sm:$0xff]  ;;  %v179_v10 = vld [vmem:[%s469_s20 + $0x28] sm:$0xff] }
  0x12   : > { %v216_v11 = vmul.f32 %v464_v0, %v177_v8  ;;  %v217_v12 = vmul.f32 %v464_v0, %v178_v9  ;;  %v218_v13 = vmul.f32 %v464_v0, %v179_v10  ;;  %v180_v14 = vld [vmem:[%s469_s20 + $0x30] sm:$0xff]  ;;  %v181_v15 = vld [vmem:[%s469_s20 + $0x38] sm:$0xff]  ;;  %v182_v24 = vld [vmem:[%s469_s20 + $0x40] sm:$0xff] }
  0x13   : > { %v252_v16 = vadd.f32 %v474_v1, %v213_v5  ;;  %v253_v17 = vadd.f32 %v474_v1, %v214_v6  ;;  %v254_v18 = vadd.f32 %v474_v1, %v215_v7  ;;  %v219_v19 = vmul.f32 %v464_v0, %v180_v14  ;;  %v183_v25 = vld [vmem:[%s469_s20 + $0x48] sm:$0xff]  ;;  %v184_v26 = vld [vmem:[%s469_s20 + $0x50] sm:$0xff]  ;;  %v185_v31 = vld [vmem:[%s469_s20 + $0x58] sm:$0xff] }
  0x14   : > { %v255_v20 = vadd.f32 %v474_v1, %v216_v11  ;;  %v256_v21 = vadd.f32 %v474_v1, %v217_v12  ;;  %v257_v22 = vadd.f32 %v474_v1, %v218_v13  ;;  %v220_v23 = vmul.f32 %v464_v0, %v181_v15  ;;  %v186_v32 = vld [vmem:[%s469_s20 + $0x60] sm:$0xff]  ;;  %v187_v33 = vld [vmem:[%s469_s20 + $0x68] sm:$0xff]  ;;  %v188_v38 = vld [vmem:[%s469_s20 + $0x70] sm:$0xff] }
  0x15   : > { %v284_v27 = vmax.f32 %v252_v16, 0.0  ;;  %v285_v28 = vmax.f32 %v253_v17, 0.0  ;;  %v286_v29 = vmax.f32 %v254_v18, 0.0  ;;  %v258_v30 = vadd.f32 %v474_v1, %v219_v19  ;;  %v189_v43 = vld [vmem:[%s469_s20 + $0x78] sm:$0xff]  ;;  %v190_v56 = vld [vmem:[%s469_s20 + $0x80] sm:$0xff]  ;;  %v191_v57 = vld [vmem:[%s469_s20 + $0x88] sm:$0xff] }
  0x16   : > { %v287_v34 = vmax.f32 %v255_v20, 0.0  ;;  %v288_v35 = vmax.f32 %v256_v21, 0.0  ;;  %v289_v36 = vmax.f32 %v257_v22, 0.0  ;;  %v259_v37 = vadd.f32 %v474_v1, %v220_v23  ;;  %v192_v58 = vld [vmem:[%s469_s20 + $0x90] sm:$0xff]  ;;  %v193_v63 = vld [vmem:[%s469_s20 + $0x98] sm:$0xff]  ;;  %v194_v2 = vld [vmem:[%s469_s20 + $0xa0] sm:$0xff] }
  0x17   : > { %316 = vst [vmem:[%s497_s25] sm:$0xff] %v284_v27  ;;  %317 = vst [vmem:[%s497_s25 + $0x8] sm:$0xff] %v285_v28  ;;  %v290_v39 = vmax.f32 %v258_v30, 0.0  ;;  %v221_v40 = vmul.f32 %v464_v0, %v182_v24  ;;  %v222_v41 = vmul.f32 %v464_v0, %v183_v25  ;;  %v223_v42 = vmul.f32 %v464_v0, %v184_v26  ;;  %v195_v3 = vld [vmem:[%s469_s20 + $0xa8] sm:$0xff]  ;;  %v196_v8 = vld [vmem:[%s469_s20 + $0xb0] sm:$0xff] }
  0x18   : > { %318 = vst [vmem:[%s497_s25 + $0x10] sm:$0xff] %v286_v29  ;;  %319 = vst [vmem:[%s497_s25 + $0x18] sm:$0xff] %v287_v34  ;;  %v291_v44 = vmax.f32 %v259_v37, 0.0  ;;  %v224_v45 = vmul.f32 %v464_v0, %v185_v31  ;;  %v225_v46 = vmul.f32 %v464_v0, %v186_v32  ;;  %v226_v47 = vmul.f32 %v464_v0, %v187_v33  ;;  %v197_v13 = vld [vmem:[%s469_s20 + $0xb8] sm:$0xff]  ;;  %v198_v26 = vld [vmem:[%s469_s20 + $0xc0] sm:$0xff] }
  0x19   : > { %320 = vst [vmem:[%s497_s25 + $0x20] sm:$0xff] %v288_v35  ;;  %321 = vst [vmem:[%s497_s25 + $0x28] sm:$0xff] %v289_v36  ;;  %v260_v48 = vadd.f32 %v474_v1, %v221_v40  ;;  %v261_v49 = vadd.f32 %v474_v1, %v222_v41  ;;  %v262_v50 = vadd.f32 %v474_v1, %v223_v42  ;;  %v199_v27 = vld [vmem:[%s469_s20 + $0xc8] sm:$0xff]  ;;  %v200_v28 = vld [vmem:[%s469_s20 + $0xd0] sm:$0xff] }
  0x1a   : > { %322 = vst [vmem:[%s497_s25 + $0x30] sm:$0xff] %v290_v39  ;;  %v227_v51 = vmul.f32 %v464_v0, %v188_v38  ;;  %323 = vst [vmem:[%s497_s25 + $0x38] sm:$0xff] %v291_v44  ;;  %v263_v52 = vadd.f32 %v474_v1, %v224_v45  ;;  %v264_v53 = vadd.f32 %v474_v1, %v225_v46  ;;  %v201_v33 = vld [vmem:[%s469_s20 + $0xd8] sm:$0xff]  ;;  %v202_v34 = vld [vmem:[%s469_s20 + $0xe0] sm:$0xff] }
  0x1b   : > { %v265_v54 = vadd.f32 %v474_v1, %v226_v47  ;;  %v228_v55 = vmul.f32 %v464_v0, %v189_v43  ;;  %v292_v59 = vmax.f32 %v260_v48, 0.0  ;;  %v293_v60 = vmax.f32 %v261_v49, 0.0  ;;  %v203_v35 = vld [vmem:[%s469_s20 + $0xe8] sm:$0xff]  ;;  %v204_v40 = vld [vmem:[%s469_s20 + $0xf0] sm:$0xff]  ;;  %v205_v45 = vld [vmem:[%s469_s20 + $0xf8] sm:$0xff] }
  0x1c   : > { %v294_v61 = vmax.f32 %v262_v50, 0.0  ;;  %v266_v62 = vadd.f32 %v474_v1, %v227_v51  ;;  %v295_v4 = vmax.f32 %v263_v52, 0.0  ;;  %v296_v5 = vmax.f32 %v264_v53, 0.0 }
  0x1d   : > { %v297_v6 = vmax.f32 %v265_v54, 0.0  ;;  %v267_v7 = vadd.f32 %v474_v1, %v228_v55  ;;  %324 = vst [vmem:[%s497_s25 + $0x40] sm:$0xff] %v292_v59  ;;  %325 = vst [vmem:[%s497_s25 + $0x48] sm:$0xff] %v293_v60  ;;  %v229_v10 = vmul.f32 %v464_v0, %v190_v56  ;;  %v230_v11 = vmul.f32 %v464_v0, %v191_v57 }
  0x1e   : > { %326 = vst [vmem:[%s497_s25 + $0x50] sm:$0xff] %v294_v61  ;;  %v298_v9 = vmax.f32 %v266_v62, 0.0  ;;  %v231_v12 = vmul.f32 %v464_v0, %v192_v58  ;;  %327 = vst [vmem:[%s497_s25 + $0x58] sm:$0xff] %v295_v4  ;;  %v232_v15 = vmul.f32 %v464_v0, %v193_v63  ;;  %v233_v16 = vmul.f32 %v464_v0, %v194_v2 }
  0x1f   : > { %328 = vst [vmem:[%s497_s25 + $0x60] sm:$0xff] %v296_v5  ;;  %329 = vst [vmem:[%s497_s25 + $0x68] sm:$0xff] %v297_v6  ;;  %v299_v14 = vmax.f32 %v267_v7, 0.0  ;;  %v234_v17 = vmul.f32 %v464_v0, %v195_v3  ;;  %v268_v18 = vadd.f32 %v474_v1, %v229_v10  ;;  %v269_v19 = vadd.f32 %v474_v1, %v230_v11 }
  0x20   : > { %330 = vst [vmem:[%s497_s25 + $0x70] sm:$0xff] %v298_v9  ;;  %v270_v20 = vadd.f32 %v474_v1, %v231_v12  ;;  %v235_v21 = vmul.f32 %v464_v0, %v196_v8  ;;  %v271_v22 = vadd.f32 %v474_v1, %v232_v15  ;;  %v272_v23 = vadd.f32 %v474_v1, %v233_v16 }
  0x21   : > { %331 = vst [vmem:[%s497_s25 + $0x78] sm:$0xff] %v299_v14  ;;  %v273_v24 = vadd.f32 %v474_v1, %v234_v17  ;;  %v236_v25 = vmul.f32 %v464_v0, %v197_v13  ;;  %v300_v29 = vmax.f32 %v268_v18, 0.0  ;;  %v301_v30 = vmax.f32 %v269_v19, 0.0 }
  0x22   : > { %v302_v31 = vmax.f32 %v270_v20, 0.0  ;;  %v274_v32 = vadd.f32 %v474_v1, %v235_v21  ;;  %v303_v36 = vmax.f32 %v271_v22, 0.0  ;;  %v304_v37 = vmax.f32 %v272_v23, 0.0 }
  0x23   : > { %v305_v38 = vmax.f32 %v273_v24, 0.0  ;;  %v275_v39 = vadd.f32 %v474_v1, %v236_v25  ;;  %332 = vst [vmem:[%s497_s25 + $0x80] sm:$0xff] %v300_v29  ;;  %333 = vst [vmem:[%s497_s25 + $0x88] sm:$0xff] %v301_v30  ;;  %v237_v42 = vmul.f32 %v464_v0, %v198_v26  ;;  %v238_v43 = vmul.f32 %v464_v0, %v199_v27 }
  0x24   : > { %334 = vst [vmem:[%s497_s25 + $0x90] sm:$0xff] %v302_v31  ;;  %v306_v41 = vmax.f32 %v274_v32, 0.0  ;;  %v239_v44 = vmul.f32 %v464_v0, %v200_v28  ;;  %335 = vst [vmem:[%s497_s25 + $0x98] sm:$0xff] %v303_v36  ;;  %v240_v47 = vmul.f32 %v464_v0, %v201_v33  ;;  %v241_v48 = vmul.f32 %v464_v0, %v202_v34 }
  0x25   : > { %336 = vst [vmem:[%s497_s25 + $0xa0] sm:$0xff] %v304_v37  ;;  %337 = vst [vmem:[%s497_s25 + $0xa8] sm:$0xff] %v305_v38  ;;  %v307_v46 = vmax.f32 %v275_v39, 0.0  ;;  %v242_v49 = vmul.f32 %v464_v0, %v203_v35  ;;  %v276_v50 = vadd.f32 %v474_v1, %v237_v42  ;;  %v277_v51 = vadd.f32 %v474_v1, %v238_v43 }
  0x26   : > { %338 = vst [vmem:[%s497_s25 + $0xb0] sm:$0xff] %v306_v41  ;;  %v278_v52 = vadd.f32 %v474_v1, %v239_v44  ;;  %v243_v53 = vmul.f32 %v464_v0, %v204_v40  ;;  %v279_v54 = vadd.f32 %v474_v1, %v240_v47  ;;  %v280_v55 = vadd.f32 %v474_v1, %v241_v48 }
  0x27   : > { %339 = vst [vmem:[%s497_s25 + $0xb8] sm:$0xff] %v307_v46  ;;  %v281_v56 = vadd.f32 %v474_v1, %v242_v49  ;;  %v244_v57 = vmul.f32 %v464_v0, %v205_v45  ;;  %v308_v58 = vmax.f32 %v276_v50, 0.0  ;;  %v309_v59 = vmax.f32 %v277_v51, 0.0 }
  0x28   : > { %v310_v60 = vmax.f32 %v278_v52, 0.0  ;;  %v282_v61 = vadd.f32 %v474_v1, %v243_v53  ;;  %v311_v62 = vmax.f32 %v279_v54, 0.0  ;;  %v312_v63 = vmax.f32 %v280_v55, 0.0 }
  0x29   : > { %v313_v2 = vmax.f32 %v281_v56, 0.0  ;;  %v283_v3 = vadd.f32 %v474_v1, %v244_v57  ;;  %340 = vst [vmem:[%s497_s25 + $0xc0] sm:$0xff] %v308_v58  ;;  %341 = vst [vmem:[%s497_s25 + $0xc8] sm:$0xff] %v309_v59 }
  0x2a   : > { %342 = vst [vmem:[%s497_s25 + $0xd0] sm:$0xff] %v310_v60  ;;  %v314_v4 = vmax.f32 %v282_v61, 0.0  ;;  %343 = vst [vmem:[%s497_s25 + $0xd8] sm:$0xff] %v311_v62 }
  0x2b   : > { %344 = vst [vmem:[%s497_s25 + $0xe0] sm:$0xff] %v312_v63  ;;  %345 = vst [vmem:[%s497_s25 + $0xe8] sm:$0xff] %v313_v2  ;;  %v315_v0 = vmax.f32 %v283_v3, 0.0 }
  0x2c   : > { %346 = vst [vmem:[%s497_s25 + $0xf0] sm:$0xff] %v314_v4 }
  0x2d   : > { %347 = vst [vmem:[%s497_s25 + $0xf8] sm:$0xff] %v315_v0 }
  0x2e PF: > { %s13_s12 = sadd.s32 1, %s431_s12  }
  0x2f   : > { %p10_p4 = scmp.ge.s32.totalorder %s13_s12, 4  }
  0x31   :  { %12 = sbr.rel (!%p10_p4) target bundleno = 1 (0x1), region = 62 }

// kernel: bottleneck_v2_forward.6
= control target key start
LH: loop header
LB: loop body
LE: loop exit
PB: predicated region body
PF: predicated region fallthrough
CT: control target
= control target key end

     0   :  { %s1170_s21 = smov 0   ;;  %s1746_s0 = inlined_call_operand.vmem [shape: f32[512,128], index: 0, kind: input, shape index: {}]   ;;  %s1747_s1 = inlined_call_operand.vmem [shape: f32[1,128], index: 1, kind: input, shape index: {}]   ;;  %s1748_s2 = inlined_call_operand.vmem [shape: f32[1,128], index: 2, kind: input, shape index: {}]   ;;  %s1749_s3 = inlined_call_operand.vmem [shape: f32[128,128], index: 3, kind: input, shape index: {}]   ;;  %s1750_s4 = inlined_call_operand.vmem [shape: f32[512,128], index: 4, kind: output, shape index: {0}]   ;;  %s1751_s5 = inlined_call_operand.vmem [shape: f32[512,128], index: 5, kind: output, shape index: {1}]   ;;  %s1752_s6 = inlined_call_operand.vmem [shape: f32[2,128], index: 6, kind: output, shape index: {2}]  }
   0x1 LB: > { %s925_s22 = sadd.s32 4294967295, %s1132_s21   ;;  %p929_p0 = scmp.ge.s32.totalorder %s1132_s21, 1  ;;  %s1132_s21 = sphi %s1170_s21, %s17_s21  }
   0x2   : > { %p213_p1 = scmp.lt.s32.totalorder %s1132_s21, 3 }
   0x4   : > { %p214_p2 = pnand %p929_p0, %p213_p1 }
   0x5   : > { %v440_v0 = vld [vmem:[%s1749_s3] sm:$0xff] (!%p214_p2)  ;;  %v441_v1 = vld [vmem:[%s1749_s3 + $0x8] sm:$0xff] (!%p214_p2)  ;;  %v442_v2 = vld [vmem:[%s1749_s3 + $0x10] sm:$0xff] (!%p214_p2)  ;;  %s930_s29 = sshll.u32 (!%p214_p2), %s925_s22, 5  ;;  %p938_p4 = scmp.ne.s32.totalorder (!%p214_p2), %s925_s22, 0 }
   0x6   : > { %217 = sbr.rel (%p214_p2) target bundleno = 364 (0x16c), region = 36  ;;  %v1069_v3 = vpack.c.bf16 (!%p214_p2), %v441_v1, %v440_v0  ;;  %v443_v4 = vld [vmem:[%s1749_s3 + $0x18] sm:$0xff] (!%p214_p2)  ;;  %v444_v5 = vld [vmem:[%s1749_s3 + $0x20] sm:$0xff] (!%p214_p2)  ;;  %v445_v6 = vld [vmem:[%s1749_s3 + $0x28] sm:$0xff] (!%p214_p2)  ;;  %p249_p3 = scmp.lt.s32.totalorder (!%p214_p2), %s930_s29, 63 }
   0x7   : > { %v1073_v7 = vpack.c.bf16 (!%p214_p2), %v443_v4, %v442_v2  ;;  %v446_v8 = vld [vmem:[%s1749_s3 + $0x30] sm:$0xff] (!%p214_p2)  ;;  %v447_v9 = vld [vmem:[%s1749_s3 + $0x38] sm:$0xff] (!%p214_p2)  ;;  %v448_v10 = vld [vmem:[%s1749_s3 + $0x40] sm:$0xff] (!%p214_p2)  ;;  %v1077_v17 = vpack.c.bf16 (!%p214_p2), %v445_v6, %v444_v5 }
   0x8   : > { %1070 = vmatprep.subr.bf16.mxu0 (!%p214_p2), %v1069_v3  ;;  %1101 = vmatprep.subr.bf16.mxu1 (!%p214_p2), %v1069_v3  ;;  %v449_v11 = vld [vmem:[%s1749_s3 + $0x48] sm:$0xff] (!%p214_p2)  ;;  %v450_v12 = vld [vmem:[%s1749_s3 + $0x50] sm:$0xff] (!%p214_p2)  ;;  %v451_v13 = vld [vmem:[%s1749_s3 + $0x58] sm:$0xff] (!%p214_p2)  ;;  %v1235_v20 = vpack.c.bf16 (!%p214_p2), %v447_v9, %v446_v8 }
   0x9   : > { %1072 = vmatpush3.bf16.msra.mxu0 (!%p214_p2), %v1069_v3  ;;  %1109 = vmatpush3.bf16.msra.mxu1 (!%p214_p2), %v1069_v3  ;;  %v452_v14 = vld [vmem:[%s1749_s3 + $0x60] sm:$0xff] (!%p214_p2)  ;;  %v453_v15 = vld [vmem:[%s1749_s3 + $0x68] sm:$0xff] (!%p214_p2)  ;;  %v454_v16 = vld [vmem:[%s1749_s3 + $0x70] sm:$0xff] (!%p214_p2)  ;;  %v1248_v22 = vpack.c.bf16 (!%p214_p2), %v449_v11, %v448_v10  ;;  %v1250_v23 = vpack.c.bf16 (!%p214_p2), %v451_v13, %v450_v12 }
   0xa   : > { %1074 = vmatprep.subr.bf16.mxu0 (!%p214_p2), %v1073_v7  ;;  %1102 = vmatprep.subr.bf16.mxu1 (!%p214_p2), %v1073_v7  ;;  %v455_v18 = vld [vmem:[%s1749_s3 + $0x78] sm:$0xff] (!%p214_p2)  ;;  %v1233_v19 = vld [vmem:[%s1747_s1] ss:$0 sm:$0xff] (!%p214_p2)  ;;  %v1252_v24 = vpack.c.bf16 (!%p214_p2), %v453_v15, %v452_v14 }
   0xb   : > { %v1246_v21 = vld [vmem:[%s1748_s2] ss:$0 sm:$0xff] (!%p214_p2)  ;;  %v1254_v25 = vpack.c.bf16 (!%p214_p2), %v455_v18, %v454_v16 }
   0xd   : > { %s1754_s29 = smov (!%p249_p3, %s930_s29), 63  ;;  %1076 = vmatpush3.bf16.msra.mxu0 %v1073_v7  ;;  %1110 = vmatpush3.bf16.msra.mxu1 %v1073_v7 }
   0xe   : > { %s1228_s11 = sshll.u32 %s1754_s29, 3  ;;  %1078 = vmatprep.subr.bf16.mxu0 %v1077_v17  ;;  %1103 = vmatprep.subr.bf16.mxu1 %v1077_v17 }
   0xf   : > { %s1241_s16 = scalar_lea.vmem %s1746_s0, %s1228_s11  ;;  %s1280_s20 = scalar_lea.vmem %s1751_s5, %s1228_s11 }
  0x10   : > { %v266_v26 = vld [vmem:[%s1241_s16] sm:$0xff]  ;;  %v267_v28 = vld [vmem:[%s1241_s16 + $0x8] sm:$0xff]  ;;  %v268_v33 = vld [vmem:[%s1241_s16 + $0x10] sm:$0xff]  ;;  %s1560_s25 = scalar_lea.vmem %s1750_s4, %s1228_s11 }
  0x11   : > { %v282_v27 = vld [vmem:[%s1241_s16 + $0x80] sm:$0xff]  ;;  %v305_v29 = vmul.f32 %v1233_v19, %v266_v26  ;;  %v306_v31 = vmul.f32 %v1233_v19, %v267_v28  ;;  %v283_v32 = vld [vmem:[%s1241_s16 + $0x88] sm:$0xff]  ;;  %v284_v34 = vld [vmem:[%s1241_s16 + $0x90] sm:$0xff]  ;;  %v307_v36 = vmul.f32 %v1233_v19, %v268_v33  ;;  %1080 = vmatpush3.bf16.msra.mxu0 %v1077_v17  ;;  %1111 = vmatpush3.bf16.msra.mxu1 %v1077_v17 }
  0x12   : > { %v321_v30 = vmul.f32 %v1233_v19, %v282_v27  ;;  %v322_v35 = vmul.f32 %v1233_v19, %v283_v32  ;;  %v323_v37 = vmul.f32 %v1233_v19, %v284_v34  ;;  %v269_v38 = vld [vmem:[%s1241_s16 + $0x18] sm:$0xff]  ;;  %v270_v48 = vld [vmem:[%s1241_s16 + $0x20] sm:$0xff]  ;;  %v271_v50 = vld [vmem:[%s1241_s16 + $0x28] sm:$0xff]  ;;  %1082 = vmatprep.subr.bf16.mxu0 %v1235_v20  ;;  %1104 = vmatprep.subr.bf16.mxu1 %v1235_v20 }
  0x13   : > { %v285_v39 = vld [vmem:[%s1241_s16 + $0x98] sm:$0xff]  ;;  %v344_v40 = vadd.f32 %v1246_v21, %v305_v29  ;;  %v1273_v42 = vadd.f32 %v1246_v21, %v306_v31  ;;  %v308_v43 = vmul.f32 %v1233_v19, %v269_v38  ;;  %v1286_v45 = vadd.f32 %v1246_v21, %v307_v36  ;;  %v286_v49 = vld [vmem:[%s1241_s16 + $0xa0] sm:$0xff]  ;;  %v287_v55 = vld [vmem:[%s1241_s16 + $0xa8] sm:$0xff] }
  0x14   : > { %v360_v41 = vadd.f32 %v1246_v21, %v321_v30  ;;  %v1283_v44 = vadd.f32 %v1246_v21, %v322_v35  ;;  %v1289_v46 = vadd.f32 %v1246_v21, %v323_v37  ;;  %v324_v47 = vmul.f32 %v1233_v19, %v285_v39  ;;  %v272_v56 = vld [vmem:[%s1241_s16 + $0x30] sm:$0xff]  ;;  %v273_v6 = vld [vmem:[%s1241_s16 + $0x38] sm:$0xff]  ;;  %v274_v14 = vld [vmem:[%s1241_s16 + $0x40] sm:$0xff] }
  0x15   : > { %v376_v51 = vmax.f32 %v344_v40, 0.0  ;;  %v377_v53 = vmax.f32 %v1273_v42, 0.0  ;;  %v1297_v54 = vadd.f32 %v1246_v21, %v308_v43  ;;  %v288_v57 = vld [vmem:[%s1241_s16 + $0xb0] sm:$0xff]  ;;  %v378_v59 = vmax.f32 %v1286_v45, 0.0  ;;  %1084 = vmatpush3.bf16.msra.mxu0 %v1235_v20  ;;  %1112 = vmatpush3.bf16.msra.mxu1 %v1235_v20  ;;  %v289_v10 = vld [vmem:[%s1241_s16 + $0xb8] sm:$0xff]  ;;  %v290_v15 = vld [vmem:[%s1241_s16 + $0xc0] sm:$0xff] }
  0x16   : > { %v392_v52 = vmax.f32 %v360_v41, 0.0  ;;  %v393_v58 = vmax.f32 %v1283_v44, 0.0  ;;  %v394_v60 = vmax.f32 %v1289_v46, 0.0  ;;  %v1308_v61 = vadd.f32 %v1246_v21, %v324_v47  ;;  %1086 = vmatprep.subr.bf16.mxu0 %v1248_v22  ;;  %1105 = vmatprep.subr.bf16.mxu1 %v1248_v22  ;;  %v275_v26 = vld [vmem:[%s1241_s16 + $0x48] sm:$0xff]  ;;  %v276_v32 = vld [vmem:[%s1241_s16 + $0x50] sm:$0xff]  ;;  %v277_v39 = vld [vmem:[%s1241_s16 + $0x58] sm:$0xff] }
  0x17   : > { %408 = vst [vmem:[%s1280_s20] sm:$0xff] %v376_v51  ;;  %1021 = vmatprep.mubr.f32.mxu0 %v376_v51  ;;  %409 = vst [vmem:[%s1280_s20 + $0x8] sm:$0xff] %v377_v53  ;;  %v379_v62 = vmax.f32 %v1297_v54, 0.0  ;;  %v309_v63 = vmul.f32 %v1233_v19, %v270_v48  ;;  %v325_v0 = vmul.f32 %v1233_v19, %v286_v49  ;;  %v291_v27 = vld [vmem:[%s1241_s16 + $0xc8] sm:$0xff]  ;;  %v292_v36 = vld [vmem:[%s1241_s16 + $0xd0] sm:$0xff] }
  0x18   : > { %424 = vst [vmem:[%s1280_s20 + $0x80] sm:$0xff] %v392_v52  ;;  %1045 = vmatprep.mubr.f32.mxu1 %v392_v52  ;;  %v310_v1 = vmul.f32 %v1233_v19, %v271_v50  ;;  %425 = vst [vmem:[%s1280_s20 + $0x88] sm:$0xff] %v393_v58  ;;  %v395_v2 = vmax.f32 %v1308_v61, 0.0  ;;  %v326_v3 = vmul.f32 %v1233_v19, %v287_v55  ;;  %v293_v48 = vld [vmem:[%s1241_s16 + $0xd8] sm:$0xff]  ;;  %v278_v55 = vld [vmem:[%s1241_s16 + $0x60] sm:$0xff] }
  0x19   : > { %410 = vst [vmem:[%s1280_s20 + $0x10] sm:$0xff] %v378_v59  ;;  %426 = vst [vmem:[%s1280_s20 + $0x90] sm:$0xff] %v394_v60  ;;  %v311_v4 = vmul.f32 %v1233_v19, %v272_v56  ;;  %v327_v5 = vmul.f32 %v1233_v19, %v288_v57  ;;  %v1339_v7 = vadd.f32 %v1246_v21, %v309_v63  ;;  %1088 = vmatpush3.bf16.msra.mxu0 %v1248_v22  ;;  %v294_v56 = vld [vmem:[%s1241_s16 + $0xe0] sm:$0xff] }
  0x1a   : > { %411 = vst [vmem:[%s1280_s20 + $0x18] sm:$0xff] %v379_v62  ;;  %v1342_v8 = vadd.f32 %v1246_v21, %v325_v0  ;;  %v1345_v9 = vadd.f32 %v1246_v21, %v310_v1  ;;  %427 = vst [vmem:[%s1280_s20 + $0x98] sm:$0xff] %v395_v2  ;;  %v1354_v11 = vadd.f32 %v1246_v21, %v326_v3  ;;  %1113 = vmatpush3.bf16.msra.mxu1 %v1248_v22  ;;  %v279_v3 = vld [vmem:[%s1241_s16 + $0x68] sm:$0xff] }
  0x1b   : > { %v1357_v12 = vadd.f32 %v1246_v21, %v311_v4  ;;  %v1360_v13 = vadd.f32 %v1246_v21, %v327_v5  ;;  %v380_v16 = vmax.f32 %v1339_v7, 0.0  ;;  %v312_v20 = vmul.f32 %v1233_v19, %v273_v6  ;;  %1090 = vmatprep.subr.bf16.mxu0 %v1250_v23  ;;  %1106 = vmatprep.subr.bf16.mxu1 %v1250_v23  ;;  %v295_v4 = vld [vmem:[%s1241_s16 + $0xe8] sm:$0xff] }
  0x1c   : > { %v396_v17 = vmax.f32 %v1342_v8, 0.0  ;;  %v381_v18 = vmax.f32 %v1345_v9, 0.0  ;;  %v397_v28 = vmax.f32 %v1354_v11, 0.0  ;;  %v328_v31 = vmul.f32 %v1233_v19, %v289_v10 }
  0x1d   : > { %v382_v29 = vmax.f32 %v1357_v12, 0.0  ;;  %v398_v30 = vmax.f32 %v1360_v13, 0.0  ;;  %412 = vst [vmem:[%s1280_s20 + $0x20] sm:$0xff] %v380_v16  ;;  %v1387_v33 = vadd.f32 %v1246_v21, %v312_v20  ;;  %v313_v34 = vmul.f32 %v1233_v19, %v274_v14  ;;  %1092 = vmatpush3.bf16.msra.mxu0 %v1250_v23  ;;  %v280_v14 = vld [vmem:[%s1241_s16 + $0x70] sm:$0xff] }
  0x1e   : > { %428 = vst [vmem:[%s1280_s20 + $0xa0] sm:$0xff] %v396_v17  ;;  %413 = vst [vmem:[%s1280_s20 + $0x28] sm:$0xff] %v381_v18  ;;  %v329_v35 = vmul.f32 %v1233_v19, %v290_v15  ;;  %v1404_v22 = vadd.f32 %v1246_v21, %v328_v31  ;;  %v314_v37 = vmul.f32 %v1233_v19, %v275_v26  ;;  %1114 = vmatpush3.bf16.msra.mxu1 %v1250_v23  ;;  %v296_v31 = vld [vmem:[%s1241_s16 + $0xf0] sm:$0xff] }
  0x1f   : > { %429 = vst [vmem:[%s1280_s20 + $0xa8] sm:$0xff] %v397_v28  ;;  %414 = vst [vmem:[%s1280_s20 + $0x30] sm:$0xff] %v382_v29  ;;  %v330_v38 = vmul.f32 %v1233_v19, %v291_v27  ;;  %v383_v40 = vmax.f32 %v1387_v33, 0.0  ;;  %v1411_v41 = vadd.f32 %v1246_v21, %v313_v34  ;;  %v315_v47 = vmul.f32 %v1233_v19, %v276_v32 }
  0x20   : > { %430 = vst [vmem:[%s1280_s20 + $0xb0] sm:$0xff] %v398_v30  ;;  %v1414_v43 = vadd.f32 %v1246_v21, %v329_v35  ;;  %v399_v49 = vmax.f32 %v1404_v22, 0.0  ;;  %v1420_v50 = vadd.f32 %v1246_v21, %v314_v37  ;;  %v331_v52 = vmul.f32 %v1233_v19, %v292_v36  ;;  %1094 = vmatprep.subr.bf16.mxu0 %v1252_v24  ;;  %v281_v37 = vld [vmem:[%s1241_s16 + $0x78] sm:$0xff] }
  0x21   : > { %v1423_v51 = vadd.f32 %v1246_v21, %v330_v38  ;;  %415 = vst [vmem:[%s1280_s20 + $0x38] sm:$0xff] %v383_v40  ;;  %v384_v57 = vmax.f32 %v1411_v41, 0.0  ;;  %v1436_v0 = vadd.f32 %v1246_v21, %v315_v47  ;;  %v316_v1 = vmul.f32 %v1233_v19, %v277_v39  ;;  %1107 = vmatprep.subr.bf16.mxu1 %v1252_v24 }
  0x22   : > { %v400_v63 = vmax.f32 %v1414_v43, 0.0  ;;  %431 = vst [vmem:[%s1280_s20 + $0xb8] sm:$0xff] %v399_v49  ;;  %v385_v23 = vmax.f32 %v1420_v50, 0.0  ;;  %v1449_v6 = vadd.f32 %v1246_v21, %v331_v52  ;;  %v332_v10 = vmul.f32 %v1233_v19, %v293_v48  ;;  %1096 = vmatpush3.bf16.msra.mxu0 %v1252_v24  ;;  %1115 = vmatpush3.bf16.msra.mxu1 %v1252_v24  ;;  %v297_v52 = vld [vmem:[%s1241_s16 + $0xf8] sm:$0xff] }
  0x23   : > { %v401_v5 = vmax.f32 %v1423_v51, 0.0  ;;  %416 = vst [vmem:[%s1280_s20 + $0x40] sm:$0xff] %v384_v57  ;;  %v386_v15 = vmax.f32 %v1436_v0, 0.0  ;;  %v1461_v20 = vadd.f32 %v1246_v21, %v316_v1  ;;  %v317_v26 = vmul.f32 %v1233_v19, %v278_v55  ;;  %1098 = vmatprep.subr.bf16.mxu0 %v1254_v25  ;;  %1108 = vmatprep.subr.bf16.mxu1 %v1254_v25 }
  0x24   : > { %432 = vst [vmem:[%s1280_s20 + $0xc0] sm:$0xff] %v400_v63  ;;  %v333_v27 = vmul.f32 %v1233_v19, %v294_v56  ;;  %417 = vst [vmem:[%s1280_s20 + $0x48] sm:$0xff] %v385_v23  ;;  %v402_v32 = vmax.f32 %v1449_v6, 0.0  ;;  %v1474_v34 = vadd.f32 %v1246_v21, %v332_v10  ;;  %v318_v35 = vmul.f32 %v1233_v19, %v279_v3 }
  0x25   : > { %433 = vst [vmem:[%s1280_s20 + $0xc8] sm:$0xff] %v401_v5  ;;  %v334_v36 = vmul.f32 %v1233_v19, %v295_v4  ;;  %418 = vst [vmem:[%s1280_s20 + $0x50] sm:$0xff] %v386_v15  ;;  %v387_v38 = vmax.f32 %v1461_v20, 0.0  ;;  %v356_v39 = vadd.f32 %v1246_v21, %v317_v26  ;;  %v319_v48 = vmul.f32 %v1233_v19, %v280_v14 }
  0x26   : > { %v372_v47 = vadd.f32 %v1246_v21, %v333_v27  ;;  %434 = vst [vmem:[%s1280_s20 + $0xd0] sm:$0xff] %v402_v32  ;;  %v403_v24 = vmax.f32 %v1474_v34, 0.0  ;;  %v357_v55 = vadd.f32 %v1246_v21, %v318_v35  ;;  %v335_v1 = vmul.f32 %v1233_v19, %v296_v31  ;;  %1100 = vmatpush3.bf16.msra.mxu0 %v1254_v25 }
  0x27   : > { %v373_v56 = vadd.f32 %v1246_v21, %v334_v36  ;;  %419 = vst [vmem:[%s1280_s20 + $0x58] sm:$0xff] %v387_v38  ;;  %v388_v3 = vmax.f32 %v356_v39, 0.0  ;;  %v358_v10 = vadd.f32 %v1246_v21, %v319_v48  ;;  %v320_v14 = vmul.f32 %v1233_v19, %v281_v37  ;;  %1116 = vmatpush3.bf16.msra.mxu1 %v1254_v25 }
  0x28   : > { %v404_v4 = vmax.f32 %v372_v47, 0.0  ;;  %435 = vst [vmem:[%s1280_s20 + $0xd8] sm:$0xff] %v403_v24  ;;  %v389_v20 = vmax.f32 %v357_v55, 0.0  ;;  %v374_v27 = vadd.f32 %v1246_v21, %v335_v1  ;;  %v336_v34 = vmul.f32 %v1233_v19, %v297_v52 }
  0x29   : > { %v405_v26 = vmax.f32 %v373_v56, 0.0  ;;  %420 = vst [vmem:[%s1280_s20 + $0x60] sm:$0xff] %v388_v3  ;;  %v390_v31 = vmax.f32 %v358_v10, 0.0  ;;  %v359_v35 = vadd.f32 %v1246_v21, %v320_v14  ;;  %1022 = vmatmul.mubr.f32.vlgmr.msra.gmra.mrb[0].mxu0 %v377_v53  ;;  %v1134_v50 = vmov (!%p938_p4), 0.0  }
  0x2a   : > { %436 = vst [vmem:[%s1280_s20 + $0xe0] sm:$0xff] %v404_v4  ;;  %421 = vst [vmem:[%s1280_s20 + $0x68] sm:$0xff] %v389_v20  ;;  %v406_v36 = vmax.f32 %v374_v27, 0.0  ;;  %v375_v37 = vadd.f32 %v1246_v21, %v336_v34  ;;  %1046 = vmatmul.mubr.f32.vlgmr.msra.gmra.mrb[0].mxu1 %v393_v58  ;;  %1024 = vmatprep.mubr.f32.mxu0 %v378_v59 }
  0x2b   : > { %437 = vst [vmem:[%s1280_s20 + $0xe8] sm:$0xff] %v405_v26  ;;  %422 = vst [vmem:[%s1280_s20 + $0x70] sm:$0xff] %v390_v31  ;;  %v391_v39 = vmax.f32 %v359_v35, 0.0  ;;  %1048 = vmatprep.mubr.f32.mxu1 %v394_v60 }
  0x2c   : > { %438 = vst [vmem:[%s1280_s20 + $0xf0] sm:$0xff] %v406_v36  ;;  %v407_v19 = vmax.f32 %v375_v37, 0.0  ;;  %717 = vst [vmem:[%s1752_s6] sm:$0x3] (!%p938_p4), %v1134_v50 }
  0x2d   : > { %423 = vst [vmem:[%s1280_s20 + $0x78] sm:$0xff] %v391_v39  ;;  %1025 = vmatmul.mubr.f32.gmra.mrb[2].mxu0 %v379_v62 }
  0x2e   : > { %439 = vst [vmem:[%s1280_s20 + $0xf8] sm:$0xff] %v407_v19  ;;  %1049 = vmatmul.mubr.f32.gmra.mrb[2].mxu1 %v395_v2  ;;  %1027 = vmatprep.mubr.f32.mxu0 %v380_v16 }
  0x2f   : > { %1051 = vmatprep.mubr.f32.mxu1 %v396_v17 }
  0x31   : > { %1028 = vmatmul.mubr.f32.gmra.mrb[4].mxu0 %v381_v18 }
  0x32   : > { %1052 = vmatmul.mubr.f32.gmra.mrb[4].mxu1 %v397_v28  ;;  %1030 = vmatprep.mubr.f32.mxu0 %v382_v29 }
  0x33   : > { %1054 = vmatprep.mubr.f32.mxu1 %v398_v30 }
  0x35   : > { %1031 = vmatmul.mubr.f32.gmra.mrb[6].mxu0 %v383_v40 }
  0x36   : > { %1055 = vmatmul.mubr.f32.gmra.mrb[6].mxu1 %v399_v49  ;;  %1033 = vmatprep.mubr.f32.mxu0 %v384_v57 }
  0x37   : > { %1057 = vmatprep.mubr.f32.mxu1 %v400_v63 }
  0x39   : > { %1034 = vmatmul.mubr.f32.gmra.mrb[8].mxu0 %v385_v23 }
  0x3a   : > { %1058 = vmatmul.mubr.f32.gmra.mrb[8].mxu1 %v401_v5  ;;  %1036 = vmatprep.mubr.f32.mxu0 %v386_v15 }
  0x3b   : > { %1060 = vmatprep.mubr.f32.mxu1 %v402_v32 }
  0x3d   : > { %1037 = vmatmul.mubr.f32.gmra.mrb[10].mxu0 %v387_v38 }
  0x3e   : > { %1061 = vmatmul.mubr.f32.gmra.mrb[10].mxu1 %v403_v24  ;;  %1039 = vmatprep.mubr.f32.mxu0 %v388_v3 }
  0x3f   : > { %1063 = vmatprep.mubr.f32.mxu1 %v404_v4 }
  0x41   : > { %1040 = vmatmul.mubr.f32.gmra.mrb[12].mxu0 %v389_v20 }
  0x42   : > { %1064 = vmatmul.mubr.f32.gmra.mrb[12].mxu1 %v405_v26  ;;  %1042 = vmatprep.mubr.f32.mxu0 %v390_v31 }
  0x43   : > { %1066 = vmatprep.mubr.f32.mxu1 %v406_v36 }
  0x45   : > { %1043 = vmatmul.mubr.f32.gmra.mrb[14].mxu0 %v391_v39 }
  0x46   : > { %1067 = vmatmul.mubr.f32.gmra.mrb[14].mxu1 %v407_v19 }
  0xfc   : > { %v1562_v21 = vpop.f32.mrb[0].mxu0 }
  0xfd   : > { %v1564_v25 = vpop.f32.mrb[0].mxu1  ;;  %682 = vst [vmem:[%s1560_s25 + $0x8] sm:$0xff] %v1562_v21  ;;  %v1570_v42 = vpop.f32.mrb[1].mxu0 }
  0xfe   : > { %698 = vst [vmem:[%s1560_s25 + $0x88] sm:$0xff] %v1564_v25  ;;  %v1572_v44 = vpop.f32.mrb[1].mxu1  ;;  %681 = vst [vmem:[%s1560_s25] sm:$0xff] %v1570_v42 }
  0xff   : > { %697 = vst [vmem:[%s1560_s25 + $0x80] sm:$0xff] %v1572_v44 }
 0x100   : > { %v1578_v45 = vpop.f32.mrb[2].mxu0 }
 0x101   : > { %v1580_v46 = vpop.f32.mrb[2].mxu1  ;;  %684 = vst [vmem:[%s1560_s25 + $0x18] sm:$0xff] %v1578_v45  ;;  %v1586_v53 = vpop.f32.mrb[3].mxu0 }
 0x102   : > { %700 = vst [vmem:[%s1560_s25 + $0x98] sm:$0xff] %v1580_v46  ;;  %v1588_v54 = vpop.f32.mrb[3].mxu1  ;;  %683 = vst [vmem:[%s1560_s25 + $0x10] sm:$0xff] %v1586_v53 }
 0x103   : > { %699 = vst [vmem:[%s1560_s25 + $0x90] sm:$0xff] %v1588_v54 }
 0x104   : > { %v1594_v58 = vpop.f32.mrb[4].mxu0 }
 0x105   : > { %v1596_v59 = vpop.f32.mrb[4].mxu1  ;;  %686 = vst [vmem:[%s1560_s25 + $0x28] sm:$0xff] %v1594_v58  ;;  %v542_v60 = vpop.f32.mrb[5].mxu0 }
 0x106   : > { %702 = vst [vmem:[%s1560_s25 + $0xa8] sm:$0xff] %v1596_v59  ;;  %v1602_v61 = vpop.f32.mrb[5].mxu1  ;;  %685 = vst [vmem:[%s1560_s25 + $0x20] sm:$0xff] %v542_v60 }
 0x107   : > { %701 = vst [vmem:[%s1560_s25 + $0xa0] sm:$0xff] %v1602_v61 }
 0x108   : > { %v1607_v62 = vpop.f32.mrb[6].mxu0 }
 0x109   : > { %v1609_v2 = vpop.f32.mrb[6].mxu1  ;;  %688 = vst [vmem:[%s1560_s25 + $0x38] sm:$0xff] %v1607_v62  ;;  %v552_v7 = vpop.f32.mrb[7].mxu0 }
 0x10a   : > { %704 = vst [vmem:[%s1560_s25 + $0xb8] sm:$0xff] %v1609_v2  ;;  %v1615_v8 = vpop.f32.mrb[7].mxu1  ;;  %687 = vst [vmem:[%s1560_s25 + $0x30] sm:$0xff] %v552_v7 }
 0x10b   : > { %703 = vst [vmem:[%s1560_s25 + $0xb0] sm:$0xff] %v1615_v8 }
 0x10c   : > { %v1620_v9 = vpop.f32.mrb[8].mxu0 }
 0x10d   : > { %v1622_v11 = vpop.f32.mrb[8].mxu1  ;;  %690 = vst [vmem:[%s1560_s25 + $0x48] sm:$0xff] %v1620_v9  ;;  %v562_v12 = vpop.f32.mrb[9].mxu0 }
 0x10e   : > { %706 = vst [vmem:[%s1560_s25 + $0xc8] sm:$0xff] %v1622_v11  ;;  %v1628_v13 = vpop.f32.mrb[9].mxu1  ;;  %689 = vst [vmem:[%s1560_s25 + $0x40] sm:$0xff] %v562_v12 }
 0x10f   : > { %705 = vst [vmem:[%s1560_s25 + $0xc0] sm:$0xff] %v1628_v13 }
 0x110   : > { %v1038_v16 = vpop.f32.mrb[10].mxu0 }
 0x111   : > { %v1633_v17 = vpop.f32.mrb[10].mxu1  ;;  %692 = vst [vmem:[%s1560_s25 + $0x58] sm:$0xff] %v1038_v16  ;;  %v572_v18 = vpop.f32.mrb[11].mxu0 }
 0x112   : > { %708 = vst [vmem:[%s1560_s25 + $0xd8] sm:$0xff] %v1633_v17  ;;  %v1638_v28 = vpop.f32.mrb[11].mxu1  ;;  %691 = vst [vmem:[%s1560_s25 + $0x50] sm:$0xff] %v572_v18 }
 0x113   : > { %707 = vst [vmem:[%s1560_s25 + $0xd0] sm:$0xff] %v1638_v28 }
 0x114   : > { %v1041_v29 = vpop.f32.mrb[12].mxu0 }
 0x115   : > { %v1643_v30 = vpop.f32.mrb[12].mxu1  ;;  %694 = vst [vmem:[%s1560_s25 + $0x68] sm:$0xff] %v1041_v29  ;;  %v582_v33 = vpop.f32.mrb[13].mxu0  ;;  %716 = sbr.rel (%p938_p4) target bundleno = 284 (0x11c), region = 40 }
 0x116   : > { %710 = vst [vmem:[%s1560_s25 + $0xe8] sm:$0xff] %v1643_v30  ;;  %v1648_v22 = vpop.f32.mrb[13].mxu1  ;;  %693 = vst [vmem:[%s1560_s25 + $0x60] sm:$0xff] %v582_v33 }
 0x117   : > { %709 = vst [vmem:[%s1560_s25 + $0xe0] sm:$0xff] %v1648_v22 }
 0x118   : > { %v1044_v40 = vpop.f32.mrb[14].mxu0 }
 0x119   : > { %v1653_v41 = vpop.f32.mrb[14].mxu1  ;;  %696 = vst [vmem:[%s1560_s25 + $0x78] sm:$0xff] %v1044_v40  ;;  %v592_v43 = vpop.f32.mrb[15].mxu0 }
 0x11a   : > { %712 = vst [vmem:[%s1560_s25 + $0xf8] sm:$0xff] %v1653_v41  ;;  %v1658_v49 = vpop.f32.mrb[15].mxu1  ;;  %695 = vst [vmem:[%s1560_s25 + $0x70] sm:$0xff] %v592_v43 }
 0x11b   : > { %711 = vst [vmem:[%s1560_s25 + $0xf0] sm:$0xff] %v1658_v49 }
 0x11c PF: > { %v719_v51 = vadd.f32 %v1562_v21, %v1570_v42  ;;  %v756_v0 = vmul.f32 %v1570_v42, %v1570_v42  ;;  %v757_v23 = vmul.f32 %v1562_v21, %v1562_v21  ;;  %v758_v6 = vmul.f32 %v1586_v53, %v1586_v53 }
 0x11d   : > { %v759_v32 = vmul.f32 %v1578_v45, %v1578_v45  ;;  %v760_v48 = vmul.f32 %v542_v60, %v542_v60  ;;  %v761_v55 = vmul.f32 %v1594_v58, %v1594_v58  ;;  %v762_v3 = vmul.f32 %v552_v7, %v552_v7 }
 0x11e   : > { %v720_v57 = vadd.f32 %v719_v51, %v1586_v53  ;;  %v788_v38 = vadd.f32 %v757_v23, %v756_v0  ;;  %v763_v14 = vmul.f32 %v1607_v62, %v1607_v62  ;;  %v764_v27 = vmul.f32 %v562_v12, %v562_v12 }
 0x11f   : > { %v765_v35 = vmul.f32 %v1620_v9, %v1620_v9  ;;  %v766_v39 = vmul.f32 %v572_v18, %v572_v18  ;;  %v767_v42 = vmul.f32 %v1038_v16, %v1038_v16  ;;  %v770_v51 = vmul.f32 %v592_v43, %v592_v43 }
 0x120   : > { %v721_v63 = vadd.f32 %v1578_v45, %v720_v57  ;;  %v789_v52 = vadd.f32 %v788_v38, %v758_v6  ;;  %vm825_vm0 = vcmask 1040384  }
 0x122   : > { %v722_v5 = vadd.f32 %v721_v63, %v542_v60  ;;  %v790_v56 = vadd.f32 %v789_v52, %v759_v32  ;;  %v775_v32 = vmul.f32 %v1580_v46, %v1580_v46  ;;  %v777_v52 = vmul.f32 %v1596_v59, %v1596_v59 }
 0x124   : > { %v723_v15 = vadd.f32 %v1594_v58, %v722_v5  ;;  %v791_v4 = vadd.f32 %v790_v56, %v760_v48  ;;  %v768_v58 = vmul.f32 %v582_v33, %v582_v33 }
 0x126   : > { %v724_v47 = vadd.f32 %v723_v15, %v552_v7  ;;  %v792_v20 = vadd.f32 %v791_v4, %v761_v55  ;;  %v778_v55 = vmul.f32 %v1615_v8, %v1615_v8  ;;  %v780_v4 = vmul.f32 %v1628_v13, %v1628_v13 }
 0x128   : > { %v725_v24 = vadd.f32 %v1607_v62, %v724_v47  ;;  %v793_v34 = vadd.f32 %v792_v20, %v762_v3  ;;  %v769_v62 = vmul.f32 %v1041_v29, %v1041_v29  ;;  %v776_v47 = vmul.f32 %v1602_v61, %v1602_v61 }
 0x12a   : > { %v726_v1 = vadd.f32 %v725_v24, %v562_v12  ;;  %v794_v36 = vadd.f32 %v793_v34, %v763_v14  ;;  %v781_v14 = vmul.f32 %v1622_v11, %v1622_v11  ;;  %v783_v34 = vmul.f32 %v1633_v17, %v1633_v17 }
 0x12c   : > { %v727_v10 = vadd.f32 %v1620_v9, %v726_v1  ;;  %v795_v19 = vadd.f32 %v794_v36, %v764_v27  ;;  %v771_v9 = vmul.f32 %v1044_v40, %v1044_v40  ;;  %v779_v1 = vmul.f32 %v1609_v2, %v1609_v2 }
 0x12e   : > { %v728_v26 = vadd.f32 %v727_v10, %v572_v18  ;;  %v796_v45 = vadd.f32 %v795_v19, %v765_v35  ;;  %v784_v35 = vmul.f32 %v1648_v22, %v1648_v22  ;;  %v786_v19 = vmul.f32 %v1658_v49, %v1658_v49 }
 0x130   : > { %v729_v31 = vadd.f32 %v1038_v16, %v728_v26  ;;  %v797_v60 = vadd.f32 %v796_v45, %v766_v39  ;;  %v772_v16 = vmul.f32 %v1572_v44, %v1572_v44  ;;  %v782_v26 = vmul.f32 %v1638_v28, %v1638_v28 }
 0x132   : > { %v730_v37 = vadd.f32 %v729_v31, %v582_v33  ;;  %v798_v50 = vadd.f32 %v797_v60, %v767_v42 }
 0x134   : > { %v731_v21 = vadd.f32 %v1041_v29, %v730_v37  ;;  %v799_v57 = vadd.f32 %v798_v50, %v768_v58  ;;  %v773_v29 = vmul.f32 %v1564_v25, %v1564_v25  ;;  %v785_v37 = vmul.f32 %v1643_v30, %v1643_v30 }
 0x136   : > { %v732_v53 = vadd.f32 %v731_v21, %v592_v43  ;;  %v800_v0 = vadd.f32 %v799_v57, %v769_v62  ;;  %v774_v43 = vmul.f32 %v1588_v54, %v1588_v54 }
 0x138   : > { %v733_v7 = vadd.f32 %v1044_v40, %v732_v53  ;;  %v801_v23 = vadd.f32 %v800_v0, %v770_v51 }
 0x13a   : > { %v734_v12 = vadd.f32 %v733_v7, %v1572_v44  ;;  %v802_v5 = vadd.f32 %v801_v23, %v771_v9 }
 0x13c   : > { %v735_v63 = vadd.f32 %v1564_v25, %v734_v12  ;;  %v803_v15 = vadd.f32 %v802_v5, %v772_v16 }
 0x13e   : > { %v736_v18 = vadd.f32 %v735_v63, %v1588_v54  ;;  %v804_v38 = vadd.f32 %v803_v15, %v773_v29 }
 0x140   : > { %v737_v33 = vadd.f32 %v1580_v46, %v736_v18  ;;  %v805_v48 = vadd.f32 %v804_v38, %v774_v43 }
 0x142   : > { %v738_v6 = vadd.f32 %v737_v33, %v1602_v61  ;;  %v806_v24 = vadd.f32 %v805_v48, %v775_v32 }
 0x144   : > { %v739_v40 = vadd.f32 %v1596_v59, %v738_v6  ;;  %v807_v56 = vadd.f32 %v806_v24, %v776_v47 }
 0x146   : > { %v740_v44 = vadd.f32 %v739_v40, %v1615_v8  ;;  %v808_v3 = vadd.f32 %v807_v56, %v777_v52 }
 0x148   : > { %v741_v25 = vadd.f32 %v1609_v2, %v740_v44  ;;  %v809_v10 = vadd.f32 %v808_v3, %v778_v55 }
 0x14a   : > { %v742_v54 = vadd.f32 %v741_v25, %v1628_v13  ;;  %v810_v20 = vadd.f32 %v809_v10, %v779_v1 }
 0x14c   : > { %v743_v46 = vadd.f32 %v1622_v11, %v742_v54  ;;  %v811_v27 = vadd.f32 %v810_v20, %v780_v4 }
 0x14e   : > { %v744_v61 = vadd.f32 %v743_v46, %v1638_v28  ;;  %v812_v31 = vadd.f32 %v811_v27, %v781_v14 }
 0x150   : > { %v745_v59 = vadd.f32 %v1633_v17, %v744_v61  ;;  %v813_v36 = vadd.f32 %v812_v31, %v782_v26  ;;  %v787_v17 = vmul.f32 %v1653_v41, %v1653_v41 }
 0x152   : > { %v746_v8 = vadd.f32 %v745_v59, %v1648_v22  ;;  %v814_v39 = vadd.f32 %v813_v36, %v783_v34 }
 0x154   : > { %v747_v2 = vadd.f32 %v1643_v30, %v746_v8  ;;  %v815_v21 = vadd.f32 %v814_v39, %v784_v35 }
 0x156   : > { %v748_v13 = vadd.f32 %v747_v2, %v1658_v49  ;;  %v816_v45 = vadd.f32 %v815_v21, %v785_v37  ;;  %v718_v49 = vld [vmem:[%s1752_s6] sm:$0x3] }
 0x158   : > { %v749_v11 = vadd.f32 %v1653_v41, %v748_v13  ;;  %v817_v58 = vadd.f32 %v816_v45, %v786_v19 }
 0x15a   : > { %v750_v28 = vrot.slane %v749_v11, 4  ;;  %v818_v22 = vadd.f32 %v817_v58, %v787_v17 }
 0x15c   : > { %v751_v42 = vadd.f32 %v750_v28, %v749_v11  ;;  %v819_v7 = vrot.slane %v818_v22, 4 }
 0x15e   : > { %v752_v53 = vrot.slane %v751_v42, 2  ;;  %v820_v62 = vadd.f32 %v819_v7, %v818_v22 }
 0x160   : > { %v753_v60 = vadd.f32 %v752_v53, %v751_v42  ;;  %v821_v12 = vrot.slane %v820_v62, 2 }
 0x162   : > { %v754_v50 = vrot.slane %v753_v60, 1  ;;  %v822_v30 = vadd.f32 %v821_v12, %v820_v62 }
 0x164   : > { %v755_v51 = vadd.f32 %v754_v50, %v753_v60  ;;  %v823_v57 = vrot.slane %v822_v30, 1 }
 0x166   : > { %v824_v63 = vadd.f32 %v823_v57, %v822_v30 }
 0x168   : > { %v826_v9 = vsel %vm825_vm0, %v755_v51, %v824_v63 }
 0x169   : > { %v827_v41 = vadd.f32 %v826_v9, %v718_v49 }
 0x16b   : > { %828 = vst [vmem:[%s1752_s6] sm:$0x3] %v827_v41 }
 0x16c PF: > { %s17_s21 = sadd.s32 1, %s1132_s21  }
 0x16d   : > { %p14_p5 = scmp.ge.s32.totalorder %s17_s21, 4  }
 0x16f   :  { %16 = sbr.rel (!%p14_p5) target bundleno = 1 (0x1), region = 90 }

// kernel: bottleneck_v2_forward.9
= control target key start
LH: loop header
LB: loop body
LE: loop exit
PB: predicated region body
PF: predicated region fallthrough
CT: control target
= control target key end

     0   :  { %s1163_s0 = inlined_call_operand.vmem [shape: f32[128,128], index: 0, kind: input, shape index: {}]   ;;  %s1164_s1 = inlined_call_operand.vmem [shape: f32[1,128], index: 1, kind: input, shape index: {}]   ;;  %s1165_s2 = inlined_call_operand.vmem [shape: f32[1,128], index: 2, kind: input, shape index: {}]   ;;  %s1166_s3 = inlined_call_operand.vmem [shape: f32[128,128], index: 3, kind: input, shape index: {}]   ;;  %s1167_s4 = inlined_call_operand.vmem [shape: f32[1,128], index: 4, kind: input, shape index: {}]   ;;  %s1168_s5 = inlined_call_operand.vmem [shape: f32[128,128], index: 5, kind: input, shape index: {}]   ;;  %s1169_s6 = inlined_call_operand.vmem [shape: f32[128,128], index: 6, kind: input, shape index: {}]   ;;  %s1170_s7 = inlined_call_operand.vmem [shape: f32[1,128], index: 7, kind: input, shape index: {}]   ;;  %s1171_s8 = inlined_call_operand.hbm [shape: f32[128,128], index: 8, kind: output, shape index: {}]  }
   0x1   :  { %v108_v0 = vld [vmem:[%s1166_s3] sm:$0xff]  ;;  %v109_v1 = vld [vmem:[%s1166_s3 + $0x8] sm:$0xff]  ;;  %v110_v5 = vld [vmem:[%s1166_s3 + $0x10] sm:$0xff] }
   0x2   :  { %v292_v2 = vld [vmem:[%s1169_s6] sm:$0xff]  ;;  %v688_v3 = vpack.c.bf16 %v109_v1, %v108_v0  ;;  %v293_v4 = vld [vmem:[%s1169_s6 + $0x8] sm:$0xff]  ;;  %v111_v6 = vld [vmem:[%s1166_s3 + $0x18] sm:$0xff] }
   0x3   :  { %v720_v7 = vpack.c.bf16 %v293_v4, %v292_v2  ;;  %v692_v8 = vpack.c.bf16 %v111_v6, %v110_v5  ;;  %v294_v9 = vld [vmem:[%s1169_s6 + $0x10] sm:$0xff]  ;;  %v295_v10 = vld [vmem:[%s1169_s6 + $0x18] sm:$0xff]  ;;  %v112_v11 = vld [vmem:[%s1166_s3 + $0x20] sm:$0xff] }
   0x4   :  { %689 = vmatprep.subr.bf16.mxu1 %v688_v3  ;;  %v724_v12 = vpack.c.bf16 %v295_v10, %v294_v9  ;;  %v113_v13 = vld [vmem:[%s1166_s3 + $0x28] sm:$0xff]  ;;  %v296_v14 = vld [vmem:[%s1169_s6 + $0x20] sm:$0xff]  ;;  %v114_v18 = vld [vmem:[%s1166_s3 + $0x30] sm:$0xff] }
   0x5   :  { %v297_v15 = vld [vmem:[%s1169_s6 + $0x28] sm:$0xff]  ;;  %691 = vmatpush3.bf16.msra.mxu1 %v688_v3  ;;  %721 = vmatprep.subr.bf16.mxu0 %v720_v7  ;;  %v696_v16 = vpack.c.bf16 %v113_v13, %v112_v11  ;;  %v115_v19 = vld [vmem:[%s1166_s3 + $0x38] sm:$0xff]  ;;  %v298_v20 = vld [vmem:[%s1169_s6 + $0x30] sm:$0xff] }
   0x6   :  { %723 = vmatpush3.bf16.msra.mxu0 %v720_v7  ;;  %693 = vmatprep.subr.bf16.mxu1 %v692_v8  ;;  %v728_v17 = vpack.c.bf16 %v297_v15, %v296_v14  ;;  %v299_v21 = vld [vmem:[%s1169_s6 + $0x38] sm:$0xff]  ;;  %v700_v22 = vpack.c.bf16 %v115_v19, %v114_v18  ;;  %v116_v23 = vld [vmem:[%s1166_s3 + $0x40] sm:$0xff]  ;;  %v117_v25 = vld [vmem:[%s1166_s3 + $0x48] sm:$0xff] }
   0x7   :  { %725 = vmatprep.subr.bf16.mxu0 %v724_v12  ;;  %v732_v24 = vpack.c.bf16 %v299_v21, %v298_v20  ;;  %v300_v26 = vld [vmem:[%s1169_s6 + $0x40] sm:$0xff]  ;;  %v301_v28 = vld [vmem:[%s1169_s6 + $0x48] sm:$0xff]  ;;  %v704_v33 = vpack.c.bf16 %v117_v25, %v116_v23  ;;  %v118_v35 = vld [vmem:[%s1166_s3 + $0x50] sm:$0xff] }
   0x8   :  { %v30_v27 = vld [vmem:[%s1163_s0] sm:$0xff]  ;;  %v736_v34 = vpack.c.bf16 %v301_v28, %v300_v26  ;;  %v119_v36 = vld [vmem:[%s1166_s3 + $0x58] sm:$0xff]  ;;  %v302_v38 = vld [vmem:[%s1169_s6 + $0x50] sm:$0xff] }
   0x9   :  { %695 = vmatpush3.bf16.msra.mxu1 %v692_v8  ;;  %v941_v29 = vld [vmem:[%s1164_s1] ss:$0 sm:$0xff]  ;;  %v303_v39 = vld [vmem:[%s1169_s6 + $0x58] sm:$0xff]  ;;  %v708_v41 = vpack.c.bf16 %v119_v36, %v118_v35  ;;  %v121_v44 = vld [vmem:[%s1166_s3 + $0x68] sm:$0xff] }
   0xa   :  { %727 = vmatpush3.bf16.msra.mxu0 %v724_v12  ;;  %697 = vmatprep.subr.bf16.mxu1 %v696_v16  ;;  %v946_v30 = vld [vmem:[%s1165_s2] ss:$0 sm:$0xff]  ;;  %v53_v31 = vmul.f32 %v941_v29, %v30_v27  ;;  %v740_v42 = vpack.c.bf16 %v303_v39, %v302_v38  ;;  %v305_v46 = vld [vmem:[%s1169_s6 + $0x68] sm:$0xff]  ;;  %v32_v49 = vld [vmem:[%s1163_s0 + $0x10] sm:$0xff] }
   0xb   :  { %729 = vmatprep.subr.bf16.mxu0 %v728_v17  ;;  %v276_v32 = vld [vmem:[%s1168_s5] sm:$0xff]  ;;  %v31_v47 = vld [vmem:[%s1163_s0 + $0x8] sm:$0xff]  ;;  %v122_v51 = vld [vmem:[%s1166_s3 + $0x70] sm:$0xff] }
   0xc   :  { %v76_v37 = vadd.f32 %v946_v30, %v53_v31  ;;  %664 = vmatprep.mubr.f32.mxu0 %v276_v32  ;;  %v120_v43 = vld [vmem:[%s1166_s3 + $0x60] sm:$0xff]  ;;  %v123_v52 = vld [vmem:[%s1166_s3 + $0x78] sm:$0xff] }
   0xd   :  { %699 = vmatpush3.bf16.msra.mxu1 %v696_v16  ;;  %v304_v45 = vld [vmem:[%s1169_s6 + $0x60] sm:$0xff]  ;;  %v712_v48 = vpack.c.bf16 %v121_v44, %v120_v43 }
   0xe   :  { %731 = vmatpush3.bf16.msra.mxu0 %v728_v17  ;;  %701 = vmatprep.subr.bf16.mxu1 %v700_v22  ;;  %v92_v40 = vmax.f32 %v76_v37, 0.0  ;;  %v744_v50 = vpack.c.bf16 %v305_v46, %v304_v45 }
   0xf   :  { %733 = vmatprep.subr.bf16.mxu0 %v732_v24 }
  0x10   :  { %608 = vmatprep.mubr.f32.mxu1 %v92_v40 }
  0x11   :  { %703 = vmatpush3.bf16.msra.mxu1 %v700_v22 }
  0x12   :  { %735 = vmatpush3.bf16.msra.mxu0 %v732_v24  ;;  %705 = vmatprep.subr.bf16.mxu1 %v704_v33 }
  0x13   :  { %737 = vmatprep.subr.bf16.mxu0 %v736_v34 }
  0x15   :  { %707 = vmatpush3.bf16.msra.mxu1 %v704_v33 }
  0x16   :  { %739 = vmatpush3.bf16.msra.mxu0 %v736_v34  ;;  %709 = vmatprep.subr.bf16.mxu1 %v708_v41 }
  0x17   :  { %741 = vmatprep.subr.bf16.mxu0 %v740_v42 }
  0x18   :  { %13 = vsyncpa [#allocation3], 0  ;;  %v306_v53 = vld [vmem:[%s1169_s6 + $0x70] sm:$0xff]  ;;  %v307_v54 = vld [vmem:[%s1169_s6 + $0x78] sm:$0xff]  ;;  %v54_v55 = vmul.f32 %v941_v29, %v31_v47  ;;  %v55_v56 = vmul.f32 %v941_v29, %v32_v49  ;;  %v716_v58 = vpack.c.bf16 %v123_v52, %v122_v51 }
  0x19   :  { %711 = vmatpush3.bf16.msra.mxu1 %v708_v41  ;;  %v33_v57 = vld [vmem:[%s1163_s0 + $0x18] sm:$0xff]  ;;  %v34_v59 = vld [vmem:[%s1163_s0 + $0x20] sm:$0xff]  ;;  %v748_v60 = vpack.c.bf16 %v307_v54, %v306_v53  ;;  %v35_v1 = vld [vmem:[%s1163_s0 + $0x28] sm:$0xff] }
  0x1a   :  { %743 = vmatpush3.bf16.msra.mxu0 %v740_v42  ;;  %713 = vmatprep.subr.bf16.mxu1 %v712_v48  ;;  %v77_v61 = vadd.f32 %v946_v30, %v54_v55  ;;  %v56_v62 = vmul.f32 %v941_v29, %v33_v57  ;;  %v78_v63 = vadd.f32 %v946_v30, %v55_v56  ;;  %v36_v2 = vld [vmem:[%s1163_s0 + $0x30] sm:$0xff]  ;;  %v37_v9 = vld [vmem:[%s1163_s0 + $0x38] sm:$0xff]  ;;  %v277_v10 = vld [vmem:[%s1168_s5 + $0x8] sm:$0xff] }
  0x1b   :  { %745 = vmatprep.subr.bf16.mxu0 %v744_v50  ;;  %v57_v0 = vmul.f32 %v941_v29, %v34_v59  ;;  %v58_v5 = vmul.f32 %v941_v29, %v35_v1  ;;  %v59_v8 = vmul.f32 %v941_v29, %v36_v2  ;;  %v38_v11 = vld [vmem:[%s1163_s0 + $0x40] sm:$0xff]  ;;  %v278_v12 = vld [vmem:[%s1168_s5 + $0x10] sm:$0xff]  ;;  %v60_v15 = vmul.f32 %v941_v29, %v37_v9  ;;  %v39_v19 = vld [vmem:[%s1163_s0 + $0x48] sm:$0xff] }
  0x1c   :  { %v93_v3 = vmax.f32 %v77_v61, 0.0  ;;  %v79_v4 = vadd.f32 %v946_v30, %v56_v62  ;;  %v94_v6 = vmax.f32 %v78_v63, 0.0  ;;  %v61_v18 = vmul.f32 %v941_v29, %v38_v11  ;;  %v279_v20 = vld [vmem:[%s1168_s5 + $0x18] sm:$0xff]  ;;  %v40_v21 = vld [vmem:[%s1163_s0 + $0x50] sm:$0xff]  ;;  %v280_v22 = vld [vmem:[%s1168_s5 + $0x20] sm:$0xff] }
  0x1d   :  { %715 = vmatpush3.bf16.msra.mxu1 %v712_v48  ;;  %v80_v7 = vadd.f32 %v946_v30, %v57_v0  ;;  %v81_v14 = vadd.f32 %v946_v30, %v58_v5  ;;  %v82_v17 = vadd.f32 %v946_v30, %v59_v8  ;;  %v83_v24 = vadd.f32 %v946_v30, %v60_v15  ;;  %v41_v31 = vld [vmem:[%s1163_s0 + $0x58] sm:$0xff]  ;;  %v281_v32 = vld [vmem:[%s1168_s5 + $0x28] sm:$0xff]  ;;  %v42_v33 = vld [vmem:[%s1163_s0 + $0x60] sm:$0xff] }
  0x1e   :  { %747 = vmatpush3.bf16.msra.mxu0 %v744_v50  ;;  %717 = vmatprep.subr.bf16.mxu1 %v716_v58  ;;  %v95_v13 = vmax.f32 %v79_v4, 0.0  ;;  %v62_v25 = vmul.f32 %v941_v29, %v39_v19  ;;  %v84_v27 = vadd.f32 %v946_v30, %v61_v18  ;;  %v63_v28 = vmul.f32 %v941_v29, %v40_v21  ;;  %v282_v34 = vld [vmem:[%s1168_s5 + $0x30] sm:$0xff]  ;;  %v43_v41 = vld [vmem:[%s1163_s0 + $0x68] sm:$0xff]  ;;  %v283_v42 = vld [vmem:[%s1168_s5 + $0x38] sm:$0xff] }
  0x1f   :  { %749 = vmatprep.subr.bf16.mxu0 %v748_v60  ;;  %v96_v16 = vmax.f32 %v80_v7, 0.0  ;;  %v97_v23 = vmax.f32 %v81_v14, 0.0  ;;  %v98_v26 = vmax.f32 %v82_v17, 0.0  ;;  %v99_v35 = vmax.f32 %v83_v24, 0.0  ;;  %v44_v43 = vld [vmem:[%s1163_s0 + $0x70] sm:$0xff]  ;;  %v284_v44 = vld [vmem:[%s1168_s5 + $0x40] sm:$0xff] }
  0x20   :  { %v85_v36 = vadd.f32 %v946_v30, %v62_v25  ;;  %v64_v37 = vmul.f32 %v941_v29, %v41_v31  ;;  %v100_v38 = vmax.f32 %v84_v27, 0.0  ;;  %v86_v39 = vadd.f32 %v946_v30, %v63_v28  ;;  %v45_v51 = vld [vmem:[%s1163_s0 + $0x78] sm:$0xff]  ;;  %v285_v52 = vld [vmem:[%s1168_s5 + $0x48] sm:$0xff]  ;;  %v286_v53 = vld [vmem:[%s1168_s5 + $0x50] sm:$0xff] }
  0x21   :  { %719 = vmatpush3.bf16.msra.mxu1 %v716_v58  ;;  %v65_v40 = vmul.f32 %v941_v29, %v42_v33  ;;  %v66_v47 = vmul.f32 %v941_v29, %v43_v41  ;;  %v67_v50 = vmul.f32 %v941_v29, %v44_v43  ;;  %v68_v56 = vmul.f32 %v941_v29, %v45_v51  ;;  %v287_v59 = vld [vmem:[%s1168_s5 + $0x58] sm:$0xff]  ;;  %v289_v63 = vld [vmem:[%s1168_s5 + $0x68] sm:$0xff]  ;;  %v290_v0 = vld [vmem:[%s1168_s5 + $0x70] sm:$0xff] }
  0x22   :  { %751 = vmatpush3.bf16.msra.mxu0 %v748_v60  ;;  %v101_v45 = vmax.f32 %v85_v36, 0.0  ;;  %v87_v46 = vadd.f32 %v946_v30, %v64_v37  ;;  %v102_v48 = vmax.f32 %v86_v39, 0.0  ;;  %v288_v60 = vld [vmem:[%s1168_s5 + $0x60] sm:$0xff] }
  0x23   :  { %v88_v49 = vadd.f32 %v946_v30, %v65_v40  ;;  %v89_v55 = vadd.f32 %v946_v30, %v66_v47  ;;  %v90_v58 = vadd.f32 %v946_v30, %v67_v50  ;;  %v91_v62 = vadd.f32 %v946_v30, %v68_v56  ;;  %v291_v30 = vld [vmem:[%s1168_s5 + $0x78] sm:$0xff]  ;;  %v1112_v2 = vld [vmem:[%s1167_s4] ss:$0 sm:$0xff]  ;;  %s827_s4 = smov [#allocation2]  }
  0x24   :  { %609 = vmatmul.mubr.f32.vlgmr.msra.gmra.mrb[0].mxu1 %v93_v3  ;;  %v103_v54 = vmax.f32 %v87_v46, 0.0  ;;  %v1119_v8 = vld [vmem:[%s1170_s7] ss:$0 sm:$0xff]  ;;  %s497_s5 = sshll.u32 %s827_s4, 4  ;;  %s498_s5 = int_to_ptr.vmem [resolvable:$true] %s497_s5 }
  0x25   :  { %665 = vmatmul.mubr.f32.vlgmr.msra.gmra.mrb[0].mxu0 %v277_v10  ;;  %611 = vmatprep.mubr.f32.mxu1 %v94_v6  ;;  %v104_v57 = vmax.f32 %v88_v49, 0.0  ;;  %v105_v61 = vmax.f32 %v89_v55, 0.0  ;;  %v106_v29 = vmax.f32 %v90_v58, 0.0  ;;  %v107_v1 = vmax.f32 %v91_v62, 0.0  ;;  %s803_s7 = scalar_lea.vmem %s498_s5, 2048  ;;  %p808_p1 = scmp.lt.s32.totalorder %s498_s5, %s498_s5 }
  0x26   :  { %667 = vmatprep.mubr.f32.mxu0 %v278_v12  ;;  %p804_p0 = scmp.ne.s32.totalorder %s498_s5, %s803_s7  ;;  %p809_p2 = scmp.lt.s32.totalorder %s803_s7, %s803_s7 }
  0x28   :  { %612 = vmatmul.mubr.f32.gmra.mrb[2].mxu1 %v95_v13  ;;  %p810_p3 = por %p809_p2, %p808_p1 }
  0x29   :  { %614 = vmatprep.mubr.f32.mxu1 %v96_v16  ;;  %668 = vmatmul.mubr.f32.gmra.mrb[2].mxu0 %v279_v20 }
  0x2a   :  { %670 = vmatprep.mubr.f32.mxu0 %v280_v22  ;;  %p811_p4 = pnand %p810_p3, %p804_p0 }
  0x2c   :  { %615 = vmatmul.mubr.f32.gmra.mrb[4].mxu1 %v97_v23 }
  0x2d   :  { %617 = vmatprep.mubr.f32.mxu1 %v98_v26  ;;  %671 = vmatmul.mubr.f32.gmra.mrb[4].mxu0 %v281_v32 }
  0x2e   :  { %673 = vmatprep.mubr.f32.mxu0 %v282_v34 }
  0x30   :  { %618 = vmatmul.mubr.f32.gmra.mrb[6].mxu1 %v99_v35 }
  0x31   :  { %620 = vmatprep.mubr.f32.mxu1 %v100_v38  ;;  %674 = vmatmul.mubr.f32.gmra.mrb[6].mxu0 %v283_v42 }
  0x32   :  { %676 = vmatprep.mubr.f32.mxu0 %v284_v44 }
  0x34   :  { %621 = vmatmul.mubr.f32.gmra.mrb[8].mxu1 %v101_v45 }
  0x35   :  { %623 = vmatprep.mubr.f32.mxu1 %v102_v48  ;;  %677 = vmatmul.mubr.f32.gmra.mrb[8].mxu0 %v285_v52 }
  0x36   :  { %679 = vmatprep.mubr.f32.mxu0 %v286_v53 }
  0x38   :  { %624 = vmatmul.mubr.f32.gmra.mrb[10].mxu1 %v103_v54 }
  0x39   :  { %626 = vmatprep.mubr.f32.mxu1 %v104_v57  ;;  %680 = vmatmul.mubr.f32.gmra.mrb[10].mxu0 %v287_v59 }
  0x3a   :  { %682 = vmatprep.mubr.f32.mxu0 %v288_v60 }
  0x3c   :  { %627 = vmatmul.mubr.f32.gmra.mrb[12].mxu1 %v105_v61 }
  0x3d   :  { %629 = vmatprep.mubr.f32.mxu1 %v106_v29  ;;  %683 = vmatmul.mubr.f32.gmra.mrb[12].mxu0 %v289_v63 }
  0x3e   :  { %685 = vmatprep.mubr.f32.mxu0 %v290_v0 }
  0x40   :  { %630 = vmatmul.mubr.f32.gmra.mrb[14].mxu1 %v107_v1 }
  0x41   :  { %686 = vmatmul.mubr.f32.gmra.mrb[14].mxu0 %v291_v30 }
  0xf7   :  { %v610_v3 = vpop.f32.mrb[0].mxu1 }
  0xf8   :  { %v203_v4 = vadd.f32 %v610_v3, %v1112_v2  ;;  %v197_v5 = vpop.f32.mrb[1].mxu1  ;;  %v666_v6 = vpop.f32.mrb[0].mxu0 }
  0xf9   :  { %v198_v7 = vadd.f32 %v1112_v2, %v197_v5  ;;  %v381_v9 = vpop.f32.mrb[1].mxu0 }
  0xfa   :  { %v753_v10 = vadd.f32 %v666_v6, %v203_v4 }
  0xfb   :  { %v756_v11 = vadd.f32 %v381_v9, %v198_v7  ;;  %v613_v12 = vpop.f32.mrb[2].mxu1 }
  0xfc   :  { %v754_v13 = vadd.f32 %v753_v10, %v1119_v8  ;;  %v213_v14 = vadd.f32 %v613_v12, %v1112_v2  ;;  %v207_v15 = vpop.f32.mrb[3].mxu1  ;;  %v669_v16 = vpop.f32.mrb[2].mxu0 }
  0xfd   :  { %v757_v17 = vadd.f32 %v756_v11, %v1119_v8  ;;  %v208_v18 = vadd.f32 %v1112_v2, %v207_v15  ;;  %v391_v19 = vpop.f32.mrb[3].mxu0 }
  0xfe   :  { %477 = vst [vmem:[#allocation2 + $0x8] sm:$0xff] %v754_v13  ;;  %v759_v20 = vadd.f32 %v1119_v8, %v213_v14 }
  0xff   :  { %476 = vst [vmem:[#allocation2] sm:$0xff] %v757_v17  ;;  %v616_v21 = vpop.f32.mrb[4].mxu1  ;;  %v762_v22 = vadd.f32 %v1119_v8, %v208_v18 }
 0x100   :  { %v760_v23 = vadd.f32 %v759_v20, %v669_v16  ;;  %v223_v24 = vadd.f32 %v616_v21, %v1112_v2  ;;  %v217_v25 = vpop.f32.mrb[5].mxu1  ;;  %v672_v26 = vpop.f32.mrb[4].mxu0 }
 0x101   :  { %v763_v27 = vadd.f32 %v762_v22, %v391_v19  ;;  %v218_v28 = vadd.f32 %v1112_v2, %v217_v25  ;;  %v401_v31 = vpop.f32.mrb[5].mxu0 }
 0x102   :  { %479 = vst [vmem:[#allocation2 + $0x18] sm:$0xff] %v760_v23  ;;  %v765_v32 = vadd.f32 %v1119_v8, %v223_v24 }
 0x103   :  { %478 = vst [vmem:[#allocation2 + $0x10] sm:$0xff] %v763_v27  ;;  %v619_v33 = vpop.f32.mrb[6].mxu1  ;;  %v768_v34 = vadd.f32 %v1119_v8, %v218_v28 }
 0x104   :  { %v766_v35 = vadd.f32 %v765_v32, %v672_v26  ;;  %v233_v36 = vadd.f32 %v619_v33, %v1112_v2  ;;  %v227_v37 = vpop.f32.mrb[7].mxu1  ;;  %v675_v38 = vpop.f32.mrb[6].mxu0 }
 0x105   :  { %v769_v39 = vadd.f32 %v768_v34, %v401_v31  ;;  %v228_v40 = vadd.f32 %v1112_v2, %v227_v37  ;;  %v411_v41 = vpop.f32.mrb[7].mxu0 }
 0x106   :  { %481 = vst [vmem:[#allocation2 + $0x28] sm:$0xff] %v766_v35  ;;  %v771_v42 = vadd.f32 %v1119_v8, %v233_v36 }
 0x107   :  { %480 = vst [vmem:[#allocation2 + $0x20] sm:$0xff] %v769_v39  ;;  %v622_v43 = vpop.f32.mrb[8].mxu1  ;;  %v774_v44 = vadd.f32 %v1119_v8, %v228_v40 }
 0x108   :  { %v772_v45 = vadd.f32 %v771_v42, %v675_v38  ;;  %v243_v46 = vadd.f32 %v622_v43, %v1112_v2  ;;  %v237_v47 = vpop.f32.mrb[9].mxu1  ;;  %v678_v48 = vpop.f32.mrb[8].mxu0 }
 0x109   :  { %v775_v49 = vadd.f32 %v774_v44, %v411_v41  ;;  %v238_v50 = vadd.f32 %v1112_v2, %v237_v47  ;;  %v421_v51 = vpop.f32.mrb[9].mxu0 }
 0x10a   :  { %483 = vst [vmem:[#allocation2 + $0x38] sm:$0xff] %v772_v45  ;;  %v777_v52 = vadd.f32 %v1119_v8, %v243_v46 }
 0x10b   :  { %482 = vst [vmem:[#allocation2 + $0x30] sm:$0xff] %v775_v49  ;;  %v625_v53 = vpop.f32.mrb[10].mxu1  ;;  %v780_v54 = vadd.f32 %v1119_v8, %v238_v50 }
 0x10c   :  { %v778_v55 = vadd.f32 %v777_v52, %v678_v48  ;;  %v253_v56 = vadd.f32 %v625_v53, %v1112_v2  ;;  %v247_v57 = vpop.f32.mrb[11].mxu1  ;;  %v681_v58 = vpop.f32.mrb[10].mxu0 }
 0x10d   :  { %v781_v59 = vadd.f32 %v780_v54, %v421_v51  ;;  %v248_v60 = vadd.f32 %v1112_v2, %v247_v57  ;;  %v431_v61 = vpop.f32.mrb[11].mxu0 }
 0x10e   :  { %485 = vst [vmem:[#allocation2 + $0x48] sm:$0xff] %v778_v55  ;;  %v783_v62 = vadd.f32 %v1119_v8, %v253_v56 }
 0x10f   :  { %484 = vst [vmem:[#allocation2 + $0x40] sm:$0xff] %v781_v59  ;;  %v628_v29 = vpop.f32.mrb[12].mxu1  ;;  %v786_v63 = vadd.f32 %v1119_v8, %v248_v60 }
 0x110   :  { %v784_v0 = vadd.f32 %v783_v62, %v681_v58  ;;  %v263_v1 = vadd.f32 %v628_v29, %v1112_v2  ;;  %v257_v30 = vpop.f32.mrb[13].mxu1  ;;  %v684_v3 = vpop.f32.mrb[12].mxu0 }
 0x111   :  { %v787_v4 = vadd.f32 %v786_v63, %v431_v61  ;;  %v258_v5 = vadd.f32 %v1112_v2, %v257_v30  ;;  %v441_v6 = vpop.f32.mrb[13].mxu0 }
 0x112   :  { %487 = vst [vmem:[#allocation2 + $0x58] sm:$0xff] %v784_v0  ;;  %v789_v7 = vadd.f32 %v1119_v8, %v263_v1 }
 0x113   :  { %486 = vst [vmem:[#allocation2 + $0x50] sm:$0xff] %v787_v4  ;;  %v631_v9 = vpop.f32.mrb[14].mxu1  ;;  %v792_v10 = vadd.f32 %v1119_v8, %v258_v5 }
 0x114   :  { %v790_v11 = vadd.f32 %v789_v7, %v684_v3  ;;  %v273_v12 = vadd.f32 %v631_v9, %v1112_v2  ;;  %v267_v13 = vpop.f32.mrb[15].mxu1  ;;  %v687_v14 = vpop.f32.mrb[14].mxu0 }
 0x115   :  { %v793_v15 = vadd.f32 %v792_v10, %v441_v6  ;;  %v268_v16 = vadd.f32 %v1112_v2, %v267_v13  ;;  %v451_v17 = vpop.f32.mrb[15].mxu0 }
 0x116   :  { %489 = vst [vmem:[#allocation2 + $0x68] sm:$0xff] %v790_v11  ;;  %v795_v18 = vadd.f32 %v1119_v8, %v273_v12 }
 0x117   :  { %488 = vst [vmem:[#allocation2 + $0x60] sm:$0xff] %v793_v15  ;;  %v798_v19 = vadd.f32 %v1119_v8, %v268_v16 }
 0x118   :  { %v796_v20 = vadd.f32 %v795_v18, %v687_v14 }
 0x119   :  { %v799_v21 = vadd.f32 %v798_v19, %v451_v17 }
 0x11a   :  { %491 = vst [vmem:[#allocation2 + $0x78] sm:$0xff] %v796_v20 }
 0x11b   :  { %490 = vst [vmem:[#allocation2 + $0x70] sm:$0xff] %v799_v21 }
 0x11c   :  { %814 = shalt.err (!%p811_p4)
}
 0x11d   :  { %s815_s18 = scalar_lea.hbm %s1171_s8, 2048 }
 0x11e   :  { %p816_p5 = scmp.ne.s32.totalorder %s1171_s8, %s815_s18  ;;  %p819_p6 = scmp.lt.u32.totalorder %s815_s18, %s1171_s8 }
 0x120   :  { %p821_p7 = pnand %p819_p6, %p816_p5 }
 0x122   :  { %824 = shalt.err (!%p821_p7)
}
 0x123   :  { %s828_s23 = smov 128   ;;  %s829_s24 = smov 8  }
 0x124   :  { %503 = dma.vmem_to_hbm [thread:$0]  %s498_s5, 2048, %s1171_s8, [#allocation3], %s828_s23, %s828_s23, %s829_s24  }
 0x125   :  { %825 = dma.done.wait [#allocation3], 2048  }
 0x126   :  { %826 = vsyncadd [#allocation3], 4294965248 }
 0x127   :  { %507 = vsyncpa [#allocation3], 1 }

// kernel: bottleneck_v2_forward.8
= control target key start
LH: loop header
LB: loop body
LE: loop exit
PB: predicated region body
PF: predicated region fallthrough
CT: control target
= control target key end

     0   :  { %s2738_s12 = smov 0   ;;  %s3342_s0 = inlined_call_operand.vmem [shape: f32[2,6,9,8,128], index: 0, kind: input, shape index: {}]   ;;  %s3343_s1 = inlined_call_operand.vmem [shape: f32[9,128,128], index: 1, kind: input, shape index: {}]   ;;  %s3344_s2 = inlined_call_operand.vmem [shape: f32[2,8,8,128], index: 2, kind: output, shape index: {0}]   ;;  %s3345_s3 = inlined_call_operand.vmem [shape: f32[2,128], index: 3, kind: output, shape index: {1}]  }
   0x1 LB: > { %s2744_s13 = sadd.s32 4294967295, %s2715_s12   ;;  %p1519_p0 = scmp.ge.s32.totalorder %s2715_s12, 1  ;;  %s2715_s12 = sphi %s2738_s12, %s14_s12  }
   0x2   : > { %p135_p1 = scmp.lt.s32.totalorder %s2715_s12, 3 }
   0x4   : > { %p136_p2 = pnand %p1519_p0, %p135_p1 }
   0x5   : > { %v1531_v0 = vld [vmem:[%s3343_s1 + $0x80] sm:$0xff] (!%p136_p2)  ;;  %v1532_v1 = vld [vmem:[%s3343_s1 + $0x88] sm:$0xff] (!%p136_p2)  ;;  %p159_p3 = scmp.lt.s32.totalorder (!%p136_p2), %s2744_s13, 1  ;;  %v1533_v5 = vld [vmem:[%s3343_s1 + $0x90] sm:$0xff] (!%p136_p2)  ;;  %p1715_p4 = scmp.ne.s32.totalorder (!%p136_p2), %s2744_s13, 0 }
   0x6   : > { %139 = sbr.rel (%p136_p2) target bundleno = 421 (0x1a5), region = 28  ;;  %v1603_v2 = vld [vmem:[%s3343_s1 + $0x200] sm:$0xff] (!%p136_p2)  ;;  %v2331_v3 = vpack.c.bf16 (!%p136_p2), %v1532_v1, %v1531_v0  ;;  %v1604_v4 = vld [vmem:[%s3343_s1 + $0x208] sm:$0xff] (!%p136_p2)  ;;  %v1534_v6 = vld [vmem:[%s3343_s1 + $0x98] sm:$0xff] (!%p136_p2) }
   0x7   : > { %v2459_v7 = vpack.c.bf16 (!%p136_p2), %v1604_v4, %v1603_v2  ;;  %v2335_v8 = vpack.c.bf16 (!%p136_p2), %v1534_v6, %v1533_v5  ;;  %v1605_v9 = vld [vmem:[%s3343_s1 + $0x210] sm:$0xff] (!%p136_p2)  ;;  %v1606_v10 = vld [vmem:[%s3343_s1 + $0x218] sm:$0xff] (!%p136_p2)  ;;  %v1535_v11 = vld [vmem:[%s3343_s1 + $0xa0] sm:$0xff] (!%p136_p2) }
   0x8   : > { %2332 = vmatprep.subr.bf16.mxu1 (!%p136_p2), %v2331_v3  ;;  %v2463_v12 = vpack.c.bf16 (!%p136_p2), %v1606_v10, %v1605_v9  ;;  %v1536_v13 = vld [vmem:[%s3343_s1 + $0xa8] sm:$0xff] (!%p136_p2)  ;;  %v1607_v14 = vld [vmem:[%s3343_s1 + $0x220] sm:$0xff] (!%p136_p2)  ;;  %v1537_v18 = vld [vmem:[%s3343_s1 + $0xb0] sm:$0xff] (!%p136_p2) }
   0x9   : > { %v1608_v15 = vld [vmem:[%s3343_s1 + $0x228] sm:$0xff] (!%p136_p2)  ;;  %2460 = vmatprep.subr.bf16.mxu0 (!%p136_p2), %v2459_v7  ;;  %2334 = vmatpush3.bf16.msra.mxu1 (!%p136_p2), %v2331_v3  ;;  %v2339_v16 = vpack.c.bf16 (!%p136_p2), %v1536_v13, %v1535_v11  ;;  %v1538_v19 = vld [vmem:[%s3343_s1 + $0xb8] sm:$0xff] (!%p136_p2)  ;;  %v1609_v20 = vld [vmem:[%s3343_s1 + $0x230] sm:$0xff] (!%p136_p2) }
   0xa   : > { %2462 = vmatpush3.bf16.msra.mxu0 (!%p136_p2), %v2459_v7  ;;  %2336 = vmatprep.subr.bf16.mxu1 (!%p136_p2), %v2335_v8  ;;  %v2467_v17 = vpack.c.bf16 (!%p136_p2), %v1608_v15, %v1607_v14  ;;  %v1610_v21 = vld [vmem:[%s3343_s1 + $0x238] sm:$0xff] (!%p136_p2)  ;;  %v2343_v22 = vpack.c.bf16 (!%p136_p2), %v1538_v19, %v1537_v18  ;;  %v1539_v24 = vld [vmem:[%s3343_s1 + $0xc0] sm:$0xff] (!%p136_p2)  ;;  %v1540_v25 = vld [vmem:[%s3343_s1 + $0xc8] sm:$0xff] (!%p136_p2) }
   0xb   : > { %2464 = vmatprep.subr.bf16.mxu0 (!%p136_p2), %v2463_v12  ;;  %v2471_v23 = vpack.c.bf16 (!%p136_p2), %v1610_v21, %v1609_v20  ;;  %v1611_v27 = vld [vmem:[%s3343_s1 + $0x240] sm:$0xff] (!%p136_p2)  ;;  %v1612_v28 = vld [vmem:[%s3343_s1 + $0x248] sm:$0xff] (!%p136_p2)  ;;  %v2347_v30 = vpack.c.bf16 (!%p136_p2), %v1540_v25, %v1539_v24  ;;  %v1541_v32 = vld [vmem:[%s3343_s1 + $0xd0] sm:$0xff] (!%p136_p2) }
   0xc   : > { %v2475_v31 = vpack.c.bf16 (!%p136_p2), %v1612_v28, %v1611_v27  ;;  %v1542_v33 = vld [vmem:[%s3343_s1 + $0xd8] sm:$0xff] (!%p136_p2)  ;;  %v1613_v34 = vld [vmem:[%s3343_s1 + $0x250] sm:$0xff] (!%p136_p2)  ;;  %v1543_v38 = vld [vmem:[%s3343_s1 + $0xe0] sm:$0xff] (!%p136_p2) }
   0xd   : > { %s2777_s5 = scalar_select %p159_p3, %s2744_s13, 1  ;;  %2338 = vmatpush3.bf16.msra.mxu1 %v2335_v8  ;;  %v1614_v35 = vld [vmem:[%s3343_s1 + $0x258] sm:$0xff]  ;;  %v2351_v36 = vpack.c.bf16 %v1542_v33, %v1541_v32  ;;  %v1544_v39 = vld [vmem:[%s3343_s1 + $0xe8] sm:$0xff]  ;;  %v1615_v40 = vld [vmem:[%s3343_s1 + $0x260] sm:$0xff] }
   0xe   : > { %2466 = vmatpush3.bf16.msra.mxu0 %v2463_v12  ;;  %2340 = vmatprep.subr.bf16.mxu1 %v2339_v16  ;;  %v2479_v37 = vpack.c.bf16 %v1614_v35, %v1613_v34  ;;  %v1616_v41 = vld [vmem:[%s3343_s1 + $0x268] sm:$0xff]  ;;  %v2355_v42 = vpack.c.bf16 %v1544_v39, %v1543_v38  ;;  %v1545_v44 = vld [vmem:[%s3343_s1 + $0xf0] sm:$0xff]  ;;  %v1546_v45 = vld [vmem:[%s3343_s1 + $0xf8] sm:$0xff] }
   0xf   : > { %s2699_s14 = smul.u32 432, %s2777_s5  ;;  %2468 = vmatprep.subr.bf16.mxu0 %v2467_v17  ;;  %v2483_v43 = vpack.c.bf16 %v1616_v41, %v1615_v40  ;;  %v1617_v46 = vld [vmem:[%s3343_s1 + $0x270] sm:$0xff]  ;;  %v1618_v47 = vld [vmem:[%s3343_s1 + $0x278] sm:$0xff]  ;;  %v2359_v48 = vpack.c.bf16 %v1546_v45, %v1545_v44  ;;  %v177_v50 = vld [vmem:[%s3343_s1] sm:$0xff] }
  0x10   : > { %v2487_v49 = vpack.c.bf16 %v1618_v47, %v1617_v46  ;;  %v178_v51 = vld [vmem:[%s3343_s1 + $0x8] sm:$0xff]  ;;  %v1627_v52 = vld [vmem:[%s3343_s1 + $0x280] sm:$0xff]  ;;  %v179_v56 = vld [vmem:[%s3343_s1 + $0x10] sm:$0xff] }
  0x11   : > { %s2804_s25 = scalar_lea.vmem %s3342_s0, %s2699_s14  ;;  %2342 = vmatpush3.bf16.msra.mxu1 %v2339_v16  ;;  %v1628_v53 = vld [vmem:[%s3343_s1 + $0x288] sm:$0xff]  ;;  %v2363_v54 = vpack.c.bf16 %v178_v51, %v177_v50  ;;  %v180_v57 = vld [vmem:[%s3343_s1 + $0x18] sm:$0xff]  ;;  %v1629_v58 = vld [vmem:[%s3343_s1 + $0x290] sm:$0xff] }
  0x12   : > { %v1523_v26 = vld [vmem:[%s2804_s25 + $0x90] sm:$0xff]  ;;  %v1595_v29 = vld [vmem:[%s2804_s25 + $0xd8] sm:$0xff]  ;;  %2470 = vmatpush3.bf16.msra.mxu0 %v2467_v17  ;;  %2344 = vmatprep.subr.bf16.mxu1 %v2343_v22  ;;  %v2491_v55 = vpack.c.bf16 %v1628_v53, %v1627_v52  ;;  %v1596_v61 = vld [vmem:[%s2804_s25 + $0xe0] sm:$0xff]  ;;  %v2367_v62 = vpack.c.bf16 %v180_v57, %v179_v56 }
  0x13   : > { %1967 = vmatprep.mubr.f32.mxu1 %v1523_v26  ;;  %2143 = vmatprep.mubr.f32.mxu0 %v1595_v29  ;;  %v1630_v59 = vld [vmem:[%s3343_s1 + $0x298] sm:$0xff]  ;;  %v181_v0 = vld [vmem:[%s3343_s1 + $0x20] sm:$0xff]  ;;  %v182_v1 = vld [vmem:[%s3343_s1 + $0x28] sm:$0xff] }
  0x14   : > { %2472 = vmatprep.subr.bf16.mxu0 %v2471_v23  ;;  %v2881_v60 = vld [vmem:[%s2804_s25 + $0x98] sm:$0xff]  ;;  %v2495_v63 = vpack.c.bf16 %v1630_v59, %v1629_v58  ;;  %v1631_v2 = vld [vmem:[%s3343_s1 + $0x2a0] sm:$0xff]  ;;  %v1632_v3 = vld [vmem:[%s3343_s1 + $0x2a8] sm:$0xff]  ;;  %v2371_v7 = vpack.c.bf16 %v182_v1, %v181_v0 }
  0x15   : > { %2346 = vmatpush3.bf16.msra.mxu1 %v2343_v22  ;;  %v2898_v4 = vld [vmem:[%s2804_s25 + $0xa0] sm:$0xff]  ;;  %v1597_v5 = vld [vmem:[%s2804_s25 + $0xe8] sm:$0xff]  ;;  %v1598_v8 = vld [vmem:[%s2804_s25 + $0xf0] sm:$0xff]  ;;  %v2499_v9 = vpack.c.bf16 %v1632_v3, %v1631_v2 }
  0x16   : > { %2474 = vmatpush3.bf16.msra.mxu0 %v2471_v23  ;;  %2348 = vmatprep.subr.bf16.mxu1 %v2347_v30  ;;  %v2902_v6 = vld [vmem:[%s2804_s25 + $0xa8] sm:$0xff]  ;;  %v183_v10 = vld [vmem:[%s3343_s1 + $0x30] sm:$0xff]  ;;  %v184_v11 = vld [vmem:[%s3343_s1 + $0x38] sm:$0xff] }
  0x17   : > { %2476 = vmatprep.subr.bf16.mxu0 %v2475_v31  ;;  %v1633_v12 = vld [vmem:[%s3343_s1 + $0x2b0] sm:$0xff]  ;;  %v1634_v13 = vld [vmem:[%s3343_s1 + $0x2b8] sm:$0xff]  ;;  %v2375_v17 = vpack.c.bf16 %v184_v11, %v183_v10  ;;  %v1600_v18 = vld [vmem:[%s2804_s25 + $0x100] sm:$0xff] }
  0x18   : > { %v2920_v14 = vld [vmem:[%s2804_s25 + $0xb0] sm:$0xff]  ;;  %v1599_v15 = vld [vmem:[%s2804_s25 + $0xf8] sm:$0xff]  ;;  %v2503_v19 = vpack.c.bf16 %v1634_v13, %v1633_v12  ;;  %v185_v20 = vld [vmem:[%s3343_s1 + $0x40] sm:$0xff] }
  0x19   : > { %2350 = vmatpush3.bf16.msra.mxu1 %v2347_v30  ;;  %v2924_v16 = vld [vmem:[%s2804_s25 + $0xb8] sm:$0xff]  ;;  %v186_v21 = vld [vmem:[%s3343_s1 + $0x48] sm:$0xff]  ;;  %v1635_v22 = vld [vmem:[%s3343_s1 + $0x2c0] sm:$0xff] }
  0x1a   : > { %2478 = vmatpush3.bf16.msra.mxu0 %v2475_v31  ;;  %2352 = vmatprep.subr.bf16.mxu1 %v2351_v36  ;;  %v1636_v23 = vld [vmem:[%s3343_s1 + $0x2c8] sm:$0xff]  ;;  %v2942_v24 = vld [vmem:[%s2804_s25 + $0xc0] sm:$0xff]  ;;  %v2379_v27 = vpack.c.bf16 %v186_v21, %v185_v20  ;;  %v1602_v28 = vld [vmem:[%s2804_s25 + $0x110] sm:$0xff] }
  0x1b   : > { %2480 = vmatprep.subr.bf16.mxu0 %v2479_v37  ;;  %v1601_v25 = vld [vmem:[%s2804_s25 + $0x108] sm:$0xff]  ;;  %v2507_v29 = vpack.c.bf16 %v1636_v23, %v1635_v22  ;;  %v187_v30 = vld [vmem:[%s3343_s1 + $0x50] sm:$0xff]  ;;  %v188_v31 = vld [vmem:[%s3343_s1 + $0x58] sm:$0xff] }
  0x1c   : > { %v2946_v26 = vld [vmem:[%s2804_s25 + $0xc8] sm:$0xff]  ;;  %v1637_v32 = vld [vmem:[%s3343_s1 + $0x2d0] sm:$0xff]  ;;  %v1638_v33 = vld [vmem:[%s3343_s1 + $0x2d8] sm:$0xff] }
  0x1d   : > { %2354 = vmatpush3.bf16.msra.mxu1 %v2351_v36  ;;  %v169_v34 = vld [vmem:[%s2804_s25] sm:$0xff]  ;;  %v1619_v35 = vld [vmem:[%s2804_s25 + $0x168] sm:$0xff]  ;;  %v2383_v36 = vpack.c.bf16 %v188_v31, %v187_v30  ;;  %v191_v44 = vld [vmem:[%s3343_s1 + $0x70] sm:$0xff] }
  0x1e   : > { %2482 = vmatpush3.bf16.msra.mxu0 %v2479_v37  ;;  %2356 = vmatprep.subr.bf16.mxu1 %v2355_v42  ;;  %v2511_v37 = vpack.c.bf16 %v1638_v33, %v1637_v32  ;;  %v189_v38 = vld [vmem:[%s3343_s1 + $0x60] sm:$0xff]  ;;  %v190_v39 = vld [vmem:[%s3343_s1 + $0x68] sm:$0xff]  ;;  %v192_v45 = vld [vmem:[%s3343_s1 + $0x78] sm:$0xff] }
  0x1f   : > { %2484 = vmatprep.subr.bf16.mxu0 %v2483_v43  ;;  %v1639_v40 = vld [vmem:[%s3343_s1 + $0x2e0] sm:$0xff]  ;;  %v1640_v41 = vld [vmem:[%s3343_s1 + $0x2e8] sm:$0xff]  ;;  %v1641_v46 = vld [vmem:[%s3343_s1 + $0x2f0] sm:$0xff] }
  0x20   : > { %v1642_v47 = vld [vmem:[%s3343_s1 + $0x2f8] sm:$0xff]  ;;  %v1555_v50 = vld [vmem:[%s3343_s1 + $0x100] sm:$0xff]  ;;  %v1556_v51 = vld [vmem:[%s3343_s1 + $0x108] sm:$0xff] }
  0x21   : > { %2358 = vmatpush3.bf16.msra.mxu1 %v2355_v42  ;;  %v2387_v42 = vpack.c.bf16 %v190_v39, %v189_v38  ;;  %v1651_v52 = vld [vmem:[%s3343_s1 + $0x300] sm:$0xff]  ;;  %v1652_v53 = vld [vmem:[%s3343_s1 + $0x308] sm:$0xff]  ;;  %v1557_v56 = vld [vmem:[%s3343_s1 + $0x110] sm:$0xff] }
  0x22   : > { %2486 = vmatpush3.bf16.msra.mxu0 %v2483_v43  ;;  %2360 = vmatprep.subr.bf16.mxu1 %v2359_v48  ;;  %v2515_v43 = vpack.c.bf16 %v1640_v41, %v1639_v40  ;;  %v1558_v57 = vld [vmem:[%s3343_s1 + $0x118] sm:$0xff]  ;;  %v1653_v58 = vld [vmem:[%s3343_s1 + $0x310] sm:$0xff]  ;;  %v1559_v1 = vld [vmem:[%s3343_s1 + $0x120] sm:$0xff] }
  0x23   : > { %2488 = vmatprep.subr.bf16.mxu0 %v2487_v49  ;;  %v1654_v59 = vld [vmem:[%s3343_s1 + $0x318] sm:$0xff]  ;;  %v1560_v2 = vld [vmem:[%s3343_s1 + $0x128] sm:$0xff]  ;;  %v1655_v3 = vld [vmem:[%s3343_s1 + $0x320] sm:$0xff] }
  0x24   : > { %v2527_v0 = vpack.c.bf16 %v1654_v59, %v1653_v58  ;;  %v2403_v10 = vpack.c.bf16 %v1560_v2, %v1559_v1  ;;  %v1622_v11 = vld [vmem:[%s2804_s25 + $0x180] sm:$0xff]  ;;  %v1561_v13 = vld [vmem:[%s3343_s1 + $0x130] sm:$0xff]  ;;  %v1623_v20 = vld [vmem:[%s2804_s25 + $0x188] sm:$0xff] }
  0x25   : > { %2362 = vmatpush3.bf16.msra.mxu1 %v2359_v48  ;;  %v2391_v48 = vpack.c.bf16 %v192_v45, %v191_v44  ;;  %v3057_v21 = vld [vmem:[%s2804_s25 + $0x28] sm:$0xff]  ;;  %v1624_v23 = vld [vmem:[%s2804_s25 + $0x190] sm:$0xff]  ;;  %v1625_v32 = vld [vmem:[%s2804_s25 + $0x198] sm:$0xff] }
  0x26   : > { %2490 = vmatpush3.bf16.msra.mxu0 %v2487_v49  ;;  %2364 = vmatprep.subr.bf16.mxu1 %v2363_v54  ;;  %v2519_v49 = vpack.c.bf16 %v1642_v47, %v1641_v46  ;;  %v1660_v30 = vld [vmem:[%s3343_s1 + $0x348] sm:$0xff]  ;;  %v3075_v31 = vld [vmem:[%s2804_s25 + $0x30] sm:$0xff]  ;;  %v3079_v33 = vld [vmem:[%s2804_s25 + $0x38] sm:$0xff] }
  0x27   : > { %2492 = vmatprep.subr.bf16.mxu0 %v2491_v55  ;;  %v1566_v38 = vld [vmem:[%s3343_s1 + $0x158] sm:$0xff]  ;;  %v1661_v39 = vld [vmem:[%s3343_s1 + $0x350] sm:$0xff]  ;;  %v1547_v41 = vld [vmem:[%s2804_s25 + $0x120] sm:$0xff] }
  0x28   : > { %1968 = vmatmul.mubr.f32.vlgmr.msra.gmra.mrb[0].mxu1 %v2881_v60  ;;  %v1662_v40 = vld [vmem:[%s3343_s1 + $0x358] sm:$0xff]  ;;  %v1567_v44 = vld [vmem:[%s3343_s1 + $0x160] sm:$0xff]  ;;  %v1568_v45 = vld [vmem:[%s3343_s1 + $0x168] sm:$0xff] }
  0x29   : > { %2366 = vmatpush3.bf16.msra.mxu1 %v2363_v54  ;;  %2144 = vmatmul.mubr.f32.vlgmr.msra.gmra.mrb[0].mxu0 %v1596_v61  ;;  %v2395_v54 = vpack.c.bf16 %v1556_v51, %v1555_v50  ;;  %v3014_v61 = vld [vmem:[%s2804_s25 + $0x8] sm:$0xff]  ;;  %v1663_v46 = vld [vmem:[%s3343_s1 + $0x360] sm:$0xff]  ;;  %v1569_v50 = vld [vmem:[%s3343_s1 + $0x170] sm:$0xff] }
  0x2a   : > { %2494 = vmatpush3.bf16.msra.mxu0 %v2491_v55  ;;  %2368 = vmatprep.subr.bf16.mxu1 %v2367_v62  ;;  %v2523_v55 = vpack.c.bf16 %v1652_v53, %v1651_v52  ;;  %v1664_v47 = vld [vmem:[%s3343_s1 + $0x368] sm:$0xff]  ;;  %v1570_v51 = vld [vmem:[%s3343_s1 + $0x178] sm:$0xff]  ;;  %v1665_v52 = vld [vmem:[%s3343_s1 + $0x370] sm:$0xff] }
  0x2b   : > { %2496 = vmatprep.subr.bf16.mxu0 %v2495_v63  ;;  %1970 = vmatprep.mubr.f32.mxu1 %v2898_v4  ;;  %v1666_v53 = vld [vmem:[%s3343_s1 + $0x378] sm:$0xff]  ;;  %v1675_v58 = vld [vmem:[%s3343_s1 + $0x380] sm:$0xff]  ;;  %v1676_v59 = vld [vmem:[%s3343_s1 + $0x388] sm:$0xff] }
  0x2c   : > { %2146 = vmatprep.mubr.f32.mxu0 %v1597_v5  ;;  %1971 = vmatmul.mubr.f32.gmra.mrb[2].mxu1 %v2902_v6  ;;  %v1656_v5 = vld [vmem:[%s3343_s1 + $0x328] sm:$0xff]  ;;  %v1677_v1 = vld [vmem:[%s3343_s1 + $0x390] sm:$0xff]  ;;  %v1678_v2 = vld [vmem:[%s3343_s1 + $0x398] sm:$0xff] }
  0x2d   : > { %2370 = vmatpush3.bf16.msra.mxu1 %v2367_v62  ;;  %2147 = vmatmul.mubr.f32.gmra.mrb[2].mxu0 %v1598_v8  ;;  %v1620_v62 = vld [vmem:[%s2804_s25 + $0x170] sm:$0xff]  ;;  %v1621_v8 = vld [vmem:[%s2804_s25 + $0x178] sm:$0xff]  ;;  %v2531_v12 = vpack.c.bf16 %v1656_v5, %v1655_v3  ;;  %v3147_v3 = vld [vmem:[%s2804_s25 + $0x128] sm:$0xff] }
  0x2e   : > { %2498 = vmatpush3.bf16.msra.mxu0 %v2495_v63  ;;  %2372 = vmatprep.subr.bf16.mxu1 %v2371_v7  ;;  %v2399_v63 = vpack.c.bf16 %v1558_v57, %v1557_v56  ;;  %v1579_v56 = vld [vmem:[%s3343_s1 + $0x180] sm:$0xff]  ;;  %v1580_v57 = vld [vmem:[%s3343_s1 + $0x188] sm:$0xff] }
  0x2f   : > { %2500 = vmatprep.subr.bf16.mxu0 %v2499_v9  ;;  %1973 = vmatprep.mubr.f32.mxu1 %v2920_v14 }
  0x30   : > { %2149 = vmatprep.mubr.f32.mxu0 %v1599_v15  ;;  %1974 = vmatmul.mubr.f32.gmra.mrb[4].mxu1 %v2924_v16  ;;  %v1562_v15 = vld [vmem:[%s3343_s1 + $0x138] sm:$0xff] }
  0x31   : > { %2374 = vmatpush3.bf16.msra.mxu1 %v2371_v7  ;;  %2150 = vmatmul.mubr.f32.gmra.mrb[4].mxu0 %v1600_v18  ;;  %v3031_v7 = vld [vmem:[%s2804_s25 + $0x10] sm:$0xff]  ;;  %v1658_v18 = vld [vmem:[%s3343_s1 + $0x338] sm:$0xff]  ;;  %v2407_v22 = vpack.c.bf16 %v1562_v15, %v1561_v13  ;;  %v1680_v13 = vld [vmem:[%s3343_s1 + $0x3a8] sm:$0xff] }
  0x32   : > { %2502 = vmatpush3.bf16.msra.mxu0 %v2499_v9  ;;  %2376 = vmatprep.subr.bf16.mxu1 %v2375_v17  ;;  %v3035_v9 = vld [vmem:[%s2804_s25 + $0x18] sm:$0xff]  ;;  %v3163_v15 = vld [vmem:[%s2804_s25 + $0x130] sm:$0xff] }
  0x33   : > { %2504 = vmatprep.subr.bf16.mxu0 %v2503_v19  ;;  %1976 = vmatprep.mubr.f32.mxu1 %v2942_v24 }
  0x34   : > { %2152 = vmatprep.mubr.f32.mxu0 %v1601_v25  ;;  %1977 = vmatmul.mubr.f32.gmra.mrb[6].mxu1 %v2946_v26 }
  0x35   : > { %2378 = vmatpush3.bf16.msra.mxu1 %v2375_v17  ;;  %2153 = vmatmul.mubr.f32.gmra.mrb[6].mxu0 %v1602_v28  ;;  %v1657_v17 = vld [vmem:[%s3343_s1 + $0x330] sm:$0xff]  ;;  %v1564_v28 = vld [vmem:[%s3343_s1 + $0x148] sm:$0xff] }
  0x36   : > { %2506 = vmatpush3.bf16.msra.mxu0 %v2503_v19  ;;  %2380 = vmatprep.subr.bf16.mxu1 %v2379_v27  ;;  %v3053_v19 = vld [vmem:[%s2804_s25 + $0x20] sm:$0xff]  ;;  %v2535_v25 = vpack.c.bf16 %v1658_v18, %v1657_v17  ;;  %v3167_v17 = vld [vmem:[%s2804_s25 + $0x138] sm:$0xff] }
  0x37   : > { %2508 = vmatprep.subr.bf16.mxu0 %v2507_v29  ;;  %2011 = vmatprep.mubr.f32.mxu1 %v169_v34 }
  0x38   : > { %2187 = vmatprep.mubr.f32.mxu0 %v1619_v35  ;;  %v1626_v35 = vld [vmem:[%s2804_s25 + $0x1a0] sm:$0xff] }
  0x39   : > { %2382 = vmatpush3.bf16.msra.mxu1 %v2379_v27  ;;  %v1563_v27 = vld [vmem:[%s3343_s1 + $0x140] sm:$0xff] }
  0x3a   : > { %2510 = vmatpush3.bf16.msra.mxu0 %v2507_v29  ;;  %2384 = vmatprep.subr.bf16.mxu1 %v2383_v36  ;;  %v1659_v29 = vld [vmem:[%s3343_s1 + $0x340] sm:$0xff]  ;;  %v2411_v34 = vpack.c.bf16 %v1564_v28, %v1563_v27  ;;  %v3189_v28 = vld [vmem:[%s2804_s25 + $0x148] sm:$0xff] }
  0x3b   : > { %2512 = vmatprep.subr.bf16.mxu0 %v2511_v37  ;;  %v3185_v27 = vld [vmem:[%s2804_s25 + $0x140] sm:$0xff] }
  0x3d   : > { %2386 = vmatpush3.bf16.msra.mxu1 %v2383_v36  ;;  %v2539_v36 = vpack.c.bf16 %v1660_v30, %v1659_v29 }
  0x3e   : > { %2514 = vmatpush3.bf16.msra.mxu0 %v2511_v37  ;;  %2388 = vmatprep.subr.bf16.mxu1 %v2387_v42  ;;  %v1565_v37 = vld [vmem:[%s3343_s1 + $0x150] sm:$0xff] }
  0x3f   : > { %2516 = vmatprep.subr.bf16.mxu0 %v2515_v43 }
  0x41   : > { %2390 = vmatpush3.bf16.msra.mxu1 %v2387_v42  ;;  %v2415_v42 = vpack.c.bf16 %v1566_v38, %v1565_v37  ;;  %v1650_v38 = vld [vmem:[%s2804_s25 + $0x40] sm:$0xff] }
  0x42   : > { %2518 = vmatpush3.bf16.msra.mxu0 %v2515_v43  ;;  %2392 = vmatprep.subr.bf16.mxu1 %v2391_v48  ;;  %v2543_v43 = vpack.c.bf16 %v1662_v40, %v1661_v39  ;;  %v1590_v40 = vld [vmem:[%s3343_s1 + $0x1d8] sm:$0xff] }
  0x43   : > { %2520 = vmatprep.subr.bf16.mxu0 %v2519_v49 }
  0x45   : > { %2394 = vmatpush3.bf16.msra.mxu1 %v2391_v48  ;;  %v2419_v48 = vpack.c.bf16 %v1568_v45, %v1567_v44  ;;  %v1591_v45 = vld [vmem:[%s3343_s1 + $0x1e0] sm:$0xff] }
  0x46   : > { %2522 = vmatpush3.bf16.msra.mxu0 %v2519_v49  ;;  %2396 = vmatprep.subr.bf16.mxu1 %v2395_v54  ;;  %v2547_v49 = vpack.c.bf16 %v1664_v47, %v1663_v46  ;;  %v1592_v46 = vld [vmem:[%s3343_s1 + $0x1e8] sm:$0xff] }
  0x47   : > { %2524 = vmatprep.subr.bf16.mxu0 %v2523_v55  ;;  %v1688_v47 = vld [vmem:[%s3343_s1 + $0x3e8] sm:$0xff] }
  0x48   : > { %2012 = vmatmul.mubr.f32.vlgmr.msra.gmra.mrb[0].mxu1 %v3014_v61 }
  0x49   : > { %2398 = vmatpush3.bf16.msra.mxu1 %v2395_v54  ;;  %2188 = vmatmul.mubr.f32.vlgmr.msra.gmra.mrb[0].mxu0 %v1620_v62  ;;  %v2423_v54 = vpack.c.bf16 %v1570_v51, %v1569_v50  ;;  %v2555_v62 = vpack.c.bf16 %v1676_v59, %v1675_v58  ;;  %v1593_v50 = vld [vmem:[%s3343_s1 + $0x1f0] sm:$0xff]  ;;  %v1594_v51 = vld [vmem:[%s3343_s1 + $0x1f8] sm:$0xff] }
  0x4a   : > { %2526 = vmatpush3.bf16.msra.mxu0 %v2523_v55  ;;  %2400 = vmatprep.subr.bf16.mxu1 %v2399_v63  ;;  %v2551_v55 = vpack.c.bf16 %v1666_v53, %v1665_v52  ;;  %v1689_v52 = vld [vmem:[%s3343_s1 + $0x3f0] sm:$0xff]  ;;  %v2455_v53 = vpack.c.bf16 %v1594_v51, %v1593_v50  ;;  %v1702_v59 = vld [vmem:[%s3343_s1 + $0x418] sm:$0xff] }
  0x4b   : > { %2528 = vmatprep.subr.bf16.mxu0 %v2527_v0  ;;  %2014 = vmatprep.mubr.f32.mxu1 %v3031_v7  ;;  %v1701_v58 = vld [vmem:[%s3343_s1 + $0x410] sm:$0xff] }
  0x4c   : > { %2190 = vmatprep.mubr.f32.mxu0 %v1621_v8  ;;  %2015 = vmatmul.mubr.f32.gmra.mrb[2].mxu1 %v3035_v9  ;;  %v2559_v8 = vpack.c.bf16 %v1678_v2, %v1677_v1  ;;  %v1704_v1 = vld [vmem:[%s3343_s1 + $0x428] sm:$0xff]  ;;  %v1574_v2 = vld [vmem:[%s2804_s25 + $0x60] sm:$0xff] }
  0x4d   : > { %2402 = vmatpush3.bf16.msra.mxu1 %v2399_v63  ;;  %2191 = vmatmul.mubr.f32.gmra.mrb[2].mxu0 %v1622_v11  ;;  %v1581_v63 = vld [vmem:[%s3343_s1 + $0x190] sm:$0xff]  ;;  %v1584_v11 = vld [vmem:[%s3343_s1 + $0x1a8] sm:$0xff] }
  0x4e   : > { %2530 = vmatpush3.bf16.msra.mxu0 %v2527_v0  ;;  %2404 = vmatprep.subr.bf16.mxu1 %v2403_v10  ;;  %v1582_v0 = vld [vmem:[%s3343_s1 + $0x198] sm:$0xff] }
  0x4f   : > { %2532 = vmatprep.subr.bf16.mxu0 %v2531_v12  ;;  %2017 = vmatprep.mubr.f32.mxu1 %v3053_v19  ;;  %v2431_v5 = vpack.c.bf16 %v1582_v0, %v1581_v63  ;;  %v2591_v63 = vpack.c.bf16 %v1702_v59, %v1701_v58  ;;  %v1703_v0 = vld [vmem:[%s3343_s1 + $0x420] sm:$0xff] }
  0x50   : > { %2193 = vmatprep.mubr.f32.mxu0 %v1623_v20  ;;  %2018 = vmatmul.mubr.f32.gmra.mrb[4].mxu1 %v3057_v21 }
  0x51   : > { %2406 = vmatpush3.bf16.msra.mxu1 %v2403_v10  ;;  %2194 = vmatmul.mubr.f32.gmra.mrb[4].mxu0 %v1624_v23  ;;  %v1583_v10 = vld [vmem:[%s3343_s1 + $0x1a0] sm:$0xff]  ;;  %v1586_v23 = vld [vmem:[%s3343_s1 + $0x1b8] sm:$0xff] }
  0x52   : > { %2534 = vmatpush3.bf16.msra.mxu0 %v2531_v12  ;;  %2408 = vmatprep.subr.bf16.mxu1 %v2407_v22  ;;  %v1679_v12 = vld [vmem:[%s3343_s1 + $0x3a0] sm:$0xff]  ;;  %v2435_v18 = vpack.c.bf16 %v1584_v11, %v1583_v10  ;;  %v1705_v10 = vld [vmem:[%s3343_s1 + $0x430] sm:$0xff] }
  0x53   : > { %2536 = vmatprep.subr.bf16.mxu0 %v2535_v25  ;;  %2020 = vmatprep.mubr.f32.mxu1 %v3075_v31  ;;  %v2563_v20 = vpack.c.bf16 %v1680_v13, %v1679_v12  ;;  %v1576_v11 = vld [vmem:[%s2804_s25 + $0x70] sm:$0xff]  ;;  %v1707_v13 = vld [vmem:[%s3343_s1 + $0x440] sm:$0xff] }
  0x54   : > { %2196 = vmatprep.mubr.f32.mxu0 %v1625_v32  ;;  %2021 = vmatmul.mubr.f32.gmra.mrb[6].mxu1 %v3079_v33  ;;  %v1588_v32 = vld [vmem:[%s3343_s1 + $0x1c8] sm:$0xff] }
  0x55   : > { %2410 = vmatpush3.bf16.msra.mxu1 %v2407_v22  ;;  %2197 = vmatmul.mubr.f32.gmra.mrb[6].mxu0 %v1626_v35  ;;  %v1585_v22 = vld [vmem:[%s3343_s1 + $0x1b0] sm:$0xff] }
  0x56   : > { %2538 = vmatpush3.bf16.msra.mxu0 %v2535_v25  ;;  %2412 = vmatprep.subr.bf16.mxu1 %v2411_v34  ;;  %v1682_v25 = vld [vmem:[%s3343_s1 + $0x3b8] sm:$0xff]  ;;  %v2439_v29 = vpack.c.bf16 %v1586_v23, %v1585_v22  ;;  %v3207_v35 = vld [vmem:[%s2804_s25 + $0x150] sm:$0xff] }
  0x57   : > { %2540 = vmatprep.subr.bf16.mxu0 %v2539_v36  ;;  %2055 = vmatprep.mubr.f32.mxu1 %v1547_v41  ;;  %v1686_v41 = vld [vmem:[%s3343_s1 + $0x3d8] sm:$0xff]  ;;  %v1709_v22 = vld [vmem:[%s3343_s1 + $0x450] sm:$0xff] }
  0x58   : > { %2231 = vmatprep.mubr.f32.mxu0 %v3014_v61  ;;  %v2427_v61 = vpack.c.bf16 %v1580_v57, %v1579_v56  ;;  %v1700_v56 = vld [vmem:[%s3343_s1 + $0x408] sm:$0xff]  ;;  %v1710_v23 = vld [vmem:[%s3343_s1 + $0x458] sm:$0xff] }
  0x59   : > { %2414 = vmatpush3.bf16.msra.mxu1 %v2411_v34  ;;  %v1684_v34 = vld [vmem:[%s3343_s1 + $0x3c8] sm:$0xff] }
  0x5a   : > { %2542 = vmatpush3.bf16.msra.mxu0 %v2539_v36  ;;  %2416 = vmatprep.subr.bf16.mxu1 %v2415_v42  ;;  %v3211_v36 = vld [vmem:[%s2804_s25 + $0x158] sm:$0xff] }
  0x5b   : > { %2544 = vmatprep.subr.bf16.mxu0 %v2543_v43 }
  0x5d   : > { %2418 = vmatpush3.bf16.msra.mxu1 %v2415_v42  ;;  %v1571_v42 = vld [vmem:[%s2804_s25 + $0x48] sm:$0xff] }
  0x5e   : > { %2546 = vmatpush3.bf16.msra.mxu0 %v2543_v43  ;;  %2420 = vmatprep.subr.bf16.mxu1 %v2419_v48 }
  0x5f   : > { %2548 = vmatprep.subr.bf16.mxu0 %v2547_v49 }
  0x61   : > { %2422 = vmatpush3.bf16.msra.mxu1 %v2419_v48  ;;  %v2451_v48 = vpack.c.bf16 %v1592_v46, %v1591_v45 }
  0x62   : > { %2550 = vmatpush3.bf16.msra.mxu0 %v2547_v49  ;;  %2424 = vmatprep.subr.bf16.mxu1 %v2423_v54 }
  0x63   : > { %2552 = vmatprep.subr.bf16.mxu0 %v2551_v55 }
  0x65   : > { %2426 = vmatpush3.bf16.msra.mxu1 %v2423_v54 }
  0x66   : > { %2554 = vmatpush3.bf16.msra.mxu0 %v2551_v55  ;;  %2428 = vmatprep.subr.bf16.mxu1 %v2427_v61  ;;  %v1699_v55 = vld [vmem:[%s3343_s1 + $0x400] sm:$0xff] }
  0x67   : > { %2556 = vmatprep.subr.bf16.mxu0 %v2555_v62  ;;  %v2587_v57 = vpack.c.bf16 %v1700_v56, %v1699_v55  ;;  %v2717_v56 = vmov (!%p1715_p4), 0.0  }
  0x68   : > { %2056 = vmatmul.mubr.f32.vlgmr.msra.gmra.mrb[0].mxu1 %v3147_v3  ;;  %1414 = vst [vmem:[%s3345_s3] sm:$0x3] (!%p1715_p4), %v2717_v56 }
  0x69   : > { %2430 = vmatpush3.bf16.msra.mxu1 %v2427_v61  ;;  %2232 = vmatmul.mubr.f32.vlgmr.msra.gmra.mrb[0].mxu0 %v3031_v7  ;;  %v1681_v7 = vld [vmem:[%s3343_s1 + $0x3b0] sm:$0xff] }
  0x6a   : > { %2558 = vmatpush3.bf16.msra.mxu0 %v2555_v62  ;;  %2432 = vmatprep.subr.bf16.mxu1 %v2431_v5  ;;  %v2567_v30 = vpack.c.bf16 %v1682_v25, %v1681_v7  ;;  %v1572_v61 = vld [vmem:[%s2804_s25 + $0x50] sm:$0xff]  ;;  %v1573_v62 = vld [vmem:[%s2804_s25 + $0x58] sm:$0xff]  ;;  %v1712_v7 = vld [vmem:[%s3343_s1 + $0x468] sm:$0xff] }
  0x6b   : > { %2560 = vmatprep.subr.bf16.mxu0 %v2559_v8  ;;  %2058 = vmatprep.mubr.f32.mxu1 %v3163_v15 }
  0x6c   : > { %2234 = vmatprep.mubr.f32.mxu0 %v3035_v9  ;;  %2059 = vmatmul.mubr.f32.gmra.mrb[2].mxu1 %v3167_v17  ;;  %v1587_v9 = vld [vmem:[%s3343_s1 + $0x1c0] sm:$0xff] }
  0x6d   : > { %2434 = vmatpush3.bf16.msra.mxu1 %v2431_v5  ;;  %2235 = vmatmul.mubr.f32.gmra.mrb[2].mxu0 %v3053_v19  ;;  %v1683_v19 = vld [vmem:[%s3343_s1 + $0x3c0] sm:$0xff]  ;;  %v2443_v37 = vpack.c.bf16 %v1588_v32, %v1587_v9  ;;  %v1575_v5 = vld [vmem:[%s2804_s25 + $0x68] sm:$0xff] }
  0x6e   : > { %2562 = vmatpush3.bf16.msra.mxu0 %v2559_v8  ;;  %2436 = vmatprep.subr.bf16.mxu1 %v2435_v18  ;;  %v2571_v39 = vpack.c.bf16 %v1684_v34, %v1683_v19  ;;  %v2595_v8 = vpack.c.bf16 %v1704_v1, %v1703_v0 }
  0x6f   : > { %2564 = vmatprep.subr.bf16.mxu0 %v2563_v20  ;;  %2061 = vmatprep.mubr.f32.mxu1 %v3185_v27 }
  0x70   : > { %2237 = vmatprep.mubr.f32.mxu0 %v3057_v21  ;;  %2062 = vmatmul.mubr.f32.gmra.mrb[4].mxu1 %v3189_v28  ;;  %v1589_v21 = vld [vmem:[%s3343_s1 + $0x1d0] sm:$0xff] }
  0x71   : > { %2438 = vmatpush3.bf16.msra.mxu1 %v2435_v18  ;;  %2238 = vmatmul.mubr.f32.gmra.mrb[4].mxu0 %v3075_v31  ;;  %v1685_v31 = vld [vmem:[%s3343_s1 + $0x3d0] sm:$0xff]  ;;  %v2447_v43 = vpack.c.bf16 %v1590_v40, %v1589_v21  ;;  %v1708_v18 = vld [vmem:[%s3343_s1 + $0x448] sm:$0xff] }
  0x72   : > { %2566 = vmatpush3.bf16.msra.mxu0 %v2563_v20  ;;  %2440 = vmatprep.subr.bf16.mxu1 %v2439_v29  ;;  %v2575_v44 = vpack.c.bf16 %v1686_v41, %v1685_v31  ;;  %v2603_v20 = vpack.c.bf16 %v1708_v18, %v1707_v13 }
  0x73   : > { %2568 = vmatprep.subr.bf16.mxu0 %v2567_v30  ;;  %2064 = vmatprep.mubr.f32.mxu1 %v3207_v35 }
  0x74   : > { %2240 = vmatprep.mubr.f32.mxu0 %v3079_v33  ;;  %2065 = vmatmul.mubr.f32.gmra.mrb[6].mxu1 %v3211_v36  ;;  %v1687_v33 = vld [vmem:[%s3343_s1 + $0x3e0] sm:$0xff] }
  0x75   : > { %2442 = vmatpush3.bf16.msra.mxu1 %v2439_v29  ;;  %2241 = vmatmul.mubr.f32.gmra.mrb[6].mxu0 %v1650_v38  ;;  %v2579_v49 = vpack.c.bf16 %v1688_v47, %v1687_v33  ;;  %v1713_v29 = vld [vmem:[%s3343_s1 + $0x470] sm:$0xff] }
  0x76   : > { %2570 = vmatpush3.bf16.msra.mxu0 %v2567_v30  ;;  %2444 = vmatprep.subr.bf16.mxu1 %v2443_v37  ;;  %v1714_v30 = vld [vmem:[%s3343_s1 + $0x478] sm:$0xff] }
  0x77   : > { %2572 = vmatprep.subr.bf16.mxu0 %v2571_v39  ;;  %2099 = vmatprep.mubr.f32.mxu1 %v1571_v42 }
  0x78   : > { %2275 = vmatprep.mubr.f32.mxu0 %v2881_v60  ;;  %v1690_v60 = vld [vmem:[%s3343_s1 + $0x3f8] sm:$0xff] }
  0x79   : > { %2446 = vmatpush3.bf16.msra.mxu1 %v2443_v37  ;;  %v2583_v54 = vpack.c.bf16 %v1690_v60, %v1689_v52 }
  0x7a   : > { %2574 = vmatpush3.bf16.msra.mxu0 %v2571_v39  ;;  %2448 = vmatprep.subr.bf16.mxu1 %v2447_v43 }
  0x7b   : > { %2576 = vmatprep.subr.bf16.mxu0 %v2575_v44 }
  0x7d   : > { %2450 = vmatpush3.bf16.msra.mxu1 %v2447_v43 }
  0x7e   : > { %2578 = vmatpush3.bf16.msra.mxu0 %v2575_v44  ;;  %2452 = vmatprep.subr.bf16.mxu1 %v2451_v48 }
  0x7f   : > { %2580 = vmatprep.subr.bf16.mxu0 %v2579_v49 }
  0x81   : > { %2454 = vmatpush3.bf16.msra.mxu1 %v2451_v48 }
  0x82   : > { %2582 = vmatpush3.bf16.msra.mxu0 %v2579_v49  ;;  %2456 = vmatprep.subr.bf16.mxu1 %v2455_v53 }
  0x83   : > { %2584 = vmatprep.subr.bf16.mxu0 %v2583_v54 }
  0x85   : > { %2458 = vmatpush3.bf16.msra.mxu1 %v2455_v53 }
  0x86   : > { %2586 = vmatpush3.bf16.msra.mxu0 %v2583_v54  ;;  %2619 = vmatprep.subr.bf16.mxu1 %v2587_v57 }
  0x87   : > { %2588 = vmatprep.subr.bf16.mxu0 %v2587_v57 }
  0x88   : > { %2100 = vmatmul.mubr.f32.vlgmr.msra.gmra.mrb[0].mxu1 %v1572_v61 }
  0x89   : > { %2276 = vmatmul.mubr.f32.vlgmr.msra.gmra.mrb[0].mxu0 %v2898_v4  ;;  %2627 = vmatpush3.bf16.msra.mxu1 %v2587_v57  ;;  %v1706_v4 = vld [vmem:[%s3343_s1 + $0x438] sm:$0xff] }
  0x8a   : > { %2590 = vmatpush3.bf16.msra.mxu0 %v2587_v57  ;;  %2102 = vmatprep.mubr.f32.mxu1 %v1573_v62  ;;  %v2599_v12 = vpack.c.bf16 %v1706_v4, %v1705_v10 }
  0x8b   : > { %2278 = vmatprep.mubr.f32.mxu0 %v2902_v6  ;;  %2592 = vmatprep.subr.bf16.mxu0 %v2591_v63  ;;  %v1577_v6 = vld [vmem:[%s2804_s25 + $0x78] sm:$0xff] }
  0x8c   : > { %2103 = vmatmul.mubr.f32.gmra.mrb[2].mxu1 %v1574_v2  ;;  %2620 = vmatprep.subr.bf16.mxu1 %v2591_v63 }
  0x8d   : > { %2279 = vmatmul.mubr.f32.gmra.mrb[2].mxu0 %v2920_v14  ;;  %2628 = vmatpush3.bf16.msra.mxu1 %v2591_v63  ;;  %v1578_v14 = vld [vmem:[%s2804_s25 + $0x80] sm:$0xff] }
  0x8e   : > { %2594 = vmatpush3.bf16.msra.mxu0 %v2591_v63  ;;  %2105 = vmatprep.mubr.f32.mxu1 %v1575_v5 }
  0x8f   : > { %2281 = vmatprep.mubr.f32.mxu0 %v2924_v16  ;;  %2596 = vmatprep.subr.bf16.mxu0 %v2595_v8  ;;  %v1674_v16 = vld [vmem:[%s2804_s25 + $0xd0] sm:$0xff] }
  0x90   : > { %2106 = vmatmul.mubr.f32.gmra.mrb[4].mxu1 %v1576_v11  ;;  %2621 = vmatprep.subr.bf16.mxu1 %v2595_v8 }
  0x91   : > { %2282 = vmatmul.mubr.f32.gmra.mrb[4].mxu0 %v2942_v24  ;;  %2629 = vmatpush3.bf16.msra.mxu1 %v2595_v8  ;;  %v2607_v24 = vpack.c.bf16 %v1710_v23, %v1709_v22 }
  0x92   : > { %2598 = vmatpush3.bf16.msra.mxu0 %v2595_v8  ;;  %2108 = vmatprep.mubr.f32.mxu1 %v1577_v6 }
  0x93   : > { %2284 = vmatprep.mubr.f32.mxu0 %v2946_v26  ;;  %2600 = vmatprep.subr.bf16.mxu0 %v2599_v12  ;;  %v1711_v26 = vld [vmem:[%s3343_s1 + $0x460] sm:$0xff] }
  0x94   : > { %2109 = vmatmul.mubr.f32.gmra.mrb[6].mxu1 %v1578_v14  ;;  %2622 = vmatprep.subr.bf16.mxu1 %v2599_v12  ;;  %v2611_v25 = vpack.c.bf16 %v1712_v7, %v1711_v26 }
  0x95   : > { %2285 = vmatmul.mubr.f32.gmra.mrb[6].mxu0 %v1674_v16  ;;  %2630 = vmatpush3.bf16.msra.mxu1 %v2599_v12 }
  0x96   : > { %2602 = vmatpush3.bf16.msra.mxu0 %v2599_v12  ;;  %2623 = vmatprep.subr.bf16.mxu1 %v2603_v20 }
  0x97   : > { %2604 = vmatprep.subr.bf16.mxu0 %v2603_v20  ;;  %2319 = vmatprep.mubr.f32.mxu0 %v3147_v3  ;;  %v2615_v3 = vpack.c.bf16 %v1714_v30, %v1713_v29 }
  0x98   : > { %2325 = vmatprep.mubr.f32.mxu1 %v3189_v28  ;;  %v1698_v28 = vld [vmem:[%s2804_s25 + $0x160] sm:$0xff]  ;;  %s1718_s25 = sshll.u32 %s2777_s5, 6 }
  0x99   : > { %2631 = vmatpush3.bf16.msra.mxu1 %v2603_v20  ;;  %s168_s4 = scalar_lea.vmem %s3344_s2, %s1718_s25 }
  0x9a   : > { %2606 = vmatpush3.bf16.msra.mxu0 %v2603_v20  ;;  %2624 = vmatprep.subr.bf16.mxu1 %v2607_v24 }
  0x9b   : > { %2608 = vmatprep.subr.bf16.mxu0 %v2607_v24 }
  0x9d   : > { %2632 = vmatpush3.bf16.msra.mxu1 %v2607_v24 }
  0x9e   : > { %2610 = vmatpush3.bf16.msra.mxu0 %v2607_v24  ;;  %2625 = vmatprep.subr.bf16.mxu1 %v2611_v25 }
  0x9f   : > { %2612 = vmatprep.subr.bf16.mxu0 %v2611_v25 }
  0xa1   : > { %2633 = vmatpush3.bf16.msra.mxu1 %v2611_v25 }
  0xa2   : > { %2614 = vmatpush3.bf16.msra.mxu0 %v2611_v25  ;;  %2626 = vmatprep.subr.bf16.mxu1 %v2615_v3 }
  0xa3   : > { %2616 = vmatprep.subr.bf16.mxu0 %v2615_v3 }
  0xa5   : > { %2634 = vmatpush3.bf16.msra.mxu1 %v2615_v3 }
  0xa6   : > { %2618 = vmatpush3.bf16.msra.mxu0 %v2615_v3 }
  0xa8   : > { %2326 = vmatmul.mubr.f32.vlgmr.msra.gmra.mrb[8].mxu1 %v3207_v35 }
  0xa9   : > { %2320 = vmatmul.mubr.f32.vlgmr.msra.gmra.mrb[0].mxu0 %v3163_v15  ;;  %2328 = vmatprep.mubr.f32.mxu1 %v3211_v36 }
  0xaa   : > { %2322 = vmatprep.mubr.f32.mxu0 %v3167_v17 }
  0xac   : > { %2329 = vmatmul.mubr.f32.gmra.mrb[10].mxu1 %v1698_v28 }
  0xad   : > { %2323 = vmatmul.mubr.f32.gmra.mrb[2].mxu0 %v3185_v27 }
 0x15b   : > { %v2101_v9 = vpop.f32.mrb[0].mxu1 }
 0x15c   : > { %v660_v32 = vpop.f32.mrb[1].mxu1 }
 0x15f   : > { %v2104_v19 = vpop.f32.mrb[2].mxu1 }
 0x160   : > { %v670_v34 = vpop.f32.mrb[3].mxu1 }
 0x163   : > { %v2107_v37 = vpop.f32.mrb[4].mxu1 }
 0x164   : > { %v2283_v38 = vpop.f32.mrb[4].mxu0  ;;  %v680_v39 = vpop.f32.mrb[5].mxu1 }
 0x165   : > { %v2639_v21 = vadd.f32 %v2283_v38, %v2107_v37  ;;  %v1236_v35 = vpop.f32.mrb[5].mxu0 }
 0x166   : > { %v2641_v40 = vadd.f32 %v1236_v35, %v680_v39 }
 0x167   : > { %v2110_v15 = vpop.f32.mrb[6].mxu1 }
 0x168   : > { %v2286_v31 = vpop.f32.mrb[6].mxu0  ;;  %v690_v36 = vpop.f32.mrb[7].mxu1 }
 0x169   : > { %v2643_v41 = vadd.f32 %v2286_v31, %v2110_v15  ;;  %v1246_v42 = vpop.f32.mrb[7].mxu0 }
 0x16a   : > { %v2645_v17 = vadd.f32 %v1246_v42, %v690_v36 }
 0x17b   : > { %v2327_v27 = vpop.f32.mrb[8].mxu1 }
 0x17c   : > { %v2321_v43 = vpop.f32.mrb[0].mxu0  ;;  %v2640_v44 = vadd.f32 %v2639_v21, %v2327_v27  ;;  %v1375_v45 = vpop.f32.mrb[9].mxu1 }
 0x17d   : > { %v2635_v46 = vadd.f32 %v2321_v43, %v2101_v9  ;;  %v1355_v33 = vpop.f32.mrb[1].mxu0  ;;  %v2642_v47 = vadd.f32 %v2641_v40, %v1375_v45 }
 0x17e   : > { %1407 = vst [vmem:[%s168_s4 + $0x28] sm:$0xff] %v2640_v44  ;;  %v2636_v48 = vadd.f32 %v1355_v33, %v660_v32  ;;  %1413 = sbr.rel (%p1715_p4) target bundleno = 389 (0x185), region = 32 }
 0x17f   : > { %1403 = vst [vmem:[%s168_s4 + $0x8] sm:$0xff] %v2635_v46  ;;  %1406 = vst [vmem:[%s168_s4 + $0x20] sm:$0xff] %v2642_v47  ;;  %v2330_v49 = vpop.f32.mrb[10].mxu1 }
 0x180   : > { %1402 = vst [vmem:[%s168_s4] sm:$0xff] %v2636_v48  ;;  %v2324_v50 = vpop.f32.mrb[2].mxu0  ;;  %v2644_v51 = vadd.f32 %v2643_v41, %v2330_v49  ;;  %v1385_v52 = vpop.f32.mrb[11].mxu1 }
 0x181   : > { %v2637_v60 = vadd.f32 %v2324_v50, %v2104_v19  ;;  %v1365_v53 = vpop.f32.mrb[3].mxu0  ;;  %v2646_v54 = vadd.f32 %v2645_v17, %v1385_v52 }
 0x182   : > { %1409 = vst [vmem:[%s168_s4 + $0x38] sm:$0xff] %v2644_v51  ;;  %v2638_v55 = vadd.f32 %v1365_v53, %v670_v34 }
 0x183   : > { %1405 = vst [vmem:[%s168_s4 + $0x18] sm:$0xff] %v2637_v60  ;;  %1408 = vst [vmem:[%s168_s4 + $0x30] sm:$0xff] %v2646_v54 }
 0x184   : > { %1404 = vst [vmem:[%s168_s4 + $0x10] sm:$0xff] %v2638_v55 }
 0x185 PF: > { %v1416_v57 = vadd.f32 %v2636_v48, %v2635_v46  ;;  %v1429_v58 = vmul.f32 %v2636_v48, %v2636_v48  ;;  %v1430_v59 = vmul.f32 %v2635_v46, %v2635_v46  ;;  %v1431_v61 = vmul.f32 %v2638_v55, %v2638_v55  ;;  %v1415_v19 = vld [vmem:[%s3345_s3] sm:$0x3] }
 0x186   : > { %v1432_v63 = vmul.f32 %v2637_v60, %v2637_v60  ;;  %v1433_v2 = vmul.f32 %v2642_v47, %v2642_v47  ;;  %v1434_v10 = vmul.f32 %v2640_v44, %v2640_v44  ;;  %v1435_v6 = vmul.f32 %v2646_v54, %v2646_v54 }
 0x187   : > { %v1417_v62 = vadd.f32 %v2638_v55, %v1416_v57  ;;  %v1437_v0 = vadd.f32 %v1430_v59, %v1429_v58  ;;  %v1436_v18 = vmul.f32 %v2644_v51, %v2644_v51  ;;  %vm1450_vm0 = vcmask 1040384  }
 0x189   : > { %v1418_v1 = vadd.f32 %v2637_v60, %v1417_v62  ;;  %v1438_v5 = vadd.f32 %v1437_v0, %v1431_v61 }
 0x18b   : > { %v1419_v8 = vadd.f32 %v2642_v47, %v1418_v1  ;;  %v1439_v4 = vadd.f32 %v1438_v5, %v1432_v63 }
 0x18d   : > { %v1420_v11 = vadd.f32 %v2640_v44, %v1419_v8  ;;  %v1440_v12 = vadd.f32 %v1439_v4, %v1433_v2 }
 0x18f   : > { %v1421_v13 = vadd.f32 %v2646_v54, %v1420_v11  ;;  %v1441_v14 = vadd.f32 %v1440_v12, %v1434_v10 }
 0x191   : > { %v1422_v16 = vadd.f32 %v2644_v51, %v1421_v13  ;;  %v1442_v20 = vadd.f32 %v1441_v14, %v1435_v6 }
 0x193   : > { %v1423_v22 = vrot.slane %v1422_v16, 4  ;;  %v1443_v23 = vadd.f32 %v1442_v20, %v1436_v18 }
 0x195   : > { %v1424_v24 = vadd.f32 %v1423_v22, %v1422_v16  ;;  %v1444_v26 = vrot.slane %v1443_v23, 4 }
 0x197   : > { %v1425_v7 = vrot.slane %v1424_v24, 2  ;;  %v1445_v25 = vadd.f32 %v1444_v26, %v1443_v23 }
 0x199   : > { %v1426_v29 = vadd.f32 %v1425_v7, %v1424_v24  ;;  %v1446_v30 = vrot.slane %v1445_v25, 2 }
 0x19b   : > { %v1427_v3 = vrot.slane %v1426_v29, 1  ;;  %v1447_v28 = vadd.f32 %v1446_v30, %v1445_v25 }
 0x19d   : > { %v1428_v9 = vadd.f32 %v1427_v3, %v1426_v29  ;;  %v1448_v32 = vrot.slane %v1447_v28, 1 }
 0x19f   : > { %v1449_v34 = vadd.f32 %v1448_v32, %v1447_v28 }
 0x1a1   : > { %v1451_v37 = vsel %vm1450_vm0, %v1428_v9, %v1449_v34 }
 0x1a2   : > { %v1452_v38 = vadd.f32 %v1451_v37, %v1415_v19 }
 0x1a4   : > { %1453 = vst [vmem:[%s3345_s3] sm:$0x3] %v1452_v38 }
 0x1a5 PF: > { %s14_s12 = sadd.s32 1, %s2715_s12  }
 0x1a6   : > { %p11_p5 = scmp.ge.s32.totalorder %s14_s12, 4  }
 0x1a8   :  { %13 = sbr.rel (!%p11_p5) target bundleno = 1 (0x1), region = 86 }

</bundles_post_ra>
